<compile_context>
chip_gen: v7x
topology: tpu7x:2x2x1
jax: 0.10.0
libtpu: 0.0.40
codegen_flags: <defaults>
</compile_context>

<pallas_src>
import functools

import jax
import jax.numpy as jnp
from jax.experimental import pallas as pl
from jax.experimental.pallas import tpu as pltpu


# ----------------------------------------------------------------------------- kernel
def _down_fused_kernel(xph_ref, w1t_ref, b1_ref, w2t_ref, b2_ref, o_ref,
                       p1_ref, h1p_ref, p2_ref, *, Ho, Wo, Cin, Cout):
    # xph_ref : (1, 4, Cin, Ho+1, Wo+1) parity phases of the zero-padded input
    #           (phase 2p+q == x_pad[:, p::2, q::2]) for one batch element.
    # w1t_ref : (Cout, 9*Cin)   conv1 weight^T, columns ordered (kh, kw, cin).
    # w2t_ref : (Cout, 9*Cout)  conv2 weight^T, columns ordered (kh, kw, cin).
    # b*_ref  : (Cout, 1) float32 biases.
    # p1_ref  : VMEM (9*Cin, Ho, Wo)     im2col scratch for conv1.
    # h1p_ref : VMEM (Cout, Ho+2, Wo+2)  zero-padded conv1 activation.
    # p2_ref  : VMEM (9*Cout, Ho, Wo)    im2col scratch for conv2.

    # ---- conv1: 3x3 stride-2 pad-1 as ONE im2col matmul (lanes = Wo) ----
    # Tap (kh, kw) reads phase (kh%2, kw%2) at offset (kh//2, kw//2).
    # Ref-windowed loads: no whole-tensor vreg materialization.
    for kh in range(3):
        for kw in range(3):
            t = kh * 3 + kw
            ph = 2 * (kh % 2) + (kw % 2)
            ro, co = kh // 2, kw // 2
            p1_ref[pl.ds(t * Cin, Cin), :, :] = xph_ref[
                0, ph, :, pl.ds(ro, Ho), pl.ds(co, Wo)]
    p1 = p1_ref[...].reshape(9 * Cin, Ho * Wo)
    h1 = jnp.dot(w1t_ref[...], p1, preferred_element_type=jnp.float32)   # (Cout, M)
    h1 = jnp.maximum(h1 + b1_ref[...], 0.0)                # f32 bias + ReLU

    # ---- conv2: 3x3 stride-1 'same' on the VMEM-resident intermediate ----
    # Zero only the 1-pixel border (interior is fully overwritten every step).
    zrow = jnp.zeros((Cout, 1, Wo + 2), h1p_ref.dtype)
    zcol = jnp.zeros((Cout, Ho + 2, 1), h1p_ref.dtype)
    h1p_ref[:, pl.ds(0, 1), :] = zrow
    h1p_ref[:, pl.ds(Ho + 1, 1), :] = zrow
    h1p_ref[:, :, pl.ds(0, 1)] = zcol
    h1p_ref[:, :, pl.ds(Wo + 1, 1)] = zcol
    h1p_ref[:, pl.ds(1, Ho), pl.ds(1, Wo)] = (
        h1.reshape(Cout, Ho, Wo).astype(h1p_ref.dtype))

    for kh in range(3):
        for kw in range(3):
            t = kh * 3 + kw
            p2_ref[pl.ds(t * Cout, Cout), :, :] = h1p_ref[
                :, pl.ds(kh, Ho), pl.ds(kw, Wo)]
    p2 = p2_ref[...].reshape(9 * Cout, Ho * Wo)
    out = jnp.dot(w2t_ref[...], p2, preferred_element_type=jnp.float32)  # (Cout, M)
    out = jnp.maximum(out + b2_ref[...], 0.0)              # f32 bias + ReLU
    o_ref[0] = out.reshape(Cout, Ho, Wo).astype(o_ref.dtype)


# ----------------------------------------------------------------------------- wrapper
def down_forward(x_nchw, params, compute_dtype=jnp.bfloat16):
    """Equivalent of down.forward(x): NCHW input -> NCHW output.

    params: w1 (3,3,Cin,Cout), b1 (Cout,), w2 (3,3,Cout,Cout), b2 (Cout,) in HWIO.
    compute_dtype: dtype fed to the MXU (bf16 recommended on v6e/v7x);
                   accumulation and the bias+ReLU epilogues stay f32.
    """
    N, Cin, H, W = x_nchw.shape
    assert H % 2 == 0 and W % 2 == 0, "down_forward assumes even H, W"
    Cout = params["w1"].shape[-1]
    Ho, Wo = H // 2, W // 2

    # Zero-pad and stack the 4 stride-2 parity phases, channels-major
    # (pure layout glue; phase 2p+q == x_pad[:, :, p::2, q::2]).
    x = x_nchw.astype(compute_dtype)
    xp = jnp.pad(x, ((0, 0), (0, 0), (1, 1), (1, 1)))            # (N, Cin, H+2, W+2)
    xph = xp.reshape(N, Cin, Ho + 1, 2, Wo + 1, 2)
    xph = jnp.transpose(xph, (0, 3, 5, 1, 2, 4)).reshape(N, 4, Cin, Ho + 1, Wo + 1)

    # Host-side im2col weight flattening; columns ordered (kh, kw, cin) to match
    # the in-kernel tap scatter.  W^T orientation -> out = W^T @ patches.
    w1t = params["w1"].astype(compute_dtype).reshape(9 * Cin, Cout).T   # (Cout, 9*Cin)
    w2t = params["w2"].astype(compute_dtype).reshape(9 * Cout, Cout).T  # (Cout, 9*Cout)
    b1 = params["b1"].astype(jnp.float32).reshape(Cout, 1)
    b2 = params["b2"].astype(jnp.float32).reshape(Cout, 1)

    kern = functools.partial(_down_fused_kernel, Ho=Ho, Wo=Wo, Cin=Cin, Cout=Cout)
    out = pl.pallas_call(
        kern,
        out_shape=jax.ShapeDtypeStruct((N, Cout, Ho, Wo), x_nchw.dtype),
        grid_spec=pltpu.PrefetchScalarGridSpec(
            num_scalar_prefetch=0,
            grid=(N,),
            in_specs=[
                pl.BlockSpec((1, 4, Cin, Ho + 1, Wo + 1),
                             lambda n: (n, 0, 0, 0, 0)),
                pl.BlockSpec((Cout, 9 * Cin), lambda n: (0, 0)),
                pl.BlockSpec((Cout, 1), lambda n: (0, 0)),
                pl.BlockSpec((Cout, 9 * Cout), lambda n: (0, 0)),
                pl.BlockSpec((Cout, 1), lambda n: (0, 0)),
            ],
            out_specs=pl.BlockSpec((1, Cout, Ho, Wo), lambda n: (n, 0, 0, 0)),
            scratch_shapes=[
                pltpu.VMEM((9 * Cin, Ho, Wo), compute_dtype),        # conv1 im2col
                pltpu.VMEM((Cout, Ho + 2, Wo + 2), compute_dtype),   # padded conv1 act
                pltpu.VMEM((9 * Cout, Ho, Wo), compute_dtype),       # conv2 im2col
            ],
        ),
        compiler_params=pltpu.CompilerParams(
            dimension_semantics=("parallel",),
            vmem_limit_bytes=64 * 1024 * 1024,   # <= physical VMEM on v5e/v6e/v7x
        ),
    )(xph, w1t, b1, w2t, b2)
    return out   # already NCHW -- no output transpose


# ----------------------------------------------------------------------------- reference
def _ref_down(x_nchw, params):
    x = jnp.transpose(x_nchw, (0, 2, 3, 1))
    y = jax.lax.conv_general_dilated(
        x, params["w1"], window_strides=(2, 2), padding=[(1, 1), (1, 1)],
        dimension_numbers=("NHWC", "HWIO", "NHWC"))
    y = jax.nn.relu(y + params["b1"])
    y = jax.lax.conv_general_dilated(
        y, params["w2"], window_strides=(1, 1), padding=[(1, 1), (1, 1)],
        dimension_numbers=("NHWC", "HWIO", "NHWC"))
    y = jax.nn.relu(y + params["b2"])
    return jnp.transpose(y, (0, 3, 1, 2))


if __name__ == "__main__":
    # down(inChannels=4, outChannels=8, filterSize=3, act=nn.ReLU)
    N, Cin, Cout, H, W = 2, 4, 8, 16, 16

    key = jax.random.PRNGKey(0)
    k1, k2, k3, k4, k5 = jax.random.split(key, 5)
    x = jax.random.normal(k1, (N, Cin, H, W), jnp.float32)

    # Deterministic synthetic parameters (shapes from nn.Conv2d), stored as HWIO.
    w1 = 0.1 * jax.random.normal(k2, (3, 3, Cin, Cout), jnp.float32)
    b1 = 0.1 * jax.random.normal(k3, (Cout,), jnp.float32)
    w2 = 0.1 * jax.random.normal(k4, (3, 3, Cout, Cout), jnp.float32)
    b2 = 0.1 * jax.random.normal(k5, (Cout,), jnp.float32)
    params = dict(w1=w1, b1=b1, w2=w2, b2=b2)

    ref = jax.block_until_ready(_ref_down(x, params))

    # Exact f32 path: tight check against XLA's conv (same cross-correlation
    # semantics as PyTorch Conv2d).
    out_f32 = jax.block_until_ready(down_forward(x, params, compute_dtype=jnp.float32))
    assert out_f32.shape == (N, Cout, H // 2, W // 2), out_f32.shape
    err_f32 = float(jnp.max(jnp.abs(out_f32 - ref)))
    assert err_f32 < 1e-4, err_f32

    # bf16-fed MXU path (v6e/v7x recommendation): loose check vs f32 reference.
    out_bf16 = jax.block_until_ready(down_forward(x, params, compute_dtype=jnp.bfloat16))
    assert out_bf16.shape == (N, Cout, H // 2, W // 2), out_bf16.shape
    err_bf16 = float(jnp.max(jnp.abs(out_bf16 - ref)))
    assert err_bf16 < 5e-2, err_bf16

    print("KERNEL_OK")
</pallas_src>

<mosaic_0001>
module attributes {stable_mosaic.version = 11 : i64} {
  func.func @_down_fused_kernel(%arg0: i32, %arg1: memref<1x4x4x9x9xf32, #tpu.memory_space<vmem>>, %arg2: memref<8x36xf32, #tpu.memory_space<vmem>>, %arg3: memref<8x1xf32, #tpu.memory_space<vmem>>, %arg4: memref<8x72xf32, #tpu.memory_space<vmem>>, %arg5: memref<8x1xf32, #tpu.memory_space<vmem>>, %arg6: memref<1x8x8x8xf32, #tpu.memory_space<vmem>>, %arg7: memref<36x8x8xf32, #tpu.memory_space<vmem>>, %arg8: memref<8x10x10xf32, #tpu.memory_space<vmem>>, %arg9: memref<72x8x8xf32, #tpu.memory_space<vmem>>) attributes {dimension_semantics = [#tpu.dimension_semantics<parallel>], iteration_bounds = array<i64: 2>, scalar_prefetch = 0 : i64, scratch_operands = 3 : i64, tpu.core_type = #tpu.core_type<tc>, window_params = [{transform_indices = @transform_0, window_bounds = array<i64: 1, 4, 4, 9, 9>}, {pipeline_mode = #tpu.pipeline_mode<synchronous>, transform_indices = @transform_1, window_bounds = array<i64: 8, 36>}, {pipeline_mode = #tpu.pipeline_mode<synchronous>, transform_indices = @transform_2, window_bounds = array<i64: 8, 1>}, {pipeline_mode = #tpu.pipeline_mode<synchronous>, transform_indices = @transform_3, window_bounds = array<i64: 8, 72>}, {pipeline_mode = #tpu.pipeline_mode<synchronous>, transform_indices = @transform_4, window_bounds = array<i64: 8, 1>}, {transform_indices = @transform_5, window_bounds = array<i64: 1, 8, 8, 8>}]} {
    %c0 = arith.constant 0 : index
    %c0_0 = arith.constant 0 : index
    %c0_1 = arith.constant 0 : index
    %c0_2 = arith.constant 0 : index
    %c0_3 = arith.constant 0 : index
    %0 = vector.load %arg1[%c0, %c0_0, %c0_1, %c0_2, %c0_3] : memref<1x4x4x9x9xf32, #tpu.memory_space<vmem>>, vector<1x1x4x8x8xf32>
    %1 = vector.shape_cast %0 : vector<1x1x4x8x8xf32> to vector<4x8x8xf32>
    %c0_4 = arith.constant 0 : index
    %c0_5 = arith.constant 0 : index
    %c0_6 = arith.constant 0 : index
    %2 = vector.load %arg7[%c0_4, %c0_5, %c0_6] : memref<36x8x8xf32, #tpu.memory_space<vmem>>, vector<4x8x8xf32>
    tpu.vector_store %arg7[%c0_4, %c0_5, %c0_6], %1 {strides = array<i32>} : memref<36x8x8xf32, #tpu.memory_space<vmem>>, vector<4x8x8xf32>,
    %c0_7 = arith.constant 0 : index
    %c1 = arith.constant 1 : index
    %c0_8 = arith.constant 0 : index
    %c0_9 = arith.constant 0 : index
    %c0_10 = arith.constant 0 : index
    %3 = vector.load %arg1[%c0_7, %c1, %c0_8, %c0_9, %c0_10] : memref<1x4x4x9x9xf32, #tpu.memory_space<vmem>>, vector<1x1x4x8x8xf32>
    %4 = vector.shape_cast %3 : vector<1x1x4x8x8xf32> to vector<4x8x8xf32>
    %c4 = arith.constant 4 : index
    %c0_11 = arith.constant 0 : index
    %c0_12 = arith.constant 0 : index
    %5 = vector.load %arg7[%c4, %c0_11, %c0_12] : memref<36x8x8xf32, #tpu.memory_space<vmem>>, vector<4x8x8xf32>
    tpu.vector_store %arg7[%c4, %c0_11, %c0_12], %4 {strides = array<i32>} : memref<36x8x8xf32, #tpu.memory_space<vmem>>, vector<4x8x8xf32>,
    %c0_13 = arith.constant 0 : index
    %c0_14 = arith.constant 0 : index
    %c0_15 = arith.constant 0 : index
    %c0_16 = arith.constant 0 : index
    %c1_17 = arith.constant 1 : index
    %6 = vector.load %arg1[%c0_13, %c0_14, %c0_15, %c0_16, %c1_17] : memref<1x4x4x9x9xf32, #tpu.memory_space<vmem>>, vector<1x1x4x8x8xf32>
    %7 = vector.shape_cast %6 : vector<1x1x4x8x8xf32> to vector<4x8x8xf32>
    %c8 = arith.constant 8 : index
    %c0_18 = arith.constant 0 : index
    %c0_19 = arith.constant 0 : index
    %8 = vector.load %arg7[%c8, %c0_18, %c0_19] : memref<36x8x8xf32, #tpu.memory_space<vmem>>, vector<4x8x8xf32>
    tpu.vector_store %arg7[%c8, %c0_18, %c0_19], %7 {strides = array<i32>} : memref<36x8x8xf32, #tpu.memory_space<vmem>>, vector<4x8x8xf32>,
    %c0_20 = arith.constant 0 : index
    %c2 = arith.constant 2 : index
    %c0_21 = arith.constant 0 : index
    %c0_22 = arith.constant 0 : index
    %c0_23 = arith.constant 0 : index
    %9 = vector.load %arg1[%c0_20, %c2, %c0_21, %c0_22, %c0_23] : memref<1x4x4x9x9xf32, #tpu.memory_space<vmem>>, vector<1x1x4x8x8xf32>
    %10 = vector.shape_cast %9 : vector<1x1x4x8x8xf32> to vector<4x8x8xf32>
    %c12 = arith.constant 12 : index
    %c0_24 = arith.constant 0 : index
    %c0_25 = arith.constant 0 : index
    %11 = vector.load %arg7[%c12, %c0_24, %c0_25] : memref<36x8x8xf32, #tpu.memory_space<vmem>>, vector<4x8x8xf32>
    tpu.vector_store %arg7[%c12, %c0_24, %c0_25], %10 {strides = array<i32>} : memref<36x8x8xf32, #tpu.memory_space<vmem>>, vector<4x8x8xf32>,
    %c0_26 = arith.constant 0 : index
    %c3 = arith.constant 3 : index
    %c0_27 = arith.constant 0 : index
    %c0_28 = arith.constant 0 : index
    %c0_29 = arith.constant 0 : index
    %12 = vector.load %arg1[%c0_26, %c3, %c0_27, %c0_28, %c0_29] : memref<1x4x4x9x9xf32, #tpu.memory_space<vmem>>, vector<1x1x4x8x8xf32>
    %13 = vector.shape_cast %12 : vector<1x1x4x8x8xf32> to vector<4x8x8xf32>
    %c16 = arith.constant 16 : index
    %c0_30 = arith.constant 0 : index
    %c0_31 = arith.constant 0 : index
    %14 = vector.load %arg7[%c16, %c0_30, %c0_31] : memref<36x8x8xf32, #tpu.memory_space<vmem>>, vector<4x8x8xf32>
    tpu.vector_store %arg7[%c16, %c0_30, %c0_31], %13 {strides = array<i32>} : memref<36x8x8xf32, #tpu.memory_space<vmem>>, vector<4x8x8xf32>,
    %c0_32 = arith.constant 0 : index
    %c2_33 = arith.constant 2 : index
    %c0_34 = arith.constant 0 : index
    %c0_35 = arith.constant 0 : index
    %c1_36 = arith.constant 1 : index
    %15 = vector.load %arg1[%c0_32, %c2_33, %c0_34, %c0_35, %c1_36] : memref<1x4x4x9x9xf32, #tpu.memory_space<vmem>>, vector<1x1x4x8x8xf32>
    %16 = vector.shape_cast %15 : vector<1x1x4x8x8xf32> to vector<4x8x8xf32>
    %c20 = arith.constant 20 : index
    %c0_37 = arith.constant 0 : index
    %c0_38 = arith.constant 0 : index
    %17 = vector.load %arg7[%c20, %c0_37, %c0_38] : memref<36x8x8xf32, #tpu.memory_space<vmem>>, vector<4x8x8xf32>
    tpu.vector_store %arg7[%c20, %c0_37, %c0_38], %16 {strides = array<i32>} : memref<36x8x8xf32, #tpu.memory_space<vmem>>, vector<4x8x8xf32>,
    %c0_39 = arith.constant 0 : index
    %c0_40 = arith.constant 0 : index
    %c0_41 = arith.constant 0 : index
    %c1_42 = arith.constant 1 : index
    %c0_43 = arith.constant 0 : index
    %18 = vector.load %arg1[%c0_39, %c0_40, %c0_41, %c1_42, %c0_43] : memref<1x4x4x9x9xf32, #tpu.memory_space<vmem>>, vector<1x1x4x8x8xf32>
    %19 = vector.shape_cast %18 : vector<1x1x4x8x8xf32> to vector<4x8x8xf32>
    %c24 = arith.constant 24 : index
    %c0_44 = arith.constant 0 : index
    %c0_45 = arith.constant 0 : index
    %20 = vector.load %arg7[%c24, %c0_44, %c0_45] : memref<36x8x8xf32, #tpu.memory_space<vmem>>, vector<4x8x8xf32>
    tpu.vector_store %arg7[%c24, %c0_44, %c0_45], %19 {strides = array<i32>} : memref<36x8x8xf32, #tpu.memory_space<vmem>>, vector<4x8x8xf32>,
    %c0_46 = arith.constant 0 : index
    %c1_47 = arith.constant 1 : index
    %c0_48 = arith.constant 0 : index
    %c1_49 = arith.constant 1 : index
    %c0_50 = arith.constant 0 : index
    %21 = vector.load %arg1[%c0_46, %c1_47, %c0_48, %c1_49, %c0_50] : memref<1x4x4x9x9xf32, #tpu.memory_space<vmem>>, vector<1x1x4x8x8xf32>
    %22 = vector.shape_cast %21 : vector<1x1x4x8x8xf32> to vector<4x8x8xf32>
    %c28 = arith.constant 28 : index
    %c0_51 = arith.constant 0 : index
    %c0_52 = arith.constant 0 : index
    %23 = vector.load %arg7[%c28, %c0_51, %c0_52] : memref<36x8x8xf32, #tpu.memory_space<vmem>>, vector<4x8x8xf32>
    tpu.vector_store %arg7[%c28, %c0_51, %c0_52], %22 {strides = array<i32>} : memref<36x8x8xf32, #tpu.memory_space<vmem>>, vector<4x8x8xf32>,
    %c0_53 = arith.constant 0 : index
    %c0_54 = arith.constant 0 : index
    %c0_55 = arith.constant 0 : index
    %c1_56 = arith.constant 1 : index
    %c1_57 = arith.constant 1 : index
    %24 = vector.load %arg1[%c0_53, %c0_54, %c0_55, %c1_56, %c1_57] : memref<1x4x4x9x9xf32, #tpu.memory_space<vmem>>, vector<1x1x4x8x8xf32>
    %25 = vector.shape_cast %24 : vector<1x1x4x8x8xf32> to vector<4x8x8xf32>
    %c32 = arith.constant 32 : index
    %c0_58 = arith.constant 0 : index
    %c0_59 = arith.constant 0 : index
    %26 = vector.load %arg7[%c32, %c0_58, %c0_59] : memref<36x8x8xf32, #tpu.memory_space<vmem>>, vector<4x8x8xf32>
    tpu.vector_store %arg7[%c32, %c0_58, %c0_59], %25 {strides = array<i32>} : memref<36x8x8xf32, #tpu.memory_space<vmem>>, vector<4x8x8xf32>,
    %c0_60 = arith.constant 0 : index
    %c0_61 = arith.constant 0 : index
    %c0_62 = arith.constant 0 : index
    %27 = vector.load %arg7[%c0_60, %c0_61, %c0_62] : memref<36x8x8xf32, #tpu.memory_space<vmem>>, vector<36x8x8xf32>
    %28 = vector.shape_cast %27 : vector<36x8x8xf32> to vector<36x64xf32>
    %c0_63 = arith.constant 0 : index
    %c0_64 = arith.constant 0 : index
    %29 = vector.load %arg2[%c0_63, %c0_64] : memref<8x36xf32, #tpu.memory_space<vmem>>, vector<8x36xf32>
    %cst = arith.constant dense<0.000000e+00> : vector<8x64xf32>
    %30 = tpu.matmul %29, %28, %cst {dimension_numbers = #tpu.dot_dimension_numbers<[1], [0], [0], [1], [0, 0, 1, 1], [], []>} : vector<8x36xf32>, vector<36x64xf32>, vector<8x64xf32> -> vector<8x64xf32>
    %c0_65 = arith.constant 0 : index
    %c0_66 = arith.constant 0 : index
    %31 = vector.load %arg3[%c0_65, %c0_66] : memref<8x1xf32, #tpu.memory_space<vmem>>, vector<8x1xf32>
    %32 = vector.broadcast %31 : vector<8x1xf32> to vector<8x64xf32>
    %33 = arith.addf %30, %32 : vector<8x64xf32>
    %cst_67 = arith.constant 0.000000e+00 : f32
    %34 = vector.broadcast %cst_67 : f32 to vector<8x64xf32>
    %35 = arith.maximumf %33, %34 : vector<8x64xf32>
    %cst_68 = arith.constant 0.000000e+00 : f32
    %36 = vector.broadcast %cst_68 : f32 to vector<8x1x10xf32>
    %cst_69 = arith.constant 0.000000e+00 : f32
    %37 = vector.broadcast %cst_69 : f32 to vector<8x10x1xf32>
    %c0_70 = arith.constant 0 : index
    %c0_71 = arith.constant 0 : index
    %c0_72 = arith.constant 0 : index
    %38 = vector.load %arg8[%c0_70, %c0_71, %c0_72] : memref<8x10x10xf32, #tpu.memory_space<vmem>>, vector<8x1x10xf32>
    tpu.vector_store %arg8[%c0_70, %c0_71, %c0_72], %36 {strides = array<i32>} : memref<8x10x10xf32, #tpu.memory_space<vmem>>, vector<8x1x10xf32>,
    %c0_73 = arith.constant 0 : index
    %c9 = arith.constant 9 : index
    %c0_74 = arith.constant 0 : index
    %39 = vector.load %arg8[%c0_73, %c9, %c0_74] : memref<8x10x10xf32, #tpu.memory_space<vmem>>, vector<8x1x10xf32>
    tpu.vector_store %arg8[%c0_73, %c9, %c0_74], %36 {strides = array<i32>} : memref<8x10x10xf32, #tpu.memory_space<vmem>>, vector<8x1x10xf32>,
    %c0_75 = arith.constant 0 : index
    %c0_76 = arith.constant 0 : index
    %c0_77 = arith.constant 0 : index
    %40 = vector.load %arg8[%c0_75, %c0_76, %c0_77] : memref<8x10x10xf32, #tpu.memory_space<vmem>>, vector<8x10x1xf32>
    tpu.vector_store %arg8[%c0_75, %c0_76, %c0_77], %37 {strides = array<i32>} : memref<8x10x10xf32, #tpu.memory_space<vmem>>, vector<8x10x1xf32>,
    %c0_78 = arith.constant 0 : index
    %c0_79 = arith.constant 0 : index
    %c9_80 = arith.constant 9 : index
    %41 = vector.load %arg8[%c0_78, %c0_79, %c9_80] : memref<8x10x10xf32, #tpu.memory_space<vmem>>, vector<8x10x1xf32>
    tpu.vector_store %arg8[%c0_78, %c0_79, %c9_80], %37 {strides = array<i32>} : memref<8x10x10xf32, #tpu.memory_space<vmem>>, vector<8x10x1xf32>,
    %42 = vector.shape_cast %35 : vector<8x64xf32> to vector<8x8x8xf32>
    %c0_81 = arith.constant 0 : index
    %c1_82 = arith.constant 1 : index
    %c1_83 = arith.constant 1 : index
    %43 = vector.load %arg8[%c0_81, %c1_82, %c1_83] : memref<8x10x10xf32, #tpu.memory_space<vmem>>, vector<8x8x8xf32>
    tpu.vector_store %arg8[%c0_81, %c1_82, %c1_83], %42 {strides = array<i32>} : memref<8x10x10xf32, #tpu.memory_space<vmem>>, vector<8x8x8xf32>,
    %c0_84 = arith.constant 0 : index
    %c0_85 = arith.constant 0 : index
    %c0_86 = arith.constant 0 : index
    %44 = vector.load %arg8[%c0_84, %c0_85, %c0_86] : memref<8x10x10xf32, #tpu.memory_space<vmem>>, vector<8x8x8xf32>
    %c0_87 = arith.constant 0 : index
    %c0_88 = arith.constant 0 : index
    %c0_89 = arith.constant 0 : index
    %45 = vector.load %arg9[%c0_87, %c0_88, %c0_89] : memref<72x8x8xf32, #tpu.memory_space<vmem>>, vector<8x8x8xf32>
    tpu.vector_store %arg9[%c0_87, %c0_88, %c0_89], %44 {strides = array<i32>} : memref<72x8x8xf32, #tpu.memory_space<vmem>>, vector<8x8x8xf32>,
    %c0_90 = arith.constant 0 : index
    %c0_91 = arith.constant 0 : index
    %c1_92 = arith.constant 1 : index
    %46 = vector.load %arg8[%c0_90, %c0_91, %c1_92] : memref<8x10x10xf32, #tpu.memory_space<vmem>>, vector<8x8x8xf32>
    %c8_93 = arith.constant 8 : index
    %c0_94 = arith.constant 0 : index
    %c0_95 = arith.constant 0 : index
    %47 = vector.load %arg9[%c8_93, %c0_94, %c0_95] : memref<72x8x8xf32, #tpu.memory_space<vmem>>, vector<8x8x8xf32>
    tpu.vector_store %arg9[%c8_93, %c0_94, %c0_95], %46 {strides = array<i32>} : memref<72x8x8xf32, #tpu.memory_space<vmem>>, vector<8x8x8xf32>,
    %c0_96 = arith.constant 0 : index
    %c0_97 = arith.constant 0 : index
    %c2_98 = arith.constant 2 : index
    %48 = vector.load %arg8[%c0_96, %c0_97, %c2_98] : memref<8x10x10xf32, #tpu.memory_space<vmem>>, vector<8x8x8xf32>
    %c16_99 = arith.constant 16 : index
    %c0_100 = arith.constant 0 : index
    %c0_101 = arith.constant 0 : index
    %49 = vector.load %arg9[%c16_99, %c0_100, %c0_101] : memref<72x8x8xf32, #tpu.memory_space<vmem>>, vector<8x8x8xf32>
    tpu.vector_store %arg9[%c16_99, %c0_100, %c0_101], %48 {strides = array<i32>} : memref<72x8x8xf32, #tpu.memory_space<vmem>>, vector<8x8x8xf32>,
    %c0_102 = arith.constant 0 : index
    %c1_103 = arith.constant 1 : index
    %c0_104 = arith.constant 0 : index
    %50 = vector.load %arg8[%c0_102, %c1_103, %c0_104] : memref<8x10x10xf32, #tpu.memory_space<vmem>>, vector<8x8x8xf32>
    %c24_105 = arith.constant 24 : index
    %c0_106 = arith.constant 0 : index
    %c0_107 = arith.constant 0 : index
    %51 = vector.load %arg9[%c24_105, %c0_106, %c0_107] : memref<72x8x8xf32, #tpu.memory_space<vmem>>, vector<8x8x8xf32>
    tpu.vector_store %arg9[%c24_105, %c0_106, %c0_107], %50 {strides = array<i32>} : memref<72x8x8xf32, #tpu.memory_space<vmem>>, vector<8x8x8xf32>,
    %c0_108 = arith.constant 0 : index
    %c1_109 = arith.constant 1 : index
    %c1_110 = arith.constant 1 : index
    %52 = vector.load %arg8[%c0_108, %c1_109, %c1_110] : memref<8x10x10xf32, #tpu.memory_space<vmem>>, vector<8x8x8xf32>
    %c32_111 = arith.constant 32 : index
    %c0_112 = arith.constant 0 : index
    %c0_113 = arith.constant 0 : index
    %53 = vector.load %arg9[%c32_111, %c0_112, %c0_113] : memref<72x8x8xf32, #tpu.memory_space<vmem>>, vector<8x8x8xf32>
    tpu.vector_store %arg9[%c32_111, %c0_112, %c0_113], %52 {strides = array<i32>} : memref<72x8x8xf32, #tpu.memory_space<vmem>>, vector<8x8x8xf32>,
    %c0_114 = arith.constant 0 : index
    %c1_115 = arith.constant 1 : index
    %c2_116 = arith.constant 2 : index
    %54 = vector.load %arg8[%c0_114, %c1_115, %c2_116] : memref<8x10x10xf32, #tpu.memory_space<vmem>>, vector<8x8x8xf32>
    %c40 = arith.constant 40 : index
    %c0_117 = arith.constant 0 : index
    %c0_118 = arith.constant 0 : index
    %55 = vector.load %arg9[%c40, %c0_117, %c0_118] : memref<72x8x8xf32, #tpu.memory_space<vmem>>, vector<8x8x8xf32>
    tpu.vector_store %arg9[%c40, %c0_117, %c0_118], %54 {strides = array<i32>} : memref<72x8x8xf32, #tpu.memory_space<vmem>>, vector<8x8x8xf32>,
    %c0_119 = arith.constant 0 : index
    %c2_120 = arith.constant 2 : index
    %c0_121 = arith.constant 0 : index
    %56 = vector.load %arg8[%c0_119, %c2_120, %c0_121] : memref<8x10x10xf32, #tpu.memory_space<vmem>>, vector<8x8x8xf32>
    %c48 = arith.constant 48 : index
    %c0_122 = arith.constant 0 : index
    %c0_123 = arith.constant 0 : index
    %57 = vector.load %arg9[%c48, %c0_122, %c0_123] : memref<72x8x8xf32, #tpu.memory_space<vmem>>, vector<8x8x8xf32>
    tpu.vector_store %arg9[%c48, %c0_122, %c0_123], %56 {strides = array<i32>} : memref<72x8x8xf32, #tpu.memory_space<vmem>>, vector<8x8x8xf32>,
    %c0_124 = arith.constant 0 : index
    %c2_125 = arith.constant 2 : index
    %c1_126 = arith.constant 1 : index
    %58 = vector.load %arg8[%c0_124, %c2_125, %c1_126] : memref<8x10x10xf32, #tpu.memory_space<vmem>>, vector<8x8x8xf32>
    %c56 = arith.constant 56 : index
    %c0_127 = arith.constant 0 : index
    %c0_128 = arith.constant 0 : index
    %59 = vector.load %arg9[%c56, %c0_127, %c0_128] : memref<72x8x8xf32, #tpu.memory_space<vmem>>, vector<8x8x8xf32>
    tpu.vector_store %arg9[%c56, %c0_127, %c0_128], %58 {strides = array<i32>} : memref<72x8x8xf32, #tpu.memory_space<vmem>>, vector<8x8x8xf32>,
    %c0_129 = arith.constant 0 : index
    %c2_130 = arith.constant 2 : index
    %c2_131 = arith.constant 2 : index
    %60 = vector.load %arg8[%c0_129, %c2_130, %c2_131] : memref<8x10x10xf32, #tpu.memory_space<vmem>>, vector<8x8x8xf32>
    %c64 = arith.constant 64 : index
    %c0_132 = arith.constant 0 : index
    %c0_133 = arith.constant 0 : index
    %61 = vector.load %arg9[%c64, %c0_132, %c0_133] : memref<72x8x8xf32, #tpu.memory_space<vmem>>, vector<8x8x8xf32>
    tpu.vector_store %arg9[%c64, %c0_132, %c0_133], %60 {strides = array<i32>} : memref<72x8x8xf32, #tpu.memory_space<vmem>>, vector<8x8x8xf32>,
    %c0_134 = arith.constant 0 : index
    %c0_135 = arith.constant 0 : index
    %c0_136 = arith.constant 0 : index
    %62 = vector.load %arg9[%c0_134, %c0_135, %c0_136] : memref<72x8x8xf32, #tpu.memory_space<vmem>>, vector<72x8x8xf32>
    %63 = vector.shape_cast %62 : vector<72x8x8xf32> to vector<72x64xf32>
    %c0_137 = arith.constant 0 : index
    %c0_138 = arith.constant 0 : index
    %64 = vector.load %arg4[%c0_137, %c0_138] : memref<8x72xf32, #tpu.memory_space<vmem>>, vector<8x72xf32>
    %cst_139 = arith.constant dense<0.000000e+00> : vector<8x64xf32>
    %65 = tpu.matmul %64, %63, %cst_139 {dimension_numbers = #tpu.dot_dimension_numbers<[1], [0], [0], [1], [0, 0, 1, 1], [], []>} : vector<8x72xf32>, vector<72x64xf32>, vector<8x64xf32> -> vector<8x64xf32>
    %c0_140 = arith.constant 0 : index
    %c0_141 = arith.constant 0 : index
    %66 = vector.load %arg5[%c0_140, %c0_141] : memref<8x1xf32, #tpu.memory_space<vmem>>, vector<8x1xf32>
    %67 = vector.broadcast %66 : vector<8x1xf32> to vector<8x64xf32>
    %68 = arith.addf %65, %67 : vector<8x64xf32>
    %cst_142 = arith.constant 0.000000e+00 : f32
    %69 = vector.broadcast %cst_142 : f32 to vector<8x64xf32>
    %70 = arith.maximumf %68, %69 : vector<8x64xf32>
    %71 = vector.shape_cast %70 : vector<8x64xf32> to vector<8x8x8xf32>
    %c0_143 = arith.constant 0 : index
    %c0_144 = arith.constant 0 : index
    %c0_145 = arith.constant 0 : index
    %c0_146 = arith.constant 0 : index
    %72 = vector.load %arg6[%c0_143, %c0_144, %c0_145, %c0_146] : memref<1x8x8x8xf32, #tpu.memory_space<vmem>>, vector<1x8x8x8xf32>
    %73 = vector.shape_cast %72 : vector<1x8x8x8xf32> to vector<8x8x8xf32>
    %74 = vector.shape_cast %71 : vector<8x8x8xf32> to vector<1x8x8x8xf32>
    tpu.vector_store %arg6[%c0_143, %c0_144, %c0_145, %c0_146], %74 {strides = array<i32>} : memref<1x8x8x8xf32, #tpu.memory_space<vmem>>, vector<1x8x8x8xf32>,
    return
  }
  func.func @transform_0(%arg0: i32) -> (i32, i32, i32, i32, i32) {
    %c0_i32 = arith.constant 0 : i32
    %c0_i32_0 = arith.constant 0 : i32
    %c0_i32_1 = arith.constant 0 : i32
    %c0_i32_2 = arith.constant 0 : i32
    %c0_i32_3 = arith.constant 0 : i32
    return %arg0, %c0_i32, %c0_i32_0, %c0_i32_1, %c0_i32_2 : i32, i32, i32, i32, i32
  }
  func.func @transform_1(%arg0: i32) -> (i32, i32) {
    %c0_i32 = arith.constant 0 : i32
    %c0_i32_0 = arith.constant 0 : i32
    %c0_i32_1 = arith.constant 0 : i32
    return %c0_i32, %c0_i32_0 : i32, i32
  }
  func.func @transform_2(%arg0: i32) -> (i32, i32) {
    %c0_i32 = arith.constant 0 : i32
    %c0_i32_0 = arith.constant 0 : i32
    %c0_i32_1 = arith.constant 0 : i32
    return %c0_i32, %c0_i32_0 : i32, i32
  }
  func.func @transform_3(%arg0: i32) -> (i32, i32) {
    %c0_i32 = arith.constant 0 : i32
    %c0_i32_0 = arith.constant 0 : i32
    %c0_i32_1 = arith.constant 0 : i32
    return %c0_i32, %c0_i32_0 : i32, i32
  }
  func.func @transform_4(%arg0: i32) -> (i32, i32) {
    %c0_i32 = arith.constant 0 : i32
    %c0_i32_0 = arith.constant 0 : i32
    %c0_i32_1 = arith.constant 0 : i32
    return %c0_i32, %c0_i32_0 : i32, i32
  }
  func.func @transform_5(%arg0: i32) -> (i32, i32, i32, i32) {
    %c0_i32 = arith.constant 0 : i32
    %c0_i32_0 = arith.constant 0 : i32
    %c0_i32_1 = arith.constant 0 : i32
    %c0_i32_2 = arith.constant 0 : i32
    return %arg0, %c0_i32, %c0_i32_0, %c0_i32_1 : i32, i32, i32, i32
  }
}

</mosaic_0001>

<bundles_post_ra>
// kernel: tpu_custom_call.1
= control target key start
LH: loop header
LB: loop body
LE: loop exit
PB: predicated region body
PF: predicated region fallthrough
CT: control target
= control target key end

     0   :  { %10 = vsyncpa [#allocation6], 0  ;;  %s6387_s0 = inlined_call_operand.hbm [shape: f32[2,4,4,9,9], index: 0, kind: input, shape index: {}]   ;;  %s6388_s1 = inlined_call_operand.hbm [shape: f32[8,36], index: 1, kind: input, shape index: {}]   ;;  %s6389_s2 = inlined_call_operand.hbm [shape: f32[8,1], index: 2, kind: input, shape index: {}]   ;;  %s6390_s3 = inlined_call_operand.hbm [shape: f32[8,72], index: 3, kind: input, shape index: {}]   ;;  %s6391_s4 = inlined_call_operand.hbm [shape: f32[8,1], index: 4, kind: input, shape index: {}]   ;;  %s6392_s5 = inlined_call_operand.hbm [shape: f32[2,8,8,8], index: 5, kind: output, shape index: {}]  }
   0x1   :  { %12 = vsyncpa [#allocation6 + $0x1], 0 }
   0x2   :  { %13 = vsyncpa [#allocation9], 0 }
   0x3   :  { %14 = vsyncpa [#allocation12], 0 }
   0x4   :  { %15 = vsyncpa [#allocation7], 0 }
   0x5   :  { %17 = vsyncpa [#allocation7 + $0x1], 0  ;;  %s4770_s18 = smov 0   ;;  %s4772_s19 = smov 0  }
   0x6   :  { %s4774_s20 = smov 0   ;;  %s4776_s21 = smov 0  }
   0x7 LB: > { %s4791_s22 = sadd.s32 4294967295, %s4706_s21   ;;  %s3920_s23 = sadd.s32 4294967294, %s4706_s21   ;;  %s4706_s21 = sphi %s4776_s21, %s6421_s21   ;;  %s4702_s20 = sphi %s4774_s20, %s6420_s20   ;;  %s4698_s19 = sphi %s4772_s19, %s6419_s19   ;;  %s4694_s18 = sphi %s4770_s18, %s6418_s18  }
   0x8   : > { %p43_p0 = scmp.ne.s32.totalorder %s4698_s19, %s4694_s18  ;;  %p6393_p1 = scmp.eq.s32.totalorder %s4791_s22, 0 }
   0x9   : > { %p157_p3 = scmp.eq.s32.totalorder %s3920_s23, 1  ;;  %p3921_p5 = scmp.ge.s32.totalorder %s4706_s21, 1 }
   0xa   : > { %p4800_p4 = por %p6393_p1, %p43_p0  ;;  %p164_p7 = scmp.lt.s32.totalorder %s4706_s21, 3 }
   0xb   : > { %p4805_p6 = por %p157_p3, %p43_p0  ;;  %s4708_s27 = smov [#allocation8]  }
   0xc   : > { %s6398_s24 = scalar_select %p4800_p4, 1, 0 }
   0xd   : > { %s6399_s25 = scalar_select %p4805_p6, 1, 0 }
   0xe   : > { %p4810_p8 = pnand %p3921_p5, %p164_p7  ;;  %s177_s28 = sshll.u32 %s4708_s27, 4  ;;  %s178_s28 = int_to_ptr.vmem [resolvable:$true] %s177_s28 }
   0xf   : > { %s4709_s29 = smov [#allocation11]   ;;  %s4710_s7 = smov [#allocation10]  }
  0x10   : > { %s6400_s26 = scalar_select %p4810_p8, 1, 0 }
  0x11   : > { %p4055_p10 = pneg %p4810_p8  ;;  %s199_s30 = sshll.u32 %s4709_s29, 4  ;;  %s4823_s30 = int_to_ptr.vmem [resolvable:$true] %s199_s30 }
  0x12   : > { %s188_s8 = sshll.u32 %s4710_s7, 4  ;;  %s4490_s11 = scalar_lea.hbm %s6388_s1, 128  ;;  %s4825_s8 = int_to_ptr.vmem [resolvable:$true] %s188_s8 }
  0x13   : > { %p4819_p11 = pnand %p4055_p10, %p6393_p1  ;;  %p4491_p12 = scmp.ne.s32.totalorder %s6388_s1, %s4490_s11 }
  0x14   : > { %p4497_p5 = scmp.lt.u32.totalorder %s4490_s11, %s6388_s1 }
  0x15   : > { %p4835_p13 = pneg %p4819_p11 }
  0x17   : > { %p4493_p0 = pnand %p4835_p13, %p4491_p12 }
  0x19   : > { %p4494_p3 = pneg %p4493_p0 }
  0x1b   : > { %p4499_p7 = pnand %p4497_p5, %p4494_p3 }
  0x1d   : > { %4502 = shalt.err (!%p4499_p7)
}
  0x1e   : > { %s4503_s17 = scalar_lea.vmem %s178_s28, 128  ;;  %p4511_p2 = scmp.lt.s32.totalorder %s178_s28, %s178_s28 }
  0x1f   : > { %p4504_p10 = scmp.ne.s32.totalorder %s178_s28, %s4503_s17  ;;  %p4512_p6 = scmp.lt.s32.totalorder %s4503_s17, %s4503_s17 }
  0x21   : > { %p4506_p9 = pnand %p4504_p10, %p4835_p13  ;;  %p4513_p4 = por %p4512_p6, %p4511_p2 }
  0x23   : > { %p4507_p1 = pneg %p4506_p9 }
  0x25   : > { %p4514_p8 = pnand %p4513_p4, %p4507_p1 }
  0x27   : > { %4517 = shalt.err (!%p4514_p8)
}
  0x28   : > { %4058 = dma.hbm_to_vmem [thread:$0]  (!%p4819_p11), %s6388_s1, 128, %s178_s28, [#allocation9]  }
  0x29   : > { %s4518_s9 = scalar_lea.hbm %s6390_s3, 128 }
  0x2a   : > { %p4519_p9 = scmp.ne.s32.totalorder %s6390_s3, %s4518_s9  ;;  %p4525_p1 = scmp.lt.u32.totalorder %s4518_s9, %s6390_s3 }
  0x2c   : > { %p4521_p12 = pnand %p4519_p9, %p4835_p13 }
  0x2e   : > { %p4522_p2 = pneg %p4521_p12 }
  0x30   : > { %p4527_p4 = pnand %p4525_p1, %p4522_p2 }
  0x32   : > { %4530 = shalt.err (!%p4527_p4)
}
  0x33   : > { %s4531_s28 = scalar_lea.vmem %s4823_s30, 128  ;;  %p4539_p3 = scmp.lt.s32.totalorder %s4823_s30, %s4823_s30 }
  0x34   : > { %p4532_p6 = scmp.ne.s32.totalorder %s4823_s30, %s4531_s28  ;;  %p4540_p5 = scmp.lt.s32.totalorder %s4531_s28, %s4531_s28 }
  0x36   : > { %p4534_p8 = pnand %p4532_p6, %p4835_p13  ;;  %p4541_p7 = por %p4540_p5, %p4539_p3 }
  0x38   : > { %p4535_p0 = pneg %p4534_p8 }
  0x3a   : > { %p4542_p10 = pnand %p4541_p7, %p4535_p0 }
  0x3c   : > { %4545 = shalt.err (!%p4542_p10)
}
  0x3d   : > { %4064 = dma.hbm_to_vmem [thread:$0]  (!%p4819_p11), %s6390_s3, 128, %s4823_s30, [#allocation12]  }
  0x3e   : > { %s4546_s27 = scalar_lea.hbm %s6389_s2, 128 }
  0x3f   : > { %p4547_p9 = scmp.ne.s32.totalorder %s6389_s2, %s4546_s27  ;;  %p4553_p1 = scmp.lt.u32.totalorder %s4546_s27, %s6389_s2 }
  0x41   : > { %p4549_p12 = pnand %p4547_p9, %p4835_p13 }
  0x43   : > { %p4550_p2 = pneg %p4549_p12 }
  0x45   : > { %p4555_p4 = pnand %p4553_p1, %p4550_p2 }
  0x47   : > { %4558 = shalt.err (!%p4555_p4)
}
  0x48   : > { %s4559_s30 = scalar_lea.vmem %s4825_s8, 128  ;;  %p4567_p3 = scmp.lt.s32.totalorder %s4825_s8, %s4825_s8 }
  0x49   : > { %p4560_p6 = scmp.ne.s32.totalorder %s4825_s8, %s4559_s30  ;;  %p4568_p5 = scmp.lt.s32.totalorder %s4559_s30, %s4559_s30 }
  0x4b   : > { %p4562_p8 = pnand %p4560_p6, %p4835_p13  ;;  %p4569_p7 = por %p4568_p5, %p4567_p3 }
  0x4d   : > { %p4563_p0 = pneg %p4562_p8 }
  0x4f   : > { %p4570_p10 = pnand %p4569_p7, %p4563_p0 }
  0x51   : > { %4573 = shalt.err (!%p4570_p10)
}
  0x52   : > { %4061 = dma.hbm_to_vmem [thread:$0]  (!%p4819_p11), %s6389_s2, 128, %s4825_s8, [#allocation9]  }
  0x53   : > { %s4711_s13 = smov [#allocation13]   ;;  %s4574_s17 = scalar_lea.hbm %s6391_s4, 128 }
  0x54   : > { %s210_s28 = sshll.u32 %s4711_s13, 4  ;;  %p4575_p9 = scmp.ne.s32.totalorder %s6391_s4, %s4574_s17  ;;  %s211_s28 = int_to_ptr.vmem [resolvable:$true] %s210_s28 }
  0x55   : > { %p4581_p1 = scmp.lt.u32.totalorder %s4574_s17, %s6391_s4 }
  0x56   : > { %p4577_p12 = pnand %p4575_p9, %p4835_p13 }
  0x58   : > { %p4578_p2 = pneg %p4577_p12 }
  0x5a   : > { %p4583_p4 = pnand %p4581_p1, %p4578_p2 }
  0x5c   : > { %4586 = shalt.err (!%p4583_p4)
}
  0x5d   : > { %s4587_s8 = scalar_lea.vmem %s211_s28, 128  ;;  %p4595_p3 = scmp.lt.s32.totalorder %s211_s28, %s211_s28 }
  0x5e   : > { %p4588_p6 = scmp.ne.s32.totalorder %s211_s28, %s4587_s8  ;;  %p4596_p5 = scmp.lt.s32.totalorder %s4587_s8, %s4587_s8 }
  0x60   : > { %p4590_p8 = pnand %p4588_p6, %p4835_p13  ;;  %p4597_p7 = por %p4596_p5, %p4595_p3 }
  0x62   : > { %p4591_p0 = pneg %p4590_p8 }
  0x64   : > { %p4598_p10 = pnand %p4597_p7, %p4591_p0 }
  0x66   : > { %4601 = shalt.err (!%p4598_p10)
}
  0x67   : > { %4067 = dma.hbm_to_vmem [thread:$0]  (!%p4819_p11), %s6391_s4, 128, %s211_s28, [#allocation12]  }
  0x68   : > { %s4916_s14 = sadd.s32 1, %s4706_s21   ;;  %s30_s30 = sadd.s32 1, %s4702_s20 }
  0x69   : > { %s27_s6 = ssub.s32 %s4706_s21, %s4916_s14  ;;  %p37_p13 = scmp.ne.s32.totalorder %s4702_s20, %s4698_s19 }
  0x6a   : > { %p28_p9 = scmp.eq.s32.totalorder %s27_s6, 0  ;;  %p38_p12 = scmp.eq.s32.totalorder %s4706_s21, 0 }
  0x6b   : > { %p6403_p2 = scmp.eq.s32.totalorder %s4791_s22, 1  ;;  %p4080_p4 = scmp.lt.s32.totalorder %s4706_s21, 2 }
  0x6c   : > { %s4932_s12 = scalar_select %p28_p9, %s4702_s20, %s30_s30  }
  0x6d   : > { %p4926_p1 = por %p6403_p2, %p37_p13  ;;  %p39_p6 = por %p38_p12, %p37_p13 }
  0x6e   : > { %s221_s13 = sand.u32 1, %s4702_s20   ;;  %s3965_s28 = sshll.u32 %s4706_s21, 12 }
  0x6f   : > { %s3927_s15 = sshll.u32 %s221_s13, 8  ;;  %s4939_s23 = scalar_lea.hbm %s6387_s0, %s3965_s28 }
  0x70   : > { %s225_s27 = scalar_lea.vmem [#allocation5], %s3927_s15  ;;  %p4943_p11 = pnand %p4080_p4, %p39_p6 }
  0x71   : > { %s232_s29 = sshll.u32 %s225_s27, 4  ;;  %s4947_s8 = scalar_lea.sflag [#allocation6], %s221_s13  ;;  %s4941_s29 = int_to_ptr.vmem [resolvable:$true] %s232_s29 }
  0x72   : > { %s4602_s9 = scalar_lea.hbm %s4939_s23, 4096  ;;  %p4604_p0 = pneg %p4943_p11 }
  0x73   : > { %p4603_p8 = scmp.ne.s32.totalorder %s4939_s23, %s4602_s9  ;;  %s4607_s6 = scalar_lea.hbm %s6387_s0, 8192 }
  0x74   : > { %p4608_p7 = scmp.lt.u32.totalorder %s4939_s23, %s6387_s0  ;;  %p4609_p10 = scmp.lt.u32.totalorder %s4607_s6, %s4602_s9 }
  0x75   : > { %p4605_p3 = pnand %p4604_p0, %p4603_p8  ;;  %p4611_p9 = scmp.lt.u32.totalorder %s4602_s9, %s4939_s23 }
  0x76   : > { %p4610_p13 = por %p4609_p10, %p4608_p7 }
  0x77   : > { %p4606_p5 = pneg %p4605_p3 }
  0x78   : > { %p4612_p12 = por %p4611_p9, %p4610_p13 }
  0x7a   : > { %p4613_p2 = pnand %p4612_p12, %p4606_p5 }
  0x7c   : > { %4616 = shalt.err (!%p4613_p2)
}
  0x7d   : > { %s4617_s13 = scalar_lea.vmem %s4941_s29, 4096  ;;  %s4712_s16 = smov [#allocation5]  }
  0x7e   : > { %p4618_p4 = scmp.ne.s32.totalorder %s4941_s29, %s4617_s13  ;;  %s4622_s17 = sshll.u32 %s4712_s16, 4  ;;  %s4623_s17 = int_to_ptr.vmem [resolvable:$false] %s4622_s17 }
  0x7f   : > { %s4624_s27 = scalar_lea.vmem %s4623_s17, 8192  ;;  %p4625_p3 = scmp.lt.s32.totalorder %s4941_s29, %s4623_s17 }
  0x80   : > { %p4620_p6 = pnand %p4618_p4, %p4604_p0  ;;  %p4626_p7 = scmp.lt.s32.totalorder %s4624_s27, %s4617_s13 }
  0x82   : > { %p4621_p8 = pneg %p4620_p6  ;;  %p4627_p10 = por %p4626_p7, %p4625_p3 }
  0x84   : > { %p4628_p13 = pnand %p4627_p10, %p4621_p8 }
  0x86   : > { %4631 = shalt.err (!%p4628_p13)
}
  0x87   : > { %s4713_s9 = smov 128   ;;  %s4714_s10 = smov 8  }
  0x88   : > { %4071 = dma.hbm_to_vmem [thread:$0]  (!%p4943_p11), %s4939_s23, 4096, %s4941_s29, %s4947_s8, %s4713_s9, %s4713_s9, %s4714_s10  }
  0x89   : > { %p6406_p0 = scmp.ne.s32.totalorder %s6400_s26, 0 }
  0x8a   : > { %s4978_s30 = sand.u32 (!%p6406_p0), 1, %s4698_s19   ;;  %p6407_p5 = scmp.ne.s32.totalorder (!%p6406_p0), %s6398_s24, 0 }
  0x8b   : > { %244 = sbr.rel (%p6406_p0) target bundleno = 1667 (0x683), region = 40  ;;  %s3931_s6 = sshll.u32 (!%p6406_p0), %s4978_s30, 8 }
  0x8c   : > { %s247_s15 = scalar_lea.sflag (!%p6406_p0), [#allocation6], %s4978_s30  ;;  %s4982_s28 = scalar_lea.vmem (!%p6406_p0), [#allocation5], %s3931_s6 }
  0x92   : > { %4677 = dma.done.wait (%p6407_p5), %s247_s15, 4096  }
  0x93   : > { %4679 = vsyncadd (%p6407_p5), %s247_s15, 4294963200  ;;  %p6408_p11 = scmp.eq.s32.totalorder %s4791_s22, 0 }
  0x95   : > { %4681 = dma.done.wait (%p6408_p11), [#allocation9], 256   ;;  %p6409_p9 = pmov %p6408_p11 }
  0x97   : > { %4683 = vsyncadd (%p6409_p9), [#allocation9], 4294967040  ;;  %p6410_p12 = pmov %p6409_p9 }
  0x98   : > { %p6411_p2 = pmov %p6409_p9 }
  0x99   : > { %4685 = dma.done.wait (%p6410_p12), [#allocation12], 256  }
  0x9a   : > { %4687 = vsyncadd (%p6411_p2), [#allocation12], 4294967040  ;;  %v314_v0 = vld [vmem:[%s4982_s28 + $0x20] sm:$0xff]  ;;  %v315_v2 = vld [vmem:[%s4982_s28 + $0x30] sm:$0xff]  ;;  %vm297_vm0 = vcmask 64512   ;;  %s4715_s24 = smov 127   ;;  %v466_v10 = vlaneseq }
  0x9b   : > { %v312_v1 = vld [vmem:[%s4982_s28] sm:$0xff]  ;;  %324 = vrot.lane.b32.xlu1 %v314_v0, %s4715_s24  ;;  %v313_v3 = vld [vmem:[%s4982_s28 + $0x10] sm:$0xff]  ;;  %300 = vst.msk [vmem:[#allocation2 + $0x10] sm:$0xff] %vm297_vm0, %v314_v0  ;;  %301 = vst.msk [vmem:[#allocation2 + $0x18] sm:$0xff] %vm297_vm0, %v315_v2  ;;  %v4716_v8 = vmov 1983009808  }
  0x9c   : > { %320 = vrot.lane.b32.xlu0 %v312_v1, %s4715_s24  ;;  %v3950_v4 = vld [vmem:[%s4982_s28 + $0x90] sm:$0xff]  ;;  %298 = vst.msk [vmem:[#allocation2] sm:$0xff] %vm297_vm0, %v312_v1  ;;  %v3949_v5 = vld [vmem:[%s4982_s28 + $0x80] sm:$0xff]  ;;  %299 = vst.msk [vmem:[#allocation2 + $0x8] sm:$0xff] %vm297_vm0, %v313_v3  ;;  %v464_v9 = vunpack.c.l.s4 %v4716_v8  ;;  %v467_v20 = vshrl.u32 %v466_v10, 7  ;;  %s4718_s26 = smov 8  }
  0x9d   : > { %v3952_v6 = vld [vmem:[%s4982_s28 + $0xb0] sm:$0xff]  ;;  %v3951_v7 = vld [vmem:[%s4982_s28 + $0xa0] sm:$0xff]  ;;  %344 = vst.msk [vmem:[#allocation2 + $0x68] sm:$0xff] %vm297_vm0, %v3950_v4  ;;  %343 = vst.msk [vmem:[#allocation2 + $0x60] sm:$0xff] %vm297_vm0, %v3949_v5  ;;  %v4717_v27 = vmov 1934713408  }
  0x9e   : > { %v401_v11 = vld [vmem:[%s4982_s28 + $0x11] sm:$0xff]  ;;  %v400_v12 = vld [vmem:[%s4982_s28 + $0x1] sm:$0xff]  ;;  %345 = vst.msk [vmem:[#allocation2 + $0x70] sm:$0xff] %vm297_vm0, %v3951_v7  ;;  %346 = vst.msk [vmem:[#allocation2 + $0x78] sm:$0xff] %vm297_vm0, %v3952_v6  ;;  %v465_v19 = vunpack.c.0.s8 %v464_v9  ;;  %v528_v28 = vunpack.c.l.s4 %v4717_v27  ;;  %s4719_s23 = smov 24   ;;  %s4720_s29 = smov 16  }
  0x9f   : > { %v403_v13 = vld [vmem:[%s4982_s28 + $0x31] sm:$0xff]  ;;  %v402_v14 = vld [vmem:[%s4982_s28 + $0x21] sm:$0xff]  ;;  %387 = vst.msk [vmem:[#allocation2 + $0xc0] sm:$0xff] %vm297_vm0, %v400_v12  ;;  %388 = vst.msk [vmem:[#allocation2 + $0xc8] sm:$0xff] %vm297_vm0, %v401_v11  ;;  %326 = vrot.lane.b32.xlu1 %v315_v2, %s4715_s24  ;;  %s4721_s7 = smov 32   ;;  %s4722_s8 = smov 40  }
  0xa0   : > { %v3937_v15 = vld [vmem:[%s4982_s28 + $0x40] sm:$0xff]  ;;  %v3938_v16 = vld [vmem:[%s4982_s28 + $0x50] sm:$0xff]  ;;  %390 = vst.msk [vmem:[#allocation2 + $0xd8] sm:$0xff] %vm297_vm0, %v403_v13  ;;  %322 = vrot.lane.b32.xlu0 %v313_v3, %s4715_s24  ;;  %389 = vst.msk [vmem:[#allocation2 + $0xd0] sm:$0xff] %vm297_vm0, %v402_v14  ;;  %v5046_v30 = vsub.s32 %v465_v19, %v467_v20  ;;  %v529_v33 = vunpack.c.0.s8 %v528_v28  ;;  %s4723_s13 = smov 48   ;;  %s4725_s16 = smov 56  }
  0xa1   : > { %v3939_v17 = vld [vmem:[%s4982_s28 + $0x60] sm:$0xff]  ;;  %v3940_v18 = vld [vmem:[%s4982_s28 + $0x70] sm:$0xff]  ;;  %308 = vst.msk [vmem:[#allocation2 + $0x20] sm:$0xff] %vm297_vm0, %v3937_v15  ;;  %309 = vst.msk [vmem:[#allocation2 + $0x28] sm:$0xff] %vm297_vm0, %v3938_v16  ;;  %vm4727_vm1 = vmmov 0   ;;  %vm1218_vm2 = vcmask 130048  }
  0xa2   : > { %310 = vst.msk [vmem:[#allocation2 + $0x30] sm:$0xff] %vm297_vm0, %v3939_v17  ;;  %311 = vst.msk [vmem:[#allocation2 + $0x38] sm:$0xff] %vm297_vm0, %v3940_v18  ;;  %v3945_v21 = vld [vmem:[%s4982_s28 + $0xc0] sm:$0xff]  ;;  %v3946_v22 = vld [vmem:[%s4982_s28 + $0xd0] sm:$0xff]  ;;  %v5068_v42 = vsub.s32 %v529_v33, %v467_v20  ;;  %vm1224_vm3 = vcmask 195584   ;;  %vm1230_vm4 = vcmask 261120  }
  0xa3   : > { %v3947_v23 = vld [vmem:[%s4982_s28 + $0xe0] sm:$0xff]  ;;  %v3948_v24 = vld [vmem:[%s4982_s28 + $0xf0] sm:$0xff]  ;;  %353 = vst.msk [vmem:[#allocation2 + $0x80] sm:$0xff] %vm297_vm0, %v3945_v21  ;;  %354 = vst.msk [vmem:[#allocation2 + $0x88] sm:$0xff] %vm297_vm0, %v3946_v22  ;;  %367 = vrot.lane.b32.xlu1 %v3950_v4, %s4715_s24  ;;  %vm1236_vm5 = vcmask 326656   ;;  %vm1242_vm6 = vcmask 392192  }
  0xa4   : > { %355 = vst.msk [vmem:[#allocation2 + $0x90] sm:$0xff] %vm297_vm0, %v3947_v23  ;;  %v3953_v25 = vld [vmem:[%s4982_s28 + $0x41] sm:$0xff]  ;;  %v3954_v26 = vld [vmem:[%s4982_s28 + $0x51] sm:$0xff]  ;;  %356 = vst.msk [vmem:[#allocation2 + $0x98] sm:$0xff] %vm297_vm0, %v3948_v24  ;;  %365 = vrot.lane.b32.xlu0 %v3949_v5, %s4715_s24  ;;  %vm1248_vm7 = vcmask 457728   ;;  %vm1265_vm8 = vcmask 1043456  }
  0xa5   : > { %396 = vst.msk [vmem:[#allocation2 + $0xe0] sm:$0xff] %vm297_vm0, %v3953_v25  ;;  %397 = vst.msk [vmem:[#allocation2 + $0xe8] sm:$0xff] %vm297_vm0, %v3954_v26  ;;  %v4360_v29 = vld [vmem:[#allocation2] ss:$16 sps:$4 sm:$0xff]   ;;  %v4362_v31 = vld [vmem:[#allocation2 + $0x8] ss:$16 sps:$4 sm:$0xff]  }
  0xa6   : > { %v5049_v32 = vrot.slane %v4360_v29, %v5046_v30  ;;  %v3955_v34 = vld [vmem:[%s4982_s28 + $0x61] sm:$0xff]  ;;  %v5055_v35 = vrot.slane %v4362_v31, %v5046_v30  ;;  %v3956_v38 = vld [vmem:[%s4982_s28 + $0x71] sm:$0xff]  ;;  %vm1261_vm9 = vcmask 293888   ;;  %s4729_s17 = smov 112   ;;  %s4730_s27 = smov 120   ;;  %vm1340_vm10 = vcmask 73728  }
  0xa7   : > { %371 = vrot.lane.b32.xlu1 %v3952_v6, %s4715_s24  ;;  %398 = vst.msk [vmem:[#allocation2 + $0xf0] sm:$0xff] %vm297_vm0, %v3955_v34  ;;  %399 = vst.msk [vmem:[#allocation2 + $0xf8] sm:$0xff] %vm297_vm0, %v3956_v38  ;;  %v4384_v44 = vld [vmem:[#allocation2 + $0xc0] ss:$16 sps:$4 sm:$0xff]   ;;  %v4386_v45 = vld [vmem:[#allocation2 + $0xc8] ss:$16 sps:$4 sm:$0xff]  }
  0xa8   : > { %369 = vrot.lane.b32.xlu0 %v3951_v7, %s4715_s24  ;;  %v525_v41 = vcombine.low %v5049_v32, %v5055_v35  ;;  %v5083_v49 = vrot.slane %v4384_v44, %v5046_v30  ;;  %v5086_v50 = vrot.slane %v4386_v45, %v5046_v30  ;;  %v425_v62 = vld [vmem:[#allocation2] sm:$0xff]  ;;  %v427_v63 = vld [vmem:[#allocation2 + $0x10] sm:$0xff]  ;;  %v428_v0 = vld [vmem:[#allocation2 + $0x18] sm:$0xff]  ;;  %v526_v29 = vcombine.high %v5049_v32, %v5055_v35  ;;  %s4731_s9 = smov 96   ;;  %s4732_s10 = smov 104  }
  0xa9   : > { %v4364_v36 = vld [vmem:[#allocation2 + $0x20] ss:$16 sps:$4 sm:$0xff]   ;;  %v4366_v37 = vld [vmem:[#allocation2 + $0x28] ss:$16 sps:$4 sm:$0xff]   ;;  %v462_v6 = vcombine.high %v425_v62, %v427_v63  ;;  %s6396_s6 = smov 80   ;;  %s4734_s15 = smov 88  }
  0xaa   : > { %v5060_v39 = vrot.slane %v4364_v36, %v5046_v30  ;;  %v5064_v40 = vrot.slane %v4366_v37, %v5046_v30  ;;  %v5075_v46 = vrot.slane %v525_v41, %v5068_v42  ;;  %v933_v55 = vcombine.low %v5083_v49, %v5086_v50  ;;  %v426_v3 = vld [vmem:[#allocation2 + $0x8] sm:$0xff]  ;;  %v4372_v4 = vld [vmem:[#allocation2 + $0x60] ss:$16 sps:$4 sm:$0xff]   ;;  %v432_v15 = vld [vmem:[#allocation2 + $0x38] sm:$0xff]  ;;  %s4735_s28 = smov 72  }
  0xab   : > { %410 = vrot.lane.b32.xlu1 %v401_v11, %s4715_s24  ;;  %v4374_v5 = vld [vmem:[#allocation2 + $0x68] ss:$16 sps:$4 sm:$0xff]   ;;  %v478_v7 = vcombine.high %v426_v3, %v428_v0  ;;  %v429_v10 = vld [vmem:[#allocation2 + $0x20] sm:$0xff]  ;;  %v5117_v19 = vrot.slane %v462_v6, %v5046_v30  ;;  %v439_v25 = vld [vmem:[#allocation2 + $0x70] sm:$0xff]  ;;  %vm1357_vm11 = vcmask 7168   ;;  %vm1359_vm12 = vcmask 1024  }
  0xac   : > { %408 = vrot.lane.b32.xlu0 %v400_v12, %s4715_s24  ;;  %v557_v43 = vcombine.low %v5060_v39, %v5064_v40  ;;  %v5101_v57 = vrot.slane %v933_v55, %v5068_v42  ;;  %v430_v11 = vld [vmem:[#allocation2 + $0x28] sm:$0xff]  ;;  %v431_v12 = vld [vmem:[#allocation2 + $0x30] sm:$0xff]  ;;  %v437_v24 = vld [vmem:[#allocation2 + $0x60] sm:$0xff]  ;;  %v558_v31 = vcombine.high %v5060_v39, %v5064_v40  ;;  %vm1375_vm13 = vcmask 80968  }
  0xad   : > { %v4376_v16 = vld [vmem:[#allocation2 + $0x80] ss:$16 sps:$4 sm:$0xff]   ;;  %v4378_v17 = vld [vmem:[#allocation2 + $0x88] ss:$16 sps:$4 sm:$0xff]   ;;  %v5120_v20 = vrot.slane %v478_v7, %v5046_v30  ;;  %v494_v21 = vcombine.high %v429_v10, %v431_v12  ;;  %v510_v28 = vcombine.high %v430_v11, %v432_v15  ;;  %v630_v35 = vcombine.high %v437_v24, %v439_v25  ;;  %v4396_v63 = vld [vmem:[#allocation2 + $0x84] ss:$16 sps:$4 sm:$0xff]  }
  0xae   : > { %v5078_v47 = vrot.slane %v557_v43, %v5068_v42  ;;  %v4388_v48 = vld [vmem:[#allocation2 + $0xe0] ss:$16 sps:$4 sm:$0xff]   ;;  %v4390_v52 = vld [vmem:[#allocation2 + $0xe8] ss:$16 sps:$4 sm:$0xff]   ;;  %v741_v33 = vrot.slane %v4376_v16, %v5046_v30  ;;  %v757_v34 = vrot.slane %v4378_v17, %v5046_v30  ;;  %v4401_v6 = vld [vmem:[#allocation2 + $0xcc] ss:$16 sps:$4 sm:$0xff]   ;;  %v934_v10 = vcombine.high %v5083_v49, %v5086_v50 }
  0xaf   : > { %414 = vrot.lane.b32.xlu1 %v403_v13, %s4715_s24  ;;  %v5091_v53 = vrot.slane %v4388_v48, %v5046_v30  ;;  %v5094_v54 = vrot.slane %v4390_v52, %v5046_v30  ;;  %v637_v13 = vrot.slane %v4372_v4, %v5046_v30  ;;  %v438_v36 = vld [vmem:[#allocation2 + $0x68] sm:$0xff]  ;;  %v440_v37 = vld [vmem:[#allocation2 + $0x78] sm:$0xff]  ;;  %v5133_v44 = vrot.slane %v494_v21, %v5046_v30  ;;  %v4402_v12 = vld [vmem:[#allocation2 + $0xe4] ss:$16 sps:$4 sm:$0xff]  }
  0xb0   : > { %412 = vrot.lane.b32.xlu0 %v402_v14, %s4715_s24  ;;  %v589_v51 = vcombine.low %v5075_v46, %v5078_v47  ;;  %v653_v14 = vrot.slane %v4374_v5, %v5046_v30  ;;  %v541_v32 = vcombine.low %v5117_v19, %v5120_v20  ;;  %v5141_v55 = vrot.slane %v510_v28, %v5046_v30  ;;  %v4397_v4 = vld [vmem:[#allocation2 + $0x8c] ss:$16 sps:$4 sm:$0xff]   ;;  %v4400_v5 = vld [vmem:[#allocation2 + $0xc4] ss:$16 sps:$4 sm:$0xff]  }
  0xb1   : > { %v965_v56 = vcombine.low %v5091_v53, %v5094_v54  ;;  %v646_v62 = vcombine.high %v438_v36, %v440_v37  ;;  %v590_v0 = vcombine.high %v5075_v46, %v5078_v47  ;;  %v5165_v11 = vrot.slane %v630_v35, %v5046_v30 }
  0xb2   : > { %v693_v27 = vcombine.low %v637_v13, %v653_v14  ;;  %v694_v43 = vcombine.high %v637_v13, %v653_v14  ;;  %v573_v21 = vcombine.low %v5133_v44, %v5141_v55  ;;  %v966_v25 = vcombine.high %v5091_v53, %v5094_v54 }
  0xb3   : > { %v5104_v58 = vrot.slane %v965_v56, %v5068_v42  ;;  %v5146_v56 = vrot.slane %v526_v29, %v5068_v42  ;;  %v5196_v37 = vrot.slane %v934_v10, %v5068_v42  ;;  %v5199_v53 = vrot.slane %v4396_v63, %v5046_v30 }
  0xb4   : > { %v5138_v48 = vrot.slane %v693_v27, %v5068_v42  ;;  %v5160_v3 = vrot.slane %v694_v43, %v5068_v42  ;;  %v764_v43 = vrot.slane %v4397_v4, %v5046_v30  ;;  %v900_v35 = vrot.slane %v4401_v6, %v5046_v30 }
  0xb5   : > { %v997_v59 = vcombine.low %v5101_v57, %v5104_v58  ;;  %v5223_v10 = vrot.slane %v573_v21, %v5068_v42  ;;  %vm1377_vm14 = vcmask 74824   ;;  %vm1583_vm15 = vcmask 72712  }
 0x10d   : > { %v325_v60 = vpop.permute.xlu1 %324 }
 0x10e   : > { %v321_v61 = vpop.permute.xlu0 %320  ;;  %335 = vst.msk [vmem:[#allocation2 + $0x50] sm:$0xff] %vm297_vm0, %v325_v60  ;;  %v5149_v60 = vrot.slane %v558_v31, %v5068_v42 }
 0x10f   : > { %333 = vst.msk [vmem:[#allocation2 + $0x40] sm:$0xff] %vm297_vm0, %v321_v61  ;;  %v797_v61 = vcombine.low %v741_v33, %v757_v34 }
 0x111   : > { %v327_v1 = vpop.permute.xlu1 %326  ;;  %v5181_v24 = vrot.slane %v797_v61, %v5068_v42 }
 0x112   : > { %v323_v2 = vpop.permute.xlu0 %322  ;;  %336 = vst.msk [vmem:[#allocation2 + $0x58] sm:$0xff] %vm297_vm0, %v327_v1 }
 0x113   : > { %334 = vst.msk [vmem:[#allocation2 + $0x48] sm:$0xff] %vm297_vm0, %v323_v2 }
 0x115   : > { %v368_v8 = vpop.permute.xlu1 %367  ;;  %v435_v50 = vld [vmem:[#allocation2 + $0x50] sm:$0xff] }
 0x116   : > { %v366_v9 = vpop.permute.xlu0 %365  ;;  %379 = vst.msk [vmem:[#allocation2 + $0xa8] sm:$0xff] %vm297_vm0, %v368_v8  ;;  %v4368_v18 = vld [vmem:[#allocation2 + $0x40] ss:$16 sps:$4 sm:$0xff]  }
 0x117   : > { %378 = vst.msk [vmem:[#allocation2 + $0xa0] sm:$0xff] %vm297_vm0, %v366_v9  ;;  %v605_v38 = vrot.slane %v4368_v18, %v5046_v30  ;;  %v798_v9 = vcombine.high %v741_v33, %v757_v34  ;;  %v5172_v18 = vrot.slane %v541_v32, %v5068_v42  ;;  %v433_v49 = vld [vmem:[#allocation2 + $0x40] sm:$0xff]  ;;  %v4403_v33 = vld [vmem:[#allocation2 + $0xec] ss:$16 sps:$4 sm:$0xff]   ;;  %v884_v32 = vrot.slane %v4400_v5, %v5046_v30 }
 0x119   : > { %v372_v22 = vpop.permute.xlu1 %371  ;;  %v436_v8 = vld [vmem:[#allocation2 + $0x58] sm:$0xff]  ;;  %v5193_v36 = vrot.slane %v798_v9, %v5068_v42  ;;  %v591_v9 = vcombine.low %v5146_v56, %v5149_v60 }
 0x11a   : > { %v370_v23 = vpop.permute.xlu0 %369  ;;  %v4370_v26 = vld [vmem:[#allocation2 + $0x48] ss:$16 sps:$4 sm:$0xff]   ;;  %381 = vst.msk [vmem:[#allocation2 + $0xb8] sm:$0xff] %vm297_vm0, %v372_v22  ;;  %v592_v22 = vcombine.high %v5146_v56, %v5149_v60 }
 0x11b   : > { %380 = vst.msk [vmem:[#allocation2 + $0xb0] sm:$0xff] %vm297_vm0, %v370_v23  ;;  %v621_v41 = vrot.slane %v4370_v26, %v5046_v30  ;;  %v434_v7 = vld [vmem:[#allocation2 + $0x48] sm:$0xff]  ;;  %v5186_v26 = vrot.slane %v646_v62, %v5046_v30  ;;  %v998_v62 = vcombine.high %v5101_v57, %v5104_v58 }
 0x11c   : > { %v614_v31 = vcombine.high %v434_v7, %v436_v8 }
 0x11d   : > { %v411_v45 = vpop.permute.xlu1 %410  ;;  %v661_v40 = vcombine.low %v605_v38, %v621_v41  ;;  %v662_v52 = vcombine.high %v605_v38, %v621_v41  ;;  %v598_v41 = vcombine.high %v433_v49, %v435_v50  ;;  %v813_v49 = vcombine.low %v5199_v53, %v764_v43 }
 0x11e   : > { %v409_v39 = vpop.permute.xlu0 %408  ;;  %422 = vst.msk [vmem:[#allocation2 + $0x108] sm:$0xff] %vm297_vm0, %v411_v45  ;;  %v5210_v63 = vrot.slane %v614_v31, %v5046_v30  ;;  %v949_v50 = vcombine.low %v884_v32, %v900_v35 }
 0x11f   : > { %421 = vst.msk [vmem:[#allocation2 + $0x100] sm:$0xff] %vm297_vm0, %v409_v39  ;;  %v5154_v1 = vrot.slane %v661_v40, %v5068_v42  ;;  %v5157_v2 = vrot.slane %v662_v52, %v5068_v42  ;;  %v980_v40 = vrot.slane %v966_v25, %v5068_v42  ;;  %v916_v52 = vrot.slane %v4402_v12, %v5046_v30 }
 0x120   : > { %v612_v12 = vrot.slane %v598_v41, %v5046_v30  ;;  %v5252_v41 = vrot.slane %v949_v50, %v5068_v42 }
 0x121   : > { %v415_v13 = vpop.permute.xlu1 %414  ;;  %v725_v15 = vcombine.low %v5154_v1, %v5138_v48  ;;  %v726_v16 = vcombine.high %v5154_v1, %v5138_v48  ;;  %v4382_v23 = vld [vmem:[#allocation2 + $0xa8] ss:$16 sps:$4 sm:$0xff]   ;;  %v728_v28 = vcombine.high %v5157_v2, %v5160_v3  ;;  %v4399_v38 = vld [vmem:[#allocation2 + $0xac] ss:$16 sps:$4 sm:$0xff]   ;;  %v999_v60 = vcombine.low %v5196_v37, %v980_v40 }
 0x122   : > { %v413_v14 = vpop.permute.xlu0 %412  ;;  %v4380_v17 = vld [vmem:[#allocation2 + $0xa0] ss:$16 sps:$4 sm:$0xff]   ;;  %424 = vst.msk [vmem:[#allocation2 + $0x118] sm:$0xff] %vm297_vm0, %v415_v13  ;;  %v789_v34 = vrot.slane %v4382_v23, %v5046_v30  ;;  %v4398_v54 = vld [vmem:[#allocation2 + $0xa4] ss:$16 sps:$4 sm:$0xff]   ;;  %v796_v7 = vrot.slane %v4399_v38, %v5046_v30  ;;  %v709_v13 = vcombine.low %v5165_v11, %v5186_v26  ;;  %v677_v21 = vcombine.low %v612_v12, %v5210_v63 }
 0x123   : > { %423 = vst.msk [vmem:[#allocation2 + $0x110] sm:$0xff] %vm297_vm0, %v413_v14  ;;  %v4148_v27 = vpack.i.bf16 %v726_v16, %v590_v0  ;;  %v773_v29 = vrot.slane %v4380_v17, %v5046_v30  ;;  %v4158_v61 = vpack.i.bf16 %v728_v28, %v592_v22  ;;  %v932_v0 = vrot.slane %v4403_v33, %v5046_v30 }
 0x124   : > { %v780_v6 = vrot.slane %v4398_v54, %v5046_v30  ;;  %v717_v31 = vrot.slane %v709_v13, %v5068_v42  ;;  %v814_v33 = vcombine.high %v5199_v53, %v764_v43  ;;  %v5249_v38 = vrot.slane %v813_v49, %v5068_v42 }
 0x125   : > { %4149 = vrot.lane.b32.xlu0 %v4148_v27, %s4718_s26  ;;  %v829_v45 = vcombine.low %v773_v29, %v789_v34  ;;  %v830_v39 = vcombine.high %v773_v29, %v789_v34  ;;  %v981_v22 = vcombine.low %v916_v52, %v932_v0  ;;  %v1000_v29 = vcombine.high %v5196_v37, %v980_v40 }
 0x126   : > { %v845_v28 = vcombine.low %v780_v6, %v796_v7  ;;  %v950_v34 = vcombine.high %v884_v32, %v900_v35  ;;  %v727_v37 = vcombine.low %v5157_v2, %v5160_v3  ;;  %v846_v43 = vcombine.high %v780_v6, %v796_v7 }
 0x127   : > { %v5214_v4 = vrot.slane %v829_v45, %v5068_v42  ;;  %v844_v5 = vrot.slane %v830_v39, %v5068_v42  ;;  %v982_v45 = vcombine.high %v916_v52, %v932_v0  ;;  %v685_v39 = vrot.slane %v677_v21, %v5068_v42 }
 0x128   : > { %v5258_v53 = vrot.slane %v981_v22, %v5068_v42  ;;  %v593_v52 = vcombine.low %v5172_v18, %v5223_v10  ;;  %v542_v2 = vcombine.high %v5117_v19, %v5120_v20  ;;  %v574_v3 = vcombine.high %v5133_v44, %v5141_v55 }
 0x129   : > { %4159 = vrot.lane.b32.xlu0 %v4158_v61, %s4719_s23  ;;  %v862_v14 = vcombine.high %v5181_v24, %v5214_v4  ;;  %v861_v16 = vcombine.low %v5181_v24, %v5214_v4  ;;  %v4394_v17 = vld [vmem:[#allocation2 + $0x108] ss:$16 sps:$4 sm:$0xff]   ;;  %v863_v27 = vcombine.low %v5193_v36, %v844_v5  ;;  %v864_v40 = vcombine.high %v5193_v36, %v844_v5  ;;  %v4405_v21 = vld [vmem:[#allocation2 + $0x10c] ss:$16 sps:$4 sm:$0xff]  }
 0x12a   : > { %v4392_v8 = vld [vmem:[#allocation2 + $0x100] ss:$16 sps:$4 sm:$0xff]   ;;  %v5239_v25 = vrot.slane %v4394_v17, %v5046_v30  ;;  %v5265_v61 = vrot.slane %v845_v28, %v5068_v42  ;;  %v828_v36 = vrot.slane %v814_v33, %v5068_v42  ;;  %v710_v0 = vcombine.high %v5165_v11, %v5186_v26 }
 0x12b   : > { %v5234_v56 = vrot.slane %v4392_v8, %v5046_v30  ;;  %v4168_v23 = vpack.i.bf16 %v998_v62, %v862_v14  ;;  %v4178_v35 = vpack.i.bf16 %v999_v60, %v863_v27  ;;  %v964_v62 = vrot.slane %v950_v34, %v5068_v42  ;;  %v4404_v60 = vld [vmem:[#allocation2 + $0x104] ss:$16 sps:$4 sm:$0xff]  }
 0x12c   : > { %v729_v5 = vcombine.low %v685_v39, %v717_v31  ;;  %v1001_v19 = vcombine.low %v5252_v41, %v5258_v53  ;;  %v996_v20 = vrot.slane %v982_v45, %v5068_v42  ;;  %v678_v44 = vcombine.high %v612_v12, %v5210_v63 }
 0x12d   : > { %4169 = vrot.lane.b32.xlu0 %v4168_v23, %s4718_s26  ;;  %v1038_v54 = vcombine.high %v5234_v56, %v5239_v25  ;;  %v4153_v55 = vpack.i.bf16 %v727_v37, %v591_v9  ;;  %v4188_v6 = vpack.i.bf16 %v1000_v29, %v864_v40  ;;  %v865_v7 = vcombine.low %v5249_v38, %v5265_v61 }
 0x12e   : > { %v860_v8 = vrot.slane %v846_v43, %v5068_v42  ;;  %v594_v11 = vcombine.high %v5172_v18, %v5223_v10  ;;  %v556_v26 = vrot.slane %v542_v2, %v5068_v42  ;;  %v730_v13 = vcombine.high %v685_v39, %v717_v31 }
 0x12f   : > { %v5261_v32 = vrot.slane %v1038_v54, %v5068_v42  ;;  %v588_v14 = vrot.slane %v574_v3, %v5068_v42  ;;  %v692_v63 = vrot.slane %v678_v44, %v5068_v42  ;;  %v724_v9 = vrot.slane %v710_v0, %v5068_v42 }
 0x130   : > { %v4163_v12 = vpack.i.bf16 %v729_v5, %v593_v52  ;;  %v4198_v17 = vpack.i.bf16 %v1001_v19, %v865_v7  ;;  %v867_v49 = vcombine.low %v828_v36, %v860_v8  ;;  %v1003_v50 = vcombine.low %v964_v62, %v996_v20 }
 0x131   : > { %1106 = vrot.lane.b32.xlu1 %v5261_v32, %s4720_s29  ;;  %4179 = vrot.lane.b32.xlu0 %v4178_v35, %s4720_s29  ;;  %v4173_v18 = vpack.i.bf16 %v730_v13, %v594_v11  ;;  %v595_v10 = vcombine.low %v556_v26, %v588_v14  ;;  %v731_v22 = vcombine.low %v692_v63, %v724_v9  ;;  %v4724_v39 = vmov 0.0|0.0  }
 0x132   : > { %v1004_v23 = vcombine.high %v964_v62, %v996_v20  ;;  %v4208_v27 = vpack.i.bf16 %v1003_v50, %v867_v49  ;;  %v868_v28 = vcombine.high %v828_v36, %v860_v8  ;;  %v1020_v29 = vrot.slane %v4404_v60, %v5046_v30  ;;  %4017 = vmatprep.subr.bf16.mxu0 %v4724_v39 }
 0x133   : > { %v1036_v31 = vrot.slane %v4405_v21, %v5046_v30  ;;  %v596_v33 = vcombine.high %v556_v26, %v588_v14  ;;  %v732_v34 = vcombine.high %v692_v63, %v724_v9  ;;  %v4183_v54 = vpack.i.bf16 %v731_v22, %v595_v10  ;;  %4023 = vmatprep.subr.bf16.mxu1 %v4724_v39 }
 0x134   : > { %v4213_v45 = vpack.i.bf16 %v1004_v23, %v868_v28  ;;  %v866_v35 = vcombine.high %v5249_v38, %v5265_v61  ;;  %v1002_v40 = vcombine.high %v5252_v41, %v5258_v53  ;;  %v6397_v52 = vmov 0.0  }
 0x135   : > { %4154 = vrot.lane.b32.xlu1 %v4153_v55, %s4720_s29  ;;  %4189 = vrot.lane.b32.xlu0 %v4188_v6, %s4719_s23  ;;  %v1053_v37 = vcombine.low %v1020_v29, %v1036_v31  ;;  %v4193_v43 = vpack.i.bf16 %v732_v34, %v596_v33  ;;  %v1070_v2 = vcombine.high %v5261_v32, %v6397_v52  ;;  %v4728_v53 = vmov 0   ;;  %v1255_v32 = vld [vmem:[#allocation10] sm:$0xff] }
 0x136   : > { %v1037_v36 = vcombine.low %v5234_v56, %v5239_v25  ;;  %v1054_v62 = vcombine.high %v1020_v29, %v1036_v31  ;;  %v4203_v0 = vpack.i.bf16 %v1002_v40, %v866_v35  ;;  %3993 = vmatprep.mubr.msk.f32.mxu0 %vm4727_vm1, %v6397_v52  ;;  %4014 = vmatprep.mubr.msk.f32.mxu1 %vm4727_vm1, %v6397_v52  ;;  %vm3554_vm1 = vcmask 588800  }
 0x137   : > { %v1061_v3 = vrot.slane %v1053_v37, %v5068_v42  ;;  %4218 = vset.pattern.permute.xlu1 %v4728_v53  ;;  %4359 = vset.pattern.permute.xlu0 %v4728_v53  ;;  %1342 = vst.msk [vmem:[#allocation3 + $0x10] sm:$0x1] %vm1340_vm10, %v6397_v52  ;;  %1350 = vst.msk [vmem:[#allocation3 + $0x19] sm:$0x1] %vm1340_vm10, %v6397_v52 }
 0x138   : > { %v5318_v61 = vrot.slane %v1037_v36, %v5068_v42  ;;  %v1068_v41 = vrot.slane %v1054_v62, %v5068_v42  ;;  %1341 = vst.msk [vmem:[#allocation3] sm:$0x1] %vm1340_vm10, %v6397_v52  ;;  %1343 = vst.msk [vmem:[#allocation3 + $0x20] sm:$0x1] %vm1340_vm10, %v6397_v52 }
 0x139   : > { %4164 = vrot.lane.b32.xlu1 %v4163_v12, %s4721_s7  ;;  %4199 = vrot.lane.b32.xlu0 %v4198_v17, %s4721_s7  ;;  %v1071_v38 = vcombine.high %v1061_v3, %v6397_v52  ;;  %1344 = vst.msk [vmem:[#allocation3 + $0x30] sm:$0x1] %vm1340_vm10, %v6397_v52  ;;  %1345 = vst.msk [vmem:[#allocation3 + $0x40] sm:$0x1] %vm1340_vm10, %v6397_v52 }
 0x13a   : > { %v1069_v56 = vcombine.high %v5318_v61, %v6397_v52  ;;  %v1072_v25 = vcombine.high %v1068_v41, %v6397_v52  ;;  %1346 = vst.msk [vmem:[#allocation3 + $0x50] sm:$0x1] %vm1340_vm10, %v6397_v52  ;;  %1347 = vst.msk [vmem:[#allocation3 + $0x60] sm:$0x1] %vm1340_vm10, %v6397_v52 }
 0x13b   : > { %1348 = vst.msk [vmem:[#allocation3 + $0x70] sm:$0x1] %vm1340_vm10, %v6397_v52  ;;  %1349 = vst.msk [vmem:[#allocation3 + $0x9] sm:$0x1] %vm1340_vm10, %v6397_v52 }
 0x13c   : > { %1351 = vst.msk [vmem:[#allocation3 + $0x29] sm:$0x1] %vm1340_vm10, %v6397_v52  ;;  %1352 = vst.msk [vmem:[#allocation3 + $0x39] sm:$0x1] %vm1340_vm10, %v6397_v52 }
 0x13d   : > { %4174 = vrot.lane.b32.xlu1 %v4173_v18, %s4722_s8  ;;  %4209 = vrot.lane.b32.xlu0 %v4208_v27, %s4723_s13  ;;  %1353 = vst.msk [vmem:[#allocation3 + $0x49] sm:$0x1] %vm1340_vm10, %v6397_v52  ;;  %1354 = vst.msk [vmem:[#allocation3 + $0x59] sm:$0x1] %vm1340_vm10, %v6397_v52 }
 0x13e   : > { %1355 = vst.msk [vmem:[#allocation3 + $0x69] sm:$0x1] %vm1340_vm10, %v6397_v52  ;;  %1356 = vst.msk [vmem:[#allocation3 + $0x79] sm:$0x1] %vm1340_vm10, %v6397_v52 }
 0x13f   : > { %1361 = vst.msk [vmem:[#allocation3 + $0x10] sm:$0xff] %vm1357_vm11, %v6397_v52  ;;  %1358 = vst.msk [vmem:[#allocation3] sm:$0xff] %vm1357_vm11, %v6397_v52 }
 0x140   : > { %1362 = vst.msk [vmem:[#allocation3 + $0x18] sm:$0x3] %vm1359_vm12, %v6397_v52  ;;  %1360 = vst.msk [vmem:[#allocation3 + $0x8] sm:$0x3] %vm1359_vm12, %v6397_v52 }
 0x141   : > { %4184 = vrot.lane.b32.xlu1 %v4183_v54, %s4723_s13  ;;  %4214 = vrot.lane.b32.xlu0 %v4213_v45, %s4725_s16  ;;  %1363 = vst.msk [vmem:[#allocation3 + $0x20] sm:$0xff] %vm1357_vm11, %v6397_v52  ;;  %1365 = vst.msk [vmem:[#allocation3 + $0x30] sm:$0xff] %vm1357_vm11, %v6397_v52 }
 0x142   : > { %1364 = vst.msk [vmem:[#allocation3 + $0x28] sm:$0x3] %vm1359_vm12, %v6397_v52  ;;  %1366 = vst.msk [vmem:[#allocation3 + $0x38] sm:$0x3] %vm1359_vm12, %v6397_v52 }
 0x143   : > { %1367 = vst.msk [vmem:[#allocation3 + $0x40] sm:$0xff] %vm1357_vm11, %v6397_v52  ;;  %1369 = vst.msk [vmem:[#allocation3 + $0x50] sm:$0xff] %vm1357_vm11, %v6397_v52 }
 0x144   : > { %1368 = vst.msk [vmem:[#allocation3 + $0x48] sm:$0x3] %vm1359_vm12, %v6397_v52  ;;  %1370 = vst.msk [vmem:[#allocation3 + $0x58] sm:$0x3] %vm1359_vm12, %v6397_v52 }
 0x145   : > { %4194 = vrot.lane.b32.xlu1 %v4193_v43, %s4725_s16  ;;  %1126 = vrot.lane.b32.xlu0 %v1070_v2, %s4719_s23  ;;  %1371 = vst.msk [vmem:[#allocation3 + $0x60] sm:$0xff] %vm1357_vm11, %v6397_v52  ;;  %1373 = vst.msk [vmem:[#allocation3 + $0x70] sm:$0xff] %vm1357_vm11, %v6397_v52 }
 0x146   : > { %1372 = vst.msk [vmem:[#allocation3 + $0x68] sm:$0x3] %vm1359_vm12, %v6397_v52  ;;  %1374 = vst.msk [vmem:[#allocation3 + $0x78] sm:$0x3] %vm1359_vm12, %v6397_v52 }
 0x147   : > { %1379 = vst.msk [vmem:[#allocation3 + $0x10] sm:$0xff] %vm1375_vm13, %v6397_v52  ;;  %1376 = vst.msk [vmem:[#allocation3] sm:$0xff] %vm1375_vm13, %v6397_v52 }
 0x148   : > { %1380 = vst.msk [vmem:[#allocation3 + $0x18] sm:$0x3] %vm1377_vm14, %v6397_v52  ;;  %1378 = vst.msk [vmem:[#allocation3 + $0x8] sm:$0x3] %vm1377_vm14, %v6397_v52 }
 0x149   : > { %4204 = vrot.lane.b32.xlu1 %v4203_v0, %s4722_s8  ;;  %1166 = vrot.lane.b32.xlu0 %v1071_v38, %s4722_s8  ;;  %1383 = vst.msk [vmem:[#allocation3 + $0x30] sm:$0xff] %vm1375_vm13, %v6397_v52  ;;  %1381 = vst.msk [vmem:[#allocation3 + $0x20] sm:$0xff] %vm1375_vm13, %v6397_v52 }
 0x14a   : > { %1384 = vst.msk [vmem:[#allocation3 + $0x38] sm:$0x3] %vm1377_vm14, %v6397_v52  ;;  %1382 = vst.msk [vmem:[#allocation3 + $0x28] sm:$0x3] %vm1377_vm14, %v6397_v52 }
 0x14b   : > { %1385 = vst.msk [vmem:[#allocation3 + $0x40] sm:$0xff] %vm1375_vm13, %v6397_v52  ;;  %1387 = vst.msk [vmem:[#allocation3 + $0x50] sm:$0xff] %vm1375_vm13, %v6397_v52 }
 0x14c   : > { %1386 = vst.msk [vmem:[#allocation3 + $0x48] sm:$0x3] %vm1377_vm14, %v6397_v52  ;;  %1388 = vst.msk [vmem:[#allocation3 + $0x58] sm:$0x3] %vm1377_vm14, %v6397_v52 }
 0x14d   : > { %1086 = vrot.lane.b32.xlu1 %v1069_v56, %s4718_s26  ;;  %1206 = vrot.lane.b32.xlu0 %v1072_v25, %s4725_s16  ;;  %1389 = vst.msk [vmem:[#allocation3 + $0x60] sm:$0xff] %vm1375_vm13, %v6397_v52  ;;  %1391 = vst.msk [vmem:[#allocation3 + $0x70] sm:$0xff] %vm1375_vm13, %v6397_v52 }
 0x14e   : > { %1390 = vst.msk [vmem:[#allocation3 + $0x68] sm:$0x3] %vm1377_vm14, %v6397_v52  ;;  %1392 = vst.msk [vmem:[#allocation3 + $0x78] sm:$0x3] %vm1377_vm14, %v6397_v52 }
 0x151   : > { %1146 = vrot.lane.b32.xlu1 %v1061_v3, %s4721_s7 }
 0x155   : > { %1186 = vrot.lane.b32.xlu1 %v1068_v41, %s4723_s13 }
 0x159   : > { %1258 = vperm.xlu1 %4218, %v1255_v32  }
 0x197   : > { %v4150_v5 = vpop.permute.xlu0 %4149 }
 0x198   : > { %v4152_v26 = vunpack.i.h.bf16 %v4150_v5  ;;  %v4151_v13 = vunpack.i.l.bf16 %v4150_v5 }
 0x19a   : > { %v1214_v17 = vsel %vm297_vm0, %v725_v15, %v4152_v26  ;;  %v1213_v49 = vsel %vm297_vm0, %v589_v51, %v4151_v13 }
 0x19b   : > { %v4160_v19 = vpop.permute.xlu0 %4159 }
 0x19c   : > { %v4162_v22 = vunpack.i.h.bf16 %v4160_v19  ;;  %v4161_v23 = vunpack.i.l.bf16 %v4160_v19 }
 0x19f   : > { %v4170_v20 = vpop.permute.xlu0 %4169 }
 0x1a0   : > { %v4172_v1 = vunpack.i.h.bf16 %v4170_v20  ;;  %v4171_v15 = vunpack.i.l.bf16 %v4170_v20 }
 0x1a2   : > { %v1216_v41 = vsel %vm297_vm0, %v997_v59, %v4172_v1  ;;  %v1215_v56 = vsel %vm297_vm0, %v861_v16, %v4171_v15  ;;  %v1254_v1 = vld [vmem:[#allocation8] sm:$0xff] }
 0x1a3   : > { %v5332_v44 = vpop.permute.xlu1 %1106  ;;  %v4180_v55 = vpop.permute.xlu0 %4179 }
 0x1a4   : > { %v4182_v46 = vunpack.i.h.bf16 %v4180_v55  ;;  %v4181_v47 = vunpack.i.l.bf16 %v4180_v55 }
 0x1a6   : > { %v1221_v32 = vsel %vm1218_vm2, %v1215_v56, %v4181_v47  ;;  %v1222_v5 = vsel %vm1218_vm2, %v1216_v41, %v4182_v46 }
 0x1a7   : > { %v4155_v6 = vpop.permute.xlu1 %4154  ;;  %v4190_v7 = vpop.permute.xlu0 %4189 }
 0x1a8   : > { %v4157_v14 = vunpack.i.h.bf16 %v4155_v6  ;;  %v4156_v63 = vunpack.i.l.bf16 %v4155_v6  ;;  %v4192_v34 = vunpack.i.h.bf16 %v4190_v7  ;;  %v4191_v54 = vunpack.i.l.bf16 %v4190_v7 }
 0x1aa   : > { %v1219_v50 = vsel %vm1218_vm2, %v1213_v49, %v4156_v63  ;;  %v1220_v60 = vsel %vm1218_vm2, %v1214_v17, %v4157_v14  ;;  %v1227_v55 = vsel %vm1224_vm3, %v1221_v32, %v4191_v54  ;;  %v1228_v57 = vsel %vm1224_vm3, %v1222_v5, %v4192_v34 }
 0x1ab   : > { %v4165_v8 = vpop.permute.xlu1 %4164  ;;  %v4200_v11 = vpop.permute.xlu0 %4199  ;;  %v1225_v51 = vsel %vm1224_vm3, %v1219_v50, %v4161_v23  ;;  %v1226_v31 = vsel %vm1224_vm3, %v1220_v60, %v4162_v22 }
 0x1ac   : > { %v4167_v21 = vunpack.i.h.bf16 %v4165_v8  ;;  %v4166_v18 = vunpack.i.l.bf16 %v4165_v8  ;;  %v4202_v36 = vunpack.i.h.bf16 %v4200_v11  ;;  %v4201_v62 = vunpack.i.l.bf16 %v4200_v11 }
 0x1ae   : > { %v1231_v45 = vsel %vm1230_vm4, %v1225_v51, %v4166_v18  ;;  %v1232_v37 = vsel %vm1230_vm4, %v1226_v31, %v4167_v21  ;;  %v1233_v24 = vsel %vm1230_vm4, %v1227_v55, %v4201_v62  ;;  %v1234_v4 = vsel %vm1230_vm4, %v1228_v57, %v4202_v36 }
 0x1af   : > { %v4175_v9 = vpop.permute.xlu1 %4174  ;;  %v5334_v12 = vpop.permute.xlu0 %4209 }
 0x1b0   : > { %v4177_v27 = vunpack.i.h.bf16 %v4175_v9  ;;  %v4176_v48 = vunpack.i.l.bf16 %v4175_v9  ;;  %v4212_v16 = vunpack.i.h.bf16 %v5334_v12  ;;  %v4211_v7 = vunpack.i.l.bf16 %v5334_v12 }
 0x1b2   : > { %v1237_v2 = vsel %vm1236_vm5, %v1231_v45, %v4176_v48  ;;  %v1238_v3 = vsel %vm1236_vm5, %v1232_v37, %v4177_v27 }
 0x1b3   : > { %v4185_v10 = vpop.permute.xlu1 %4184  ;;  %v4215_v33 = vpop.permute.xlu0 %4214 }
 0x1b4   : > { %v4187_v28 = vunpack.i.h.bf16 %v4185_v10  ;;  %v4186_v29 = vunpack.i.l.bf16 %v4185_v10  ;;  %v4217_v8 = vunpack.i.h.bf16 %v4215_v33  ;;  %v4216_v11 = vunpack.i.l.bf16 %v4215_v33 }
 0x1b6   : > { %v1243_v0 = vsel %vm1242_vm6, %v1237_v2, %v4186_v29  ;;  %v1244_v38 = vsel %vm1242_vm6, %v1238_v3, %v4187_v28 }
 0x1b7   : > { %v4195_v43 = vpop.permute.xlu1 %4194  ;;  %v1127_v58 = vpop.permute.xlu0 %1126 }
 0x1b8   : > { %v4197_v35 = vunpack.i.h.bf16 %v4195_v43  ;;  %v4196_v40 = vunpack.i.l.bf16 %v4195_v43 }
 0x1ba   : > { %v1249_v25 = vsel %vm1248_vm7, %v1243_v0, %v4196_v40  ;;  %v1250_v53 = vsel %vm1248_vm7, %v1244_v38, %v4197_v35 }
 0x1bb   : > { %v4205_v19 = vpop.permute.xlu1 %4204  ;;  %v4018_v20 = vpack.c.bf16 %v1250_v53, %v1249_v25  ;;  %v1167_v21 = vpop.permute.xlu0 %1166 }
 0x1bc   : > { %v4207_v59 = vunpack.i.h.bf16 %v4205_v19  ;;  %v4206_v6 = vunpack.i.l.bf16 %v4205_v19 }
 0x1bd   : > { %4019 = vmatpush3.bf16.msra.mxu0 %v4018_v20 }
 0x1be   : > { %v1239_v26 = vsel %vm1236_vm5, %v1233_v24, %v4206_v6  ;;  %v1240_v13 = vsel %vm1236_vm5, %v1234_v4, %v4207_v59  ;;  %4020 = vmatprep.subr.bf16.mxu0 %v4724_v39 }
 0x1bf   : > { %v1087_v14 = vpop.permute.xlu1 %1086  ;;  %v1245_v63 = vsel %vm1242_vm6, %v1239_v26, %v4211_v7  ;;  %v1246_v9 = vsel %vm1242_vm6, %v1240_v13, %v4212_v16  ;;  %v1207_v27 = vpop.permute.xlu0 %1206 }
 0x1c0   : > { %v1217_v17 = vsel %vm297_vm0, %v5318_v61, %v1087_v14  ;;  %v1251_v49 = vsel %vm1248_vm7, %v1245_v63, %v4216_v11  ;;  %v1252_v12 = vsel %vm1248_vm7, %v1246_v9, %v4217_v8 }
 0x1c1   : > { %v1223_v50 = vsel %vm1218_vm2, %v1217_v17, %v5332_v44  ;;  %v4021_v60 = vpack.c.bf16 %v1252_v12, %v1251_v49 }
 0x1c2   : > { %v1229_v18 = vsel %vm1224_vm3, %v1223_v50, %v1127_v58 }
 0x1c3   : > { %v1147_v10 = vpop.permute.xlu1 %1146  ;;  %4022 = vmatpush3.bf16.msra.mxu0 %v4021_v60 }
 0x1c4   : > { %v1235_v22 = vsel %vm1230_vm4, %v1229_v18, %v1147_v10  ;;  %3991 = vmatprep.subr.mxu0 %v6397_v52 }
 0x1c5   : > { %v1241_v61 = vsel %vm1236_vm5, %v1235_v22, %v1167_v21 }
 0x1c7   : > { %v1187_v23 = vpop.permute.xlu1 %1186 }
 0x1c8   : > { %v1247_v48 = vsel %vm1242_vm6, %v1241_v61, %v1187_v23 }
 0x1c9   : > { %v1253_v44 = vsel %vm1248_vm7, %v1247_v48, %v1207_v27 }
 0x1ca   : > { %3992 = vmatpush3.msk.msra.mxu0 %vm1265_vm8, %v1253_v44 }
 0x1cb   : > { %3994 = vmatmul.mubr.msk.f32.vlgmr.msra.gmra.mrb[0].mxu0 %vm1261_vm9, %v1254_v1 }
 0x1d8   : > { %v1259_v15 = vpop.permute.xlu1 %1258 }
 0x29e   : > { %v1335_v28 = vpop.f32.mrb[0].mxu0 }
 0x29f   : > { %v1336_v29 = vadd.f32 %v1335_v28, %v1259_v15  ;;  %v3995_v46 = vpop.f32.mrb[1].mxu0 }
 0x2a1   : > { %v5389_v47 = vmax.f32 %v1336_v29, 0.0 }
 0x2a3   : > { %1397 = vrot.lane.b32.xlu1 %v5389_v47, %s4729_s17  ;;  %1394 = vrot.lane.b32.xlu0 %v5389_v47, %s4730_s27 }
 0x2a7   : > { %1403 = vrot.lane.b32.xlu1 %v5389_v47, %s4731_s9  ;;  %1400 = vrot.lane.b32.xlu0 %v5389_v47, %s4732_s10 }
 0x2ab   : > { %1409 = vrot.lane.b32.xlu1 %v5389_v47, %s6396_s6  ;;  %1406 = vrot.lane.b32.xlu0 %v5389_v47, %s4734_s15  ;;  %s4736_s6 = smov 1  }
 0x2af   : > { %1412 = vrot.lane.b32.xlu0 %v5389_v47, %s4735_s28 }
 0x315   : > { %v1398_v51 = vpop.permute.xlu1 %1397  ;;  %v1395_v31 = vpop.permute.xlu0 %1394 }
 0x316   : > { %v1415_v43 = vcombine.low %v5389_v47, %v1398_v51  ;;  %v1416_v53 = vcombine.high %v5389_v47, %v1398_v51 }
 0x318   : > { %v1423_v3 = vrot.slane %v1415_v43, %v5046_v30  ;;  %v1430_v6 = vrot.slane %v1416_v53, %v5046_v30 }
 0x319   : > { %v1404_v33 = vpop.permute.xlu1 %1403  ;;  %v1401_v34 = vpop.permute.xlu0 %1400 }
 0x31a   : > { %v1431_v54 = vcombine.low %v1395_v31, %v1401_v34  ;;  %v1432_v0 = vcombine.high %v1395_v31, %v1401_v34 }
 0x31c   : > { %v1439_v35 = vrot.slane %v1431_v54, %v5046_v30  ;;  %v1446_v20 = vrot.slane %v1432_v0, %v5046_v30 }
 0x31d   : > { %v1410_v45 = vpop.permute.xlu1 %1409  ;;  %v1407_v37 = vpop.permute.xlu0 %1406 }
 0x31e   : > { %v1447_v40 = vcombine.low %v1404_v33, %v1410_v45  ;;  %v1479_v38 = vcombine.low %v1423_v3, %v1439_v35  ;;  %v1448_v41 = vcombine.high %v1404_v33, %v1410_v45  ;;  %v1480_v55 = vcombine.high %v1423_v3, %v1439_v35 }
 0x31f   : > { %v1495_v8 = vcombine.low %v1430_v6, %v1446_v20  ;;  %v1496_v9 = vcombine.high %v1430_v6, %v1446_v20 }
 0x320   : > { %v1455_v56 = vrot.slane %v1447_v40, %v5046_v30  ;;  %v1462_v57 = vrot.slane %v1448_v41, %v5046_v30  ;;  %v1487_v58 = vrot.slane %v1479_v38, %v5068_v42  ;;  %v1494_v11 = vrot.slane %v1480_v55, %v5068_v42 }
 0x321   : > { %v1413_v2 = vpop.permute.xlu0 %1412  ;;  %v1503_v17 = vrot.slane %v1495_v8, %v5068_v42  ;;  %v1510_v60 = vrot.slane %v1496_v9, %v5068_v42 }
 0x322   : > { %v1463_v36 = vcombine.low %v1407_v37, %v1413_v2  ;;  %v1464_v62 = vcombine.high %v1407_v37, %v1413_v2 }
 0x324   : > { %v1471_v25 = vrot.slane %v1463_v36, %v5046_v30  ;;  %v1478_v32 = vrot.slane %v1464_v62, %v5046_v30 }
 0x326   : > { %v1511_v5 = vcombine.low %v1455_v56, %v1471_v25  ;;  %v1512_v19 = vcombine.high %v1455_v56, %v1471_v25  ;;  %v1527_v24 = vcombine.low %v1462_v57, %v1478_v32  ;;  %v1528_v26 = vcombine.high %v1462_v57, %v1478_v32 }
 0x328   : > { %v1519_v59 = vrot.slane %v1511_v5, %v5068_v42  ;;  %v1526_v7 = vrot.slane %v1512_v19, %v5068_v42  ;;  %v1535_v63 = vrot.slane %v1527_v24, %v5068_v42  ;;  %v1542_v50 = vrot.slane %v1528_v26, %v5068_v42 }
 0x32a   : > { %v1544_v4 = vcombine.high %v1487_v58, %v1519_v59  ;;  %v1543_v16 = vcombine.low %v1487_v58, %v1519_v59  ;;  %v1546_v13 = vcombine.high %v1494_v11, %v1526_v7  ;;  %v1545_v14 = vcombine.low %v1494_v11, %v1526_v7 }
 0x32b   : > { %v1548_v49 = vcombine.high %v1503_v17, %v1535_v63  ;;  %v1547_v12 = vcombine.low %v1503_v17, %v1535_v63  ;;  %v1550_v21 = vcombine.high %v1510_v60, %v1542_v50  ;;  %v1549_v18 = vcombine.low %v1510_v60, %v1542_v50 }
 0x32c   : > { %1561 = vrot.lane.b32.xlu0 %v1544_v4, %s4736_s6  ;;  %1559 = vrot.lane.b32.xlu1 %v1543_v16, %s4736_s6 }
 0x330   : > { %1565 = vrot.lane.b32.xlu0 %v1546_v13, %s4736_s6  ;;  %1563 = vrot.lane.b32.xlu1 %v1545_v14, %s4736_s6 }
 0x334   : > { %1569 = vrot.lane.b32.xlu0 %v1548_v49, %s4736_s6  ;;  %1567 = vrot.lane.b32.xlu1 %v1547_v12, %s4736_s6 }
 0x338   : > { %1573 = vrot.lane.b32.xlu0 %v1550_v21, %s4736_s6  ;;  %1571 = vrot.lane.b32.xlu1 %v1549_v18, %s4736_s6  ;;  %s4737_s6 = smov 126  }
 0x39e   : > { %v1562_v10 = vpop.permute.xlu0 %1561  ;;  %v1560_v22 = vpop.permute.xlu1 %1559 }
 0x39f   : > { %1585 = vst.msk [vmem:[#allocation3 + $0x11] sm:$0xff] %vm1583_vm15, %v1562_v10  ;;  %1584 = vst.msk [vmem:[#allocation3 + $0x1] sm:$0xff] %vm1583_vm15, %v1560_v22 }
 0x3a2   : > { %v1566_v23 = vpop.permute.xlu0 %1565  ;;  %v1564_v61 = vpop.permute.xlu1 %1563 }
 0x3a3   : > { %1587 = vst.msk [vmem:[#allocation3 + $0x31] sm:$0xff] %vm1583_vm15, %v1566_v23  ;;  %1586 = vst.msk [vmem:[#allocation3 + $0x21] sm:$0xff] %vm1583_vm15, %v1564_v61 }
 0x3a6   : > { %v5523_v27 = vld [vmem:[#allocation3 + $0x10] sm:$0xff]  ;;  %v1570_v44 = vpop.permute.xlu0 %1569  ;;  %v1568_v15 = vpop.permute.xlu1 %1567  ;;  %v1592_v28 = vld [vmem:[#allocation3] sm:$0xff] }
 0x3a7   : > { %v5525_v48 = vld [vmem:[#allocation3 + $0x11] sm:$0xff]  ;;  %1601 = vst.msk [vmem:[#allocation4 + $0x8] sm:$0xff] %vm297_vm0, %v5523_v27  ;;  %v5535_v29 = vld [vmem:[#allocation3 + $0x1] sm:$0xff]  ;;  %1626 = vrot.lane.b32.xlu0 %v5523_v27, %s4715_s24  ;;  %1600 = vst.msk [vmem:[#allocation4] sm:$0xff] %vm297_vm0, %v1592_v28  ;;  %1624 = vrot.lane.b32.xlu1 %v1592_v28, %s4715_s24 }
 0x3a8   : > { %v5527_v1 = vld [vmem:[#allocation3 + $0x12] sm:$0xff]  ;;  %1716 = vst.msk [vmem:[#allocation4 + $0xc8] sm:$0xff] %vm297_vm0, %v5525_v48  ;;  %v5537_v46 = vld [vmem:[#allocation3 + $0x2] sm:$0xff]  ;;  %1715 = vst.msk [vmem:[#allocation4 + $0xc0] sm:$0xff] %vm297_vm0, %v5535_v29 }
 0x3a9   : > { %1831 = vst.msk [vmem:[#allocation4 + $0x188] sm:$0xff] %vm297_vm0, %v5527_v1  ;;  %1830 = vst.msk [vmem:[#allocation4 + $0x180] sm:$0xff] %vm297_vm0, %v5537_v46 }
 0x3aa   : > { %1589 = vst.msk [vmem:[#allocation3 + $0x51] sm:$0xff] %vm1583_vm15, %v1570_v44  ;;  %1588 = vst.msk [vmem:[#allocation3 + $0x41] sm:$0xff] %vm1583_vm15, %v1568_v15  ;;  %v1595_v47 = vld [vmem:[#allocation3 + $0x30] sm:$0xff]  ;;  %v1574_v33 = vpop.permute.xlu0 %1573  ;;  %v1572_v34 = vpop.permute.xlu1 %1571  ;;  %v1594_v54 = vld [vmem:[#allocation3 + $0x20] sm:$0xff] }
 0x3ab   : > { %v5549_v51 = vld [vmem:[#allocation3 + $0x31] sm:$0xff]  ;;  %1603 = vst.msk [vmem:[#allocation4 + $0x18] sm:$0xff] %vm297_vm0, %v1595_v47  ;;  %v5558_v45 = vld [vmem:[#allocation3 + $0x21] sm:$0xff]  ;;  %1630 = vrot.lane.b32.xlu0 %v1595_v47, %s4715_s24  ;;  %1602 = vst.msk [vmem:[#allocation4 + $0x10] sm:$0xff] %vm297_vm0, %v1594_v54  ;;  %1628 = vrot.lane.b32.xlu1 %v1594_v54, %s4715_s24 }
 0x3ac   : > { %v5551_v31 = vld [vmem:[#allocation3 + $0x32] sm:$0xff]  ;;  %1718 = vst.msk [vmem:[#allocation4 + $0xd8] sm:$0xff] %vm297_vm0, %v5549_v51  ;;  %v5560_v37 = vld [vmem:[#allocation3 + $0x22] sm:$0xff]  ;;  %1717 = vst.msk [vmem:[#allocation4 + $0xd0] sm:$0xff] %vm297_vm0, %v5558_v45 }
 0x3ad   : > { %1833 = vst.msk [vmem:[#allocation4 + $0x198] sm:$0xff] %vm297_vm0, %v5551_v31  ;;  %1832 = vst.msk [vmem:[#allocation4 + $0x190] sm:$0xff] %vm297_vm0, %v5560_v37 }
 0x3ae   : > { %1591 = vst.msk [vmem:[#allocation3 + $0x71] sm:$0xff] %vm1583_vm15, %v1574_v33  ;;  %1590 = vst.msk [vmem:[#allocation3 + $0x61] sm:$0xff] %vm1583_vm15, %v1572_v34 }
 0x3b1   : > { %v1597_v43 = vld [vmem:[#allocation3 + $0x50] sm:$0xff]  ;;  %v1596_v2 = vld [vmem:[#allocation3 + $0x40] sm:$0xff] }
 0x3b2   : > { %v5571_v35 = vld [vmem:[#allocation3 + $0x51] sm:$0xff]  ;;  %1605 = vst.msk [vmem:[#allocation4 + $0x28] sm:$0xff] %vm297_vm0, %v1597_v43  ;;  %v5580_v3 = vld [vmem:[#allocation3 + $0x41] sm:$0xff]  ;;  %1634 = vrot.lane.b32.xlu0 %v1597_v43, %s4715_s24  ;;  %1604 = vst.msk [vmem:[#allocation4 + $0x20] sm:$0xff] %vm297_vm0, %v1596_v2  ;;  %1632 = vrot.lane.b32.xlu1 %v1596_v2, %s4715_s24 }
 0x3b3   : > { %v5573_v40 = vld [vmem:[#allocation3 + $0x52] sm:$0xff]  ;;  %1720 = vst.msk [vmem:[#allocation4 + $0xe8] sm:$0xff] %vm297_vm0, %v5571_v35  ;;  %v5582_v36 = vld [vmem:[#allocation3 + $0x42] sm:$0xff]  ;;  %1719 = vst.msk [vmem:[#allocation4 + $0xe0] sm:$0xff] %vm297_vm0, %v5580_v3 }
 0x3b4   : > { %1835 = vst.msk [vmem:[#allocation4 + $0x1a8] sm:$0xff] %vm297_vm0, %v5573_v40  ;;  %1834 = vst.msk [vmem:[#allocation4 + $0x1a0] sm:$0xff] %vm297_vm0, %v5582_v36  ;;  %v4406_v53 = vld [vmem:[#allocation4] ss:$16 sps:$4 sm:$0xff]   ;;  %v4408_v32 = vld [vmem:[#allocation4 + $0x8] ss:$16 sps:$4 sm:$0xff]  }
 0x3b5   : > { %v1599_v62 = vld [vmem:[#allocation3 + $0x70] sm:$0xff]  ;;  %v1598_v41 = vld [vmem:[#allocation3 + $0x60] sm:$0xff]  ;;  %v5615_v5 = vrot.slane %v4406_v53, %v5046_v30  ;;  %v5618_v19 = vrot.slane %v4408_v32, %v5046_v30  ;;  %v4432_v7 = vld [vmem:[#allocation4 + $0xc8] ss:$16 sps:$4 sm:$0xff]  }
 0x3b6   : > { %v5591_v0 = vld [vmem:[#allocation3 + $0x71] sm:$0xff]  ;;  %1607 = vst.msk [vmem:[#allocation4 + $0x38] sm:$0xff] %vm297_vm0, %v1599_v62  ;;  %v5600_v56 = vld [vmem:[#allocation3 + $0x61] sm:$0xff]  ;;  %1638 = vrot.lane.b32.xlu0 %v1599_v62, %s4715_s24  ;;  %1606 = vst.msk [vmem:[#allocation4 + $0x30] sm:$0xff] %vm297_vm0, %v1598_v41  ;;  %1636 = vrot.lane.b32.xlu1 %v1598_v41, %s4715_s24  ;;  %v5653_v12 = vrot.slane %v4432_v7, %v5046_v30 }
 0x3b7   : > { %v5593_v38 = vld [vmem:[#allocation3 + $0x72] sm:$0xff]  ;;  %1722 = vst.msk [vmem:[#allocation4 + $0xf8] sm:$0xff] %vm297_vm0, %v5591_v0  ;;  %v5602_v25 = vld [vmem:[#allocation3 + $0x62] sm:$0xff]  ;;  %1721 = vst.msk [vmem:[#allocation4 + $0xf0] sm:$0xff] %vm297_vm0, %v5600_v56  ;;  %v2072_v59 = vcombine.low %v5615_v5, %v5618_v19 }
 0x3b8   : > { %1837 = vst.msk [vmem:[#allocation4 + $0x1b8] sm:$0xff] %vm297_vm0, %v5593_v38  ;;  %1836 = vst.msk [vmem:[#allocation4 + $0x1b0] sm:$0xff] %vm297_vm0, %v5602_v25  ;;  %v4430_v16 = vld [vmem:[#allocation4 + $0xc0] ss:$16 sps:$4 sm:$0xff]   ;;  %v4456_v63 = vld [vmem:[#allocation4 + $0x188] ss:$16 sps:$4 sm:$0xff]  }
 0x3b9   : > { %v5635_v8 = vrot.slane %v2072_v59, %v5068_v42  ;;  %v4454_v14 = vld [vmem:[#allocation4 + $0x180] ss:$16 sps:$4 sm:$0xff]   ;;  %v5650_v49 = vrot.slane %v4430_v16, %v5046_v30  ;;  %v5662_v18 = vrot.slane %v4456_v63, %v5046_v30  ;;  %v1937_v59 = vld [vmem:[#allocation4 + $0x8] sm:$0xff] }
 0x3ba   : > { %1675 = vrot.lane.b32.xlu0 %v5523_v27, %s4737_s6  ;;  %1673 = vrot.lane.b32.xlu1 %v1592_v28, %s4737_s6  ;;  %v5659_v21 = vrot.slane %v4454_v14, %v5046_v30 }
 0x3bb   : > { %v2480_v22 = vcombine.low %v5650_v49, %v5653_v12 }
 0x3bc   : > { %v2888_v27 = vcombine.low %v5659_v21, %v5662_v18 }
 0x3bd   : > { %v4412_v20 = vld [vmem:[#allocation4 + $0x28] ss:$16 sps:$4 sm:$0xff]   ;;  %v4410_v55 = vld [vmem:[#allocation4 + $0x20] ss:$16 sps:$4 sm:$0xff]   ;;  %v5686_v15 = vrot.slane %v2480_v22, %v5068_v42 }
 0x3be   : > { %1679 = vrot.lane.b32.xlu0 %v1595_v47, %s4737_s6  ;;  %1677 = vrot.lane.b32.xlu1 %v1594_v54, %s4737_s6  ;;  %v5623_v57 = vrot.slane %v4412_v20, %v5046_v30  ;;  %v5626_v58 = vrot.slane %v4410_v55, %v5046_v30  ;;  %v4434_v6 = vld [vmem:[#allocation4 + $0xe0] ss:$16 sps:$4 sm:$0xff]   ;;  %v4436_v24 = vld [vmem:[#allocation4 + $0xe8] ss:$16 sps:$4 sm:$0xff]   ;;  %v5694_v47 = vrot.slane %v2888_v27, %v5068_v42 }
 0x3bf   : > { %v5641_v26 = vrot.slane %v4434_v6, %v5046_v30  ;;  %v5644_v13 = vrot.slane %v4436_v24, %v5046_v30  ;;  %v4458_v9 = vld [vmem:[#allocation4 + $0x1a0] ss:$16 sps:$4 sm:$0xff]   ;;  %v4460_v50 = vld [vmem:[#allocation4 + $0x1a8] ss:$16 sps:$4 sm:$0xff]  }
 0x3c0   : > { %v2104_v4 = vcombine.low %v5626_v58, %v5623_v57  ;;  %v5665_v10 = vrot.slane %v4458_v9, %v5046_v30  ;;  %v5672_v23 = vrot.slane %v4460_v50, %v5046_v30 }
 0x3c1   : > { %v2512_v60 = vcombine.low %v5641_v26, %v5644_v13 }
 0x3c2   : > { %1683 = vrot.lane.b32.xlu0 %v1597_v43, %s4737_s6  ;;  %1681 = vrot.lane.b32.xlu1 %v1596_v2, %s4737_s6  ;;  %v5638_v11 = vrot.slane %v2104_v4, %v5068_v42  ;;  %v2920_v44 = vcombine.low %v5665_v10, %v5672_v23  ;;  %v1939_v43 = vld [vmem:[#allocation4 + $0x18] sm:$0xff]  ;;  %v1941_v2 = vld [vmem:[#allocation4 + $0x28] sm:$0xff] }
 0x3c3   : > { %v5677_v61 = vrot.slane %v2512_v60, %v5068_v42  ;;  %v2025_v16 = vcombine.high %v1937_v59, %v1939_v43  ;;  %v2105_v60 = vcombine.high %v5626_v58, %v5623_v57 }
 0x3c4   : > { %v2136_v17 = vcombine.low %v5635_v8, %v5638_v11  ;;  %v5691_v28 = vrot.slane %v2920_v44, %v5068_v42 }
 0x3c5   : > { %v2544_v33 = vcombine.low %v5686_v15, %v5677_v61 }
 0x3c6   : > { %1687 = vrot.lane.b32.xlu0 %v1599_v62, %s4737_s6  ;;  %1685 = vrot.lane.b32.xlu1 %v1598_v41, %s4737_s6  ;;  %v1940_v62 = vld [vmem:[#allocation4 + $0x20] sm:$0xff] }
 0x3ca   : > { %1741 = vrot.lane.b32.xlu0 %v5525_v48, %s4715_s24  ;;  %1739 = vrot.lane.b32.xlu1 %v5535_v29, %s4715_s24 }
 0x3ce   : > { %1745 = vrot.lane.b32.xlu0 %v5549_v51, %s4715_s24  ;;  %1743 = vrot.lane.b32.xlu1 %v5558_v45, %s4715_s24 }
 0x3d2   : > { %1749 = vrot.lane.b32.xlu0 %v5571_v35, %s4715_s24  ;;  %1747 = vrot.lane.b32.xlu1 %v5580_v3, %s4715_s24 }
 0x3d6   : > { %1753 = vrot.lane.b32.xlu0 %v5591_v0, %s4715_s24  ;;  %1751 = vrot.lane.b32.xlu1 %v5600_v56, %s4715_s24 }
 0x3da   : > { %1790 = vrot.lane.b32.xlu0 %v5525_v48, %s4737_s6  ;;  %1788 = vrot.lane.b32.xlu1 %v5535_v29, %s4737_s6 }
 0x3de   : > { %1794 = vrot.lane.b32.xlu0 %v5549_v51, %s4737_s6  ;;  %1792 = vrot.lane.b32.xlu1 %v5558_v45, %s4737_s6  ;;  %v1938_v45 = vld [vmem:[#allocation4 + $0x10] sm:$0xff] }
 0x3e2   : > { %1798 = vrot.lane.b32.xlu0 %v5571_v35, %s4737_s6  ;;  %1796 = vrot.lane.b32.xlu1 %v5580_v3, %s4737_s6  ;;  %v1942_v35 = vld [vmem:[#allocation4 + $0x30] sm:$0xff] }
 0x3e3   : > { %v2041_v32 = vcombine.high %v1940_v62, %v1942_v35  ;;  %v2119_v62 = vrot.slane %v2105_v60, %v5068_v42 }
 0x3e5   : > { %v5771_v27 = vrot.slane %v2041_v32, %v5046_v30 }
 0x3e6   : > { %1802 = vrot.lane.b32.xlu0 %v5591_v0, %s4737_s6  ;;  %1800 = vrot.lane.b32.xlu1 %v5600_v56, %s4737_s6  ;;  %v1936_v56 = vld [vmem:[#allocation4] sm:$0xff] }
 0x3e7   : > { %v2009_v6 = vcombine.high %v1936_v56, %v1938_v45 }
 0x3ea   : > { %1856 = vrot.lane.b32.xlu0 %v5527_v1, %s4715_s24  ;;  %1854 = vrot.lane.b32.xlu1 %v5537_v46, %s4715_s24 }
 0x3ee   : > { %1860 = vrot.lane.b32.xlu0 %v5551_v31, %s4715_s24  ;;  %1858 = vrot.lane.b32.xlu1 %v5560_v37, %s4715_s24 }
 0x3f2   : > { %1864 = vrot.lane.b32.xlu0 %v5573_v40, %s4715_s24  ;;  %1862 = vrot.lane.b32.xlu1 %v5582_v36, %s4715_s24 }
 0x3f6   : > { %1868 = vrot.lane.b32.xlu0 %v5593_v38, %s4715_s24  ;;  %1866 = vrot.lane.b32.xlu1 %v5602_v25, %s4715_s24  ;;  %s6415_s24 = smov 80  }
 0x3fa   : > { %1905 = vrot.lane.b32.xlu0 %v5527_v1, %s4737_s6  ;;  %1903 = vrot.lane.b32.xlu1 %v5537_v46, %s4737_s6 }
 0x3fe   : > { %1909 = vrot.lane.b32.xlu0 %v5551_v31, %s4737_s6  ;;  %1907 = vrot.lane.b32.xlu1 %v5560_v37, %s4737_s6 }
 0x402   : > { %1913 = vrot.lane.b32.xlu0 %v5573_v40, %s4737_s6  ;;  %1911 = vrot.lane.b32.xlu1 %v5582_v36, %s4737_s6  ;;  %v1943_v40 = vld [vmem:[#allocation4 + $0x38] sm:$0xff] }
 0x403   : > { %v2057_v20 = vcombine.high %v1941_v2, %v1943_v40 }
 0x405   : > { %v5774_v44 = vrot.slane %v2057_v20, %v5046_v30 }
 0x406   : > { %1917 = vrot.lane.b32.xlu0 %v5593_v38, %s4737_s6  ;;  %1915 = vrot.lane.b32.xlu1 %v5602_v25, %s4737_s6 }
 0x419   : > { %v1627_v48 = vpop.permute.xlu0 %1626  ;;  %v1625_v1 = vpop.permute.xlu1 %1624 }
 0x41a   : > { %1650 = vst.msk [vmem:[#allocation4 + $0x48] sm:$0xff] %vm297_vm0, %v1627_v48  ;;  %1649 = vst.msk [vmem:[#allocation4 + $0x40] sm:$0xff] %vm297_vm0, %v1625_v1 }
 0x41d   : > { %v1631_v29 = vpop.permute.xlu0 %1630  ;;  %v1629_v46 = vpop.permute.xlu1 %1628 }
 0x41e   : > { %1652 = vst.msk [vmem:[#allocation4 + $0x58] sm:$0xff] %vm297_vm0, %v1631_v29  ;;  %1651 = vst.msk [vmem:[#allocation4 + $0x50] sm:$0xff] %vm297_vm0, %v1629_v46 }
 0x421   : > { %v1944_v25 = vld [vmem:[#allocation4 + $0x40] sm:$0xff]  ;;  %v1945_v53 = vld [vmem:[#allocation4 + $0x48] sm:$0xff] }
 0x424   : > { %v1635_v51 = vpop.permute.xlu0 %1634  ;;  %v1633_v31 = vpop.permute.xlu1 %1632 }
 0x425   : > { %1654 = vst.msk [vmem:[#allocation4 + $0x68] sm:$0xff] %vm297_vm0, %v1635_v51  ;;  %1653 = vst.msk [vmem:[#allocation4 + $0x60] sm:$0xff] %vm297_vm0, %v1633_v31  ;;  %v1946_v3 = vld [vmem:[#allocation4 + $0x50] sm:$0xff]  ;;  %v1947_v36 = vld [vmem:[#allocation4 + $0x58] sm:$0xff]  ;;  %v5778_v51 = vrot.slane %v2009_v6, %v5046_v30 }
 0x426   : > { %v4414_v0 = vld [vmem:[#allocation4 + $0x40] ss:$16 sps:$4 sm:$0xff]   ;;  %v4416_v38 = vld [vmem:[#allocation4 + $0x48] ss:$16 sps:$4 sm:$0xff]   ;;  %v2145_v24 = vcombine.high %v1944_v25, %v1946_v3  ;;  %v2161_v4 = vcombine.high %v1945_v53, %v1947_v36 }
 0x427   : > { %v2152_v7 = vrot.slane %v4414_v0, %v5046_v30  ;;  %v2168_v14 = vrot.slane %v4416_v38, %v5046_v30  ;;  %v2120_v0 = vcombine.low %v5771_v27, %v5774_v44 }
 0x428   : > { %v1639_v54 = vpop.permute.xlu0 %1638  ;;  %v1637_v37 = vpop.permute.xlu1 %1636  ;;  %v5781_v31 = vrot.slane %v2145_v24, %v5046_v30  ;;  %v5784_v57 = vrot.slane %v2161_v4, %v5046_v30 }
 0x429   : > { %1656 = vst.msk [vmem:[#allocation4 + $0x78] sm:$0xff] %vm297_vm0, %v1639_v54  ;;  %1655 = vst.msk [vmem:[#allocation4 + $0x70] sm:$0xff] %vm297_vm0, %v1637_v37  ;;  %v2073_v54 = vcombine.high %v5615_v5, %v5618_v19  ;;  %v5791_v37 = vrot.slane %v2025_v16, %v5046_v30  ;;  %v2209_v40 = vcombine.high %v2152_v7, %v2168_v14 }
 0x42a   : > { %v2208_v2 = vcombine.low %v2152_v7, %v2168_v14  ;;  %v2224_v56 = vcombine.low %v5781_v31, %v5784_v57  ;;  %v2137_v16 = vcombine.high %v5635_v8, %v5638_v11  ;;  %v5817_v7 = vrot.slane %v2120_v0, %v5068_v42 }
 0x42b   : > { %v2087_v25 = vrot.slane %v2073_v54, %v5068_v42  ;;  %v2088_v53 = vcombine.low %v5778_v51, %v5791_v37  ;;  %v2223_v20 = vrot.slane %v2209_v40, %v5068_v42  ;;  %v2121_v40 = vcombine.high %v5771_v27, %v5774_v44  ;;  %v5849_v44 = vld [vmem:[#allocation4 + $0xc0] sm:$0xff] }
 0x42c   : > { %v1676_v41 = vpop.permute.xlu0 %1675  ;;  %v1674_v55 = vpop.permute.xlu1 %1673  ;;  %v1949_v9 = vld [vmem:[#allocation4 + $0x68] sm:$0xff]  ;;  %v1948_v1 = vld [vmem:[#allocation4 + $0x60] sm:$0xff]  ;;  %v5809_v59 = vrot.slane %v2208_v2, %v5068_v42  ;;  %v2225_v2 = vcombine.high %v5781_v31, %v5784_v57 }
 0x42d   : > { %1699 = vst.msk [vmem:[#allocation4 + $0x88] sm:$0xff] %vm297_vm0, %v1676_v41  ;;  %1698 = vst.msk [vmem:[#allocation4 + $0x80] sm:$0xff] %vm297_vm0, %v1674_v55  ;;  %v2138_v4 = vcombine.low %v2087_v25, %v2119_v62  ;;  %v2139_v0 = vcombine.high %v2087_v25, %v2119_v62  ;;  %v1966_v25 = vld [vmem:[#allocation4 + $0xf0] sm:$0xff] }
 0x430   : > { %v1680_v63 = vpop.permute.xlu0 %1679  ;;  %v1951_v50 = vld [vmem:[#allocation4 + $0x78] sm:$0xff]  ;;  %v1678_v48 = vpop.permute.xlu1 %1677  ;;  %v1950_v29 = vld [vmem:[#allocation4 + $0x70] sm:$0xff] }
 0x431   : > { %v4420_v22 = vld [vmem:[#allocation4 + $0x68] ss:$16 sps:$4 sm:$0xff]   ;;  %1701 = vst.msk [vmem:[#allocation4 + $0x98] sm:$0xff] %vm297_vm0, %v1680_v63  ;;  %v4418_v46 = vld [vmem:[#allocation4 + $0x60] ss:$16 sps:$4 sm:$0xff]   ;;  %v2193_v58 = vcombine.high %v1949_v9, %v1951_v50  ;;  %1700 = vst.msk [vmem:[#allocation4 + $0x90] sm:$0xff] %vm297_vm0, %v1678_v48  ;;  %v2177_v43 = vcombine.high %v1948_v1, %v1950_v29  ;;  %v2096_v48 = vrot.slane %v2088_v53, %v5068_v42 }
 0x432   : > { %v2200_v45 = vrot.slane %v4420_v22, %v5046_v30  ;;  %v2184_v35 = vrot.slane %v4418_v46, %v5046_v30  ;;  %v2232_v22 = vrot.slane %v2224_v56, %v5068_v42  ;;  %v1964_v56 = vld [vmem:[#allocation4 + $0xe0] sm:$0xff] }
 0x433   : > { %v2207_v3 = vrot.slane %v2193_v58, %v5046_v30  ;;  %v2191_v5 = vrot.slane %v2177_v43, %v5046_v30 }
 0x434   : > { %v1684_v36 = vpop.permute.xlu0 %1683  ;;  %v1682_v19 = vpop.permute.xlu1 %1681  ;;  %v2241_v38 = vcombine.high %v2184_v35, %v2200_v45  ;;  %v2240_v41 = vcombine.low %v2184_v35, %v2200_v45 }
 0x435   : > { %1703 = vst.msk [vmem:[#allocation4 + $0xa8] sm:$0xff] %vm297_vm0, %v1684_v36  ;;  %1702 = vst.msk [vmem:[#allocation4 + $0xa0] sm:$0xff] %vm297_vm0, %v1682_v19  ;;  %v2256_v32 = vcombine.low %v2191_v5, %v2207_v3  ;;  %v2257_v1 = vcombine.high %v2191_v5, %v2207_v3  ;;  %v2140_v3 = vcombine.low %v2096_v48, %v5817_v7  ;;  %v5841_v19 = vld [vmem:[#allocation4 + $0xd0] sm:$0xff] }
 0x436   : > { %v2255_v55 = vrot.slane %v2241_v38, %v5068_v42  ;;  %v5812_v6 = vrot.slane %v2240_v41, %v5068_v42  ;;  %v2089_v5 = vcombine.high %v5778_v51, %v5791_v37  ;;  %v5843_v38 = vld [vmem:[#allocation4 + $0xd8] sm:$0xff]  ;;  %v5858_v37 = vld [vmem:[#allocation4 + $0xc8] sm:$0xff] }
 0x437   : > { %v5820_v14 = vrot.slane %v2256_v32, %v5068_v42  ;;  %v5847_v27 = vrot.slane %v2257_v1, %v5068_v42  ;;  %v5861_v32 = vrot.slane %v2121_v40, %v5068_v42 }
 0x438   : > { %v1688_v24 = vpop.permute.xlu0 %1687  ;;  %v1686_v63 = vpop.permute.xlu1 %1685  ;;  %v2274_v9 = vcombine.low %v2223_v20, %v2255_v55  ;;  %v2273_v50 = vcombine.high %v5809_v59, %v5812_v6  ;;  %v2272_v60 = vcombine.low %v5809_v59, %v5812_v6  ;;  %v4422_v29 = vld [vmem:[#allocation4 + $0x80] ss:$16 sps:$4 sm:$0xff]   ;;  %v4424_v46 = vld [vmem:[#allocation4 + $0x88] ss:$16 sps:$4 sm:$0xff]   ;;  %v2275_v43 = vcombine.high %v2223_v20, %v2255_v55 }
 0x439   : > { %1705 = vst.msk [vmem:[#allocation4 + $0xb8] sm:$0xff] %vm297_vm0, %v1688_v24  ;;  %1704 = vst.msk [vmem:[#allocation4 + $0xb0] sm:$0xff] %vm297_vm0, %v1686_v63  ;;  %v2276_v45 = vcombine.low %v2232_v22, %v5820_v14  ;;  %v5852_v31 = vrot.slane %v4422_v29, %v5046_v30  ;;  %v5855_v57 = vrot.slane %v4424_v46, %v5046_v30  ;;  %v1967_v24 = vld [vmem:[#allocation4 + $0xf8] sm:$0xff] }
 0x43a   : > { %v4224_v58 = vpack.i.bf16 %v2274_v9, %v2138_v4  ;;  %v4219_v54 = vpack.i.bf16 %v2273_v50, %v2137_v16  ;;  %v4229_v41 = vpack.i.bf16 %v2275_v43, %v2139_v0  ;;  %v2277_v51 = vcombine.high %v2232_v22, %v5820_v14  ;;  %v1954_v22 = vld [vmem:[#allocation4 + $0x90] sm:$0xff] }
 0x43b   : > { %v4234_v62 = vpack.i.bf16 %v2276_v45, %v2140_v3  ;;  %v5864_v20 = vrot.slane %v2225_v2, %v5068_v42  ;;  %v2417_v16 = vcombine.high %v5849_v44, %v5841_v19  ;;  %v2433_v14 = vcombine.high %v5858_v37, %v5843_v38  ;;  %v1952_v2 = vld [vmem:[#allocation4 + $0x80] sm:$0xff]  ;;  %v1953_v19 = vld [vmem:[#allocation4 + $0x88] sm:$0xff] }
 0x43c   : > { %v1742_v35 = vpop.permute.xlu0 %1741  ;;  %v1740_v36 = vpop.permute.xlu1 %1739  ;;  %4225 = vrot.lane.b32.xlu0 %v4224_v58, %s4720_s29  ;;  %4220 = vrot.lane.b32.xlu1 %v4219_v54, %s4718_s26  ;;  %v2141_v9 = vcombine.high %v2096_v48, %v5817_v7  ;;  %v2103_v50 = vrot.slane %v2089_v5, %v5068_v42  ;;  %v2481_v46 = vcombine.high %v5650_v49, %v5653_v12  ;;  %v1955_v54 = vld [vmem:[#allocation4 + $0x98] sm:$0xff]  ;;  %v1956_v45 = vld [vmem:[#allocation4 + $0xa0] sm:$0xff]  ;;  %v1957_v43 = vld [vmem:[#allocation4 + $0xa8] sm:$0xff] }
 0x43d   : > { %1765 = vst.msk [vmem:[#allocation4 + $0x108] sm:$0xff] %vm297_vm0, %v1742_v35  ;;  %1764 = vst.msk [vmem:[#allocation4 + $0x100] sm:$0xff] %vm297_vm0, %v1740_v36  ;;  %v2278_v58 = vcombine.low %v5864_v20, %v5847_v27  ;;  %v2344_v7 = vcombine.low %v5852_v31, %v5855_v57  ;;  %v2449_v48 = vcombine.high %v1964_v56, %v1966_v25  ;;  %v1965_v36 = vld [vmem:[#allocation4 + $0xe8] sm:$0xff] }
 0x43e   : > { %v4244_v40 = vpack.i.bf16 %v2277_v51, %v2141_v9  ;;  %v2142_v5 = vcombine.low %v2103_v50, %v5861_v32  ;;  %v2513_v38 = vcombine.high %v5641_v26, %v5644_v13  ;;  %v2281_v44 = vcombine.high %v1952_v2, %v1954_v22 }
 0x43f   : > { %v2345_v37 = vcombine.high %v5852_v31, %v5855_v57  ;;  %v2297_v25 = vcombine.high %v1953_v19, %v1955_v54  ;;  %v5895_v26 = vrot.slane %v2344_v7, %v5068_v42  ;;  %v5898_v13 = vrot.slane %v2449_v48, %v5046_v30 }
 0x440   : > { %v1746_v53 = vpop.permute.xlu0 %1745  ;;  %v1959_v55 = vld [vmem:[#allocation4 + $0xb8] sm:$0xff]  ;;  %v1744_v63 = vpop.permute.xlu1 %1743  ;;  %4235 = vrot.lane.b32.xlu0 %v4234_v62, %s4721_s7  ;;  %4230 = vrot.lane.b32.xlu1 %v4229_v41, %s4719_s23  ;;  %v1958_v1 = vld [vmem:[#allocation4 + $0xb0] sm:$0xff]  ;;  %v2465_v62 = vcombine.high %v1965_v36, %v1967_v24  ;;  %v2527_v9 = vrot.slane %v2513_v38, %v5068_v42  ;;  %v2495_v54 = vrot.slane %v2481_v46, %v5068_v42 }
 0x441   : > { %v4428_v4 = vld [vmem:[#allocation4 + $0xa8] ss:$16 sps:$4 sm:$0xff]   ;;  %1767 = vst.msk [vmem:[#allocation4 + $0x118] sm:$0xff] %vm297_vm0, %v1746_v53  ;;  %v4426_v29 = vld [vmem:[#allocation4 + $0xa0] ss:$16 sps:$4 sm:$0xff]   ;;  %1766 = vst.msk [vmem:[#allocation4 + $0x110] sm:$0xff] %vm297_vm0, %v1744_v63  ;;  %v2313_v49 = vcombine.high %v1956_v45, %v1958_v1  ;;  %v2329_v12 = vcombine.high %v1957_v43, %v1959_v55  ;;  %v4254_v53 = vpack.i.bf16 %v2278_v58, %v2142_v5 }
 0x442   : > { %v2336_v35 = vrot.slane %v4428_v4, %v5046_v30  ;;  %v2320_v3 = vrot.slane %v4426_v29, %v5046_v30  ;;  %v2279_v55 = vcombine.high %v5864_v20, %v5847_v27  ;;  %v2143_v27 = vcombine.high %v2103_v50, %v5861_v32 }
 0x443   : > { %v5905_v31 = vrot.slane %v2313_v49, %v5046_v30  ;;  %v5908_v57 = vrot.slane %v2329_v12, %v5046_v30  ;;  %v2545_v20 = vcombine.high %v5686_v15, %v5677_v61  ;;  %v5915_v22 = vrot.slane %v2465_v62, %v5046_v30 }
 0x444   : > { %v1750_v0 = vpop.permute.xlu0 %1749  ;;  %v1748_v41 = vpop.permute.xlu1 %1747  ;;  %4245 = vrot.lane.b32.xlu0 %v4244_v40, %s4722_s8  ;;  %v2376_v51 = vcombine.low %v2320_v3, %v2336_v35  ;;  %v2377_v56 = vcombine.high %v2320_v3, %v2336_v35  ;;  %v2359_v58 = vrot.slane %v2345_v37, %v5068_v42  ;;  %v5923_v32 = vrot.slane %v2281_v44, %v5046_v30 }
 0x445   : > { %1769 = vst.msk [vmem:[#allocation4 + $0x128] sm:$0xff] %vm297_vm0, %v1750_v0  ;;  %1768 = vst.msk [vmem:[#allocation4 + $0x120] sm:$0xff] %vm297_vm0, %v1748_v41  ;;  %v5926_v50 = vrot.slane %v2297_v25, %v5046_v30  ;;  %v5931_v45 = vrot.slane %v2417_v16, %v5046_v30  ;;  %v5934_v43 = vrot.slane %v2433_v14, %v5046_v30 }
 0x446   : > { %v5901_v24 = vrot.slane %v2376_v51, %v5068_v42  ;;  %v2391_v4 = vrot.slane %v2377_v56, %v5068_v42  ;;  %v4264_v35 = vpack.i.bf16 %v2279_v55, %v2143_v27  ;;  %v2392_v40 = vcombine.low %v5905_v31, %v5908_v57 }
 0x447   : > { %v2546_v46 = vcombine.low %v2495_v54, %v2527_v9  ;;  %v2360_v16 = vcombine.low %v5923_v32, %v5926_v50  ;;  %v2528_v14 = vcombine.low %v5898_v13, %v5915_v22  ;;  %v2496_v3 = vcombine.low %v5931_v45, %v5934_v43 }
 0x448   : > { %v1754_v63 = vpop.permute.xlu0 %1753  ;;  %v1752_v1 = vpop.permute.xlu1 %1751  ;;  %4255 = vrot.lane.b32.xlu0 %v4254_v53, %s4723_s13  ;;  %v2409_v29 = vcombine.high %v5895_v26, %v5901_v24  ;;  %v2410_v48 = vcombine.low %v2359_v58, %v2391_v4  ;;  %v4438_v49 = vld [vmem:[#allocation4 + $0x100] ss:$16 sps:$4 sm:$0xff]   ;;  %v4440_v12 = vld [vmem:[#allocation4 + $0x108] ss:$16 sps:$4 sm:$0xff]   ;;  %v2408_v0 = vcombine.low %v5895_v26, %v5901_v24  ;;  %v2411_v19 = vcombine.high %v2359_v58, %v2391_v4 }
 0x449   : > { %1771 = vst.msk [vmem:[#allocation4 + $0x138] sm:$0xff] %vm297_vm0, %v1754_v63  ;;  %1770 = vst.msk [vmem:[#allocation4 + $0x130] sm:$0xff] %vm297_vm0, %v1752_v1  ;;  %v2400_v38 = vrot.slane %v2392_v40, %v5068_v42  ;;  %v2547_v51 = vcombine.high %v2495_v54, %v2527_v9  ;;  %v2368_v37 = vrot.slane %v2360_v16, %v5068_v42 }
 0x44a   : > { %v4239_v7 = vpack.i.bf16 %v2545_v20, %v2409_v29  ;;  %v4249_v5 = vpack.i.bf16 %v2546_v46, %v2410_v48  ;;  %v2536_v56 = vrot.slane %v2528_v14, %v5068_v42  ;;  %v2504_v53 = vrot.slane %v2496_v3, %v5068_v42 }
 0x44b   : > { %v5958_v55 = vrot.slane %v4438_v49, %v5046_v30  ;;  %v5961_v4 = vrot.slane %v4440_v12, %v5046_v30  ;;  %v4259_v27 = vpack.i.bf16 %v2547_v51, %v2411_v19  ;;  %v2412_v20 = vcombine.low %v2368_v37, %v2400_v38  ;;  %v6002_v51 = vld [vmem:[#allocation4 + $0x118] sm:$0xff] }
 0x44c   : > { %v1791_v2 = vpop.permute.xlu0 %1790  ;;  %v1789_v36 = vpop.permute.xlu1 %1788  ;;  %4265 = vrot.lane.b32.xlu0 %v4264_v35, %s4725_s16  ;;  %4240 = vrot.lane.b32.xlu1 %v4239_v7, %s4718_s26  ;;  %v2393_v9 = vcombine.high %v5905_v31, %v5908_v57  ;;  %v2548_v54 = vcombine.low %v2504_v53, %v2536_v56  ;;  %v2361_v35 = vcombine.high %v5923_v32, %v5926_v50 }
 0x44d   : > { %1814 = vst.msk [vmem:[#allocation4 + $0x148] sm:$0xff] %vm297_vm0, %v1791_v2  ;;  %1813 = vst.msk [vmem:[#allocation4 + $0x140] sm:$0xff] %vm297_vm0, %v1789_v36  ;;  %v2529_v7 = vcombine.high %v5898_v13, %v5915_v22  ;;  %v2616_v31 = vcombine.low %v5958_v55, %v5961_v4  ;;  %v2413_v40 = vcombine.high %v2368_v37, %v2400_v38 }
 0x44e   : > { %v4269_v57 = vpack.i.bf16 %v2548_v54, %v2412_v20  ;;  %v2407_v2 = vrot.slane %v2393_v9, %v5068_v42  ;;  %v2497_v36 = vcombine.high %v5931_v45, %v5934_v43  ;;  %v2549_v22 = vcombine.high %v2504_v53, %v2536_v56 }
 0x44f   : > { %v2375_v50 = vrot.slane %v2361_v35, %v5068_v42  ;;  %v2543_v16 = vrot.slane %v2529_v7, %v5068_v42  ;;  %v5994_v14 = vrot.slane %v2616_v31, %v5068_v42 }
 0x450   : > { %v1795_v44 = vpop.permute.xlu0 %1794  ;;  %v4444_v62 = vld [vmem:[#allocation4 + $0x128] ss:$16 sps:$4 sm:$0xff]   ;;  %v1793_v41 = vpop.permute.xlu1 %1792  ;;  %4250 = vrot.lane.b32.xlu1 %v4249_v5, %s4720_s29  ;;  %v4442_v25 = vld [vmem:[#allocation4 + $0x120] ss:$16 sps:$4 sm:$0xff]   ;;  %v4279_v45 = vpack.i.bf16 %v2549_v22, %v2413_v40  ;;  %v2511_v3 = vrot.slane %v2497_v36, %v5068_v42 }
 0x451   : > { %1816 = vst.msk [vmem:[#allocation4 + $0x158] sm:$0xff] %vm297_vm0, %v1795_v44  ;;  %1815 = vst.msk [vmem:[#allocation4 + $0x150] sm:$0xff] %vm297_vm0, %v1793_v41  ;;  %v5964_v63 = vrot.slane %v4444_v62, %v5046_v30  ;;  %v5969_v1 = vrot.slane %v4442_v25, %v5046_v30  ;;  %v2414_v43 = vcombine.low %v2375_v50, %v2407_v2  ;;  %v1974_v37 = vld [vmem:[#allocation4 + $0x130] sm:$0xff]  ;;  %v1975_v56 = vld [vmem:[#allocation4 + $0x138] sm:$0xff] }
 0x452   : > { %v2550_v44 = vcombine.low %v2511_v3, %v2543_v16  ;;  %v2415_v41 = vcombine.high %v2375_v50, %v2407_v2  ;;  %v2551_v35 = vcombine.high %v2511_v3, %v2543_v16  ;;  %v1973_v40 = vld [vmem:[#allocation4 + $0x128] sm:$0xff]  ;;  %v1970_v50 = vld [vmem:[#allocation4 + $0x110] sm:$0xff] }
 0x453   : > { %v2648_v48 = vcombine.low %v5969_v1, %v5964_v63  ;;  %v2601_v16 = vcombine.high %v1973_v40, %v1975_v56  ;;  %v2617_v56 = vcombine.high %v5958_v55, %v5961_v4 }
 0x454   : > { %v1799_v29 = vpop.permute.xlu0 %1798  ;;  %v1797_v58 = vpop.permute.xlu1 %1796  ;;  %4260 = vrot.lane.b32.xlu1 %v4259_v27, %s4719_s23  ;;  %v4289_v62 = vpack.i.bf16 %v2550_v44, %v2414_v43  ;;  %v4299_v22 = vpack.i.bf16 %v2551_v35, %v2415_v41  ;;  %v1977_v43 = vld [vmem:[#allocation4 + $0x148] sm:$0xff]  ;;  %v1968_v41 = vld [vmem:[#allocation4 + $0x100] sm:$0xff] }
 0x455   : > { %1818 = vst.msk [vmem:[#allocation4 + $0x168] sm:$0xff] %vm297_vm0, %v1799_v29  ;;  %1817 = vst.msk [vmem:[#allocation4 + $0x160] sm:$0xff] %vm297_vm0, %v1797_v58  ;;  %v5986_v32 = vrot.slane %v2648_v48, %v5068_v42 }
 0x457   : > { %v2680_v19 = vcombine.low %v5994_v14, %v5986_v32  ;;  %v2681_v4 = vcombine.high %v5994_v14, %v5986_v32 }
 0x458   : > { %v1803_v46 = vpop.permute.xlu0 %1802  ;;  %v1801_v13 = vpop.permute.xlu1 %1800  ;;  %4270 = vrot.lane.b32.xlu1 %v4269_v57, %s4721_s7  ;;  %v4446_v49 = vld [vmem:[#allocation4 + $0x140] ss:$16 sps:$4 sm:$0xff]   ;;  %v4448_v12 = vld [vmem:[#allocation4 + $0x148] ss:$16 sps:$4 sm:$0xff]  }
 0x459   : > { %1820 = vst.msk [vmem:[#allocation4 + $0x178] sm:$0xff] %vm297_vm0, %v1803_v46  ;;  %1819 = vst.msk [vmem:[#allocation4 + $0x170] sm:$0xff] %vm297_vm0, %v1801_v13  ;;  %v1979_v25 = vld [vmem:[#allocation4 + $0x158] sm:$0xff]  ;;  %v2696_v53 = vrot.slane %v4446_v49, %v5046_v30  ;;  %v2712_v27 = vrot.slane %v4448_v12, %v5046_v30  ;;  %v1969_v57 = vld [vmem:[#allocation4 + $0x108] sm:$0xff] }
 0x45a   : > { %v1978_v2 = vld [vmem:[#allocation4 + $0x150] sm:$0xff]  ;;  %v2569_v44 = vcombine.high %v1969_v57, %v6002_v51 }
 0x45b   : > { %v2752_v12 = vcombine.low %v2696_v53, %v2712_v27 }
 0x45c   : > { %v1857_v5 = vpop.permute.xlu0 %1856  ;;  %v1855_v38 = vpop.permute.xlu1 %1854  ;;  %4280 = vrot.lane.b32.xlu1 %v4279_v45, %s4722_s8  ;;  %v1981_v9 = vld [vmem:[#allocation4 + $0x168] sm:$0xff]  ;;  %v1980_v7 = vld [vmem:[#allocation4 + $0x160] sm:$0xff] }
 0x45d   : > { %1880 = vst.msk [vmem:[#allocation4 + $0x1c8] sm:$0xff] %vm297_vm0, %v1857_v5  ;;  %1879 = vst.msk [vmem:[#allocation4 + $0x1c0] sm:$0xff] %vm297_vm0, %v1855_v38  ;;  %v1972_v45 = vld [vmem:[#allocation4 + $0x120] sm:$0xff]  ;;  %v2649_v38 = vcombine.high %v5969_v1, %v5964_v63  ;;  %v2553_v63 = vcombine.high %v1968_v41, %v1970_v50 }
 0x45e   : > { %v1976_v5 = vld [vmem:[#allocation4 + $0x140] sm:$0xff] }
 0x45f   : > { %v2689_v35 = vcombine.high %v1976_v5, %v1978_v2  ;;  %v4472_v41 = vld [vmem:[#allocation4 + $0x1a4] ss:$16 sps:$4 sm:$0xff]  }
 0x460   : > { %v1861_v20 = vpop.permute.xlu0 %1860  ;;  %v1983_v29 = vld [vmem:[#allocation4 + $0x178] sm:$0xff]  ;;  %v1859_v54 = vpop.permute.xlu1 %1858  ;;  %4290 = vrot.lane.b32.xlu1 %v4289_v62, %s4723_s13  ;;  %v1982_v48 = vld [vmem:[#allocation4 + $0x170] sm:$0xff]  ;;  %v2585_v62 = vcombine.high %v1972_v45, %v1974_v37  ;;  %v6026_v37 = vrot.slane %v2752_v12, %v5068_v42  ;;  %v2631_v12 = vrot.slane %v2617_v56, %v5068_v42 }
 0x461   : > { %v4452_v58 = vld [vmem:[#allocation4 + $0x168] ss:$16 sps:$4 sm:$0xff]   ;;  %1882 = vst.msk [vmem:[#allocation4 + $0x1d8] sm:$0xff] %vm297_vm0, %v1861_v20  ;;  %v4450_v31 = vld [vmem:[#allocation4 + $0x160] ss:$16 sps:$4 sm:$0xff]   ;;  %1881 = vst.msk [vmem:[#allocation4 + $0x1d0] sm:$0xff] %vm297_vm0, %v1859_v54  ;;  %v2721_v46 = vcombine.high %v1980_v7, %v1982_v48  ;;  %v2737_v13 = vcombine.high %v1981_v9, %v1983_v29  ;;  %v2705_v20 = vcombine.high %v1977_v43, %v1979_v25 }
 0x462   : > { %v2744_v36 = vrot.slane %v4452_v58, %v5046_v30  ;;  %v2728_v49 = vrot.slane %v4450_v31, %v5046_v30  ;;  %v2753_v58 = vcombine.high %v2696_v53, %v2712_v27  ;;  %v6035_v27 = vrot.slane %v2601_v16, %v5046_v30  ;;  %v4470_v45 = vld [vmem:[#allocation4 + $0x184] ss:$16 sps:$4 sm:$0xff]   ;;  %v4471_v43 = vld [vmem:[#allocation4 + $0x18c] ss:$16 sps:$4 sm:$0xff]  }
 0x463   : > { %v6020_v1 = vrot.slane %v2721_v46, %v5046_v30  ;;  %v6023_v51 = vrot.slane %v2737_v13, %v5046_v30  ;;  %v2663_v7 = vrot.slane %v2649_v38, %v5068_v42  ;;  %v6041_v48 = vrot.slane %v2585_v62, %v5046_v30 }
 0x464   : > { %v1865_v3 = vpop.permute.xlu0 %1864  ;;  %v1863_v9 = vpop.permute.xlu1 %1862  ;;  %4300 = vrot.lane.b32.xlu1 %v4299_v22, %s4725_s16  ;;  %v2784_v29 = vcombine.low %v2728_v49, %v2744_v36  ;;  %v2785_v54 = vcombine.high %v2728_v49, %v2744_v36  ;;  %v6044_v31 = vrot.slane %v2705_v20, %v5046_v30  ;;  %v2767_v2 = vrot.slane %v2753_v58, %v5068_v42 }
 0x465   : > { %1884 = vst.msk [vmem:[#allocation4 + $0x1e8] sm:$0xff] %vm297_vm0, %v1865_v3  ;;  %1883 = vst.msk [vmem:[#allocation4 + $0x1e0] sm:$0xff] %vm297_vm0, %v1863_v9  ;;  %v6051_v36 = vrot.slane %v2689_v35, %v5046_v30  ;;  %v6057_v13 = vrot.slane %v2553_v63, %v5046_v30  ;;  %v6060_v22 = vrot.slane %v2569_v44, %v5046_v30 }
 0x466   : > { %v6029_v25 = vrot.slane %v2784_v29, %v5068_v42  ;;  %v6032_v53 = vrot.slane %v2785_v54, %v5068_v42  ;;  %v2800_v50 = vcombine.low %v6020_v1, %v6023_v51  ;;  %v2664_v62 = vcombine.low %v6041_v48, %v6035_v27  ;;  %v4473_v29 = vld [vmem:[#allocation4 + $0x1ac] ss:$16 sps:$4 sm:$0xff]  }
 0x467   : > { %v2682_v20 = vcombine.low %v2631_v12, %v2663_v7  ;;  %v2768_v9 = vcombine.low %v6051_v36, %v6044_v31  ;;  %v2632_v58 = vcombine.low %v6057_v13, %v6060_v22  ;;  %v6079_v35 = vrot.slane %v4470_v45, %v5046_v30 }
 0x468   : > { %v1869_v55 = vpop.permute.xlu0 %1868  ;;  %v1867_v57 = vpop.permute.xlu1 %1866  ;;  %v2817_v40 = vcombine.high %v6026_v37, %v6029_v25  ;;  %v2816_v46 = vcombine.low %v6026_v37, %v6029_v25  ;;  %v2818_v16 = vcombine.low %v2767_v2, %v6032_v53  ;;  %v4462_v3 = vld [vmem:[#allocation4 + $0x1c0] ss:$16 sps:$4 sm:$0xff]   ;;  %v4464_v5 = vld [vmem:[#allocation4 + $0x1c8] ss:$16 sps:$4 sm:$0xff]   ;;  %v6076_v54 = vrot.slane %v2800_v50, %v5068_v42 }
 0x469   : > { %1886 = vst.msk [vmem:[#allocation4 + $0x1f8] sm:$0xff] %vm297_vm0, %v1869_v55  ;;  %1885 = vst.msk [vmem:[#allocation4 + $0x1f0] sm:$0xff] %vm297_vm0, %v1867_v57  ;;  %v6082_v56 = vrot.slane %v4471_v43, %v5046_v30  ;;  %v2819_v55 = vcombine.high %v2767_v2, %v6032_v53  ;;  %v2984_v57 = vrot.slane %v4464_v5, %v5046_v30 }
 0x46a   : > { %v4274_v49 = vpack.i.bf16 %v2817_v40, %v2681_v4  ;;  %v4284_v63 = vpack.i.bf16 %v2818_v16, %v2682_v20  ;;  %v2968_v4 = vrot.slane %v4462_v3, %v5046_v30  ;;  %v2889_v50 = vcombine.high %v5659_v21, %v5662_v18 }
 0x46b   : > { %v2921_v45 = vcombine.high %v5665_v10, %v5672_v23  ;;  %v2683_v53 = vcombine.high %v2631_v12, %v2663_v7  ;;  %v2776_v2 = vrot.slane %v2768_v9, %v5068_v42  ;;  %v6098_v3 = vrot.slane %v4472_v41, %v5046_v30 }
 0x46c   : > { %v1906_v38 = vpop.permute.xlu0 %1905  ;;  %v1904_v44 = vpop.permute.xlu1 %1903  ;;  %4275 = vrot.lane.b32.xlu0 %v4274_v49, %s4718_s26  ;;  %v6088_v49 = vrot.slane %v2664_v62, %v5068_v42  ;;  %v6101_v5 = vrot.slane %v4473_v29, %v5046_v30  ;;  %v2640_v21 = vrot.slane %v2632_v58, %v5068_v42  ;;  %v2801_v10 = vcombine.high %v6020_v1, %v6023_v51 }
 0x46d   : > { %1929 = vst.msk [vmem:[#allocation4 + $0x208] sm:$0xff] %vm297_vm0, %v1906_v38  ;;  %1928 = vst.msk [vmem:[#allocation4 + $0x200] sm:$0xff] %vm297_vm0, %v1904_v44  ;;  %v2904_v23 = vcombine.low %v6079_v35, %v6082_v56  ;;  %v4294_v62 = vpack.i.bf16 %v2819_v55, %v2683_v53  ;;  %v2820_v44 = vcombine.low %v2776_v2, %v6076_v54 }
 0x46e   : > { %v3024_v9 = vcombine.low %v2968_v4, %v2984_v57  ;;  %v2684_v29 = vcombine.low %v2640_v21, %v6088_v49  ;;  %v2633_v58 = vcombine.high %v6057_v13, %v6060_v22  ;;  %v2665_v1 = vcombine.high %v6041_v48, %v6035_v27 }
 0x46f   : > { %v6118_v51 = vrot.slane %v2921_v45, %v5068_v42  ;;  %v3025_v53 = vcombine.high %v2968_v4, %v2984_v57  ;;  %v2821_v27 = vcombine.high %v2776_v2, %v6076_v54  ;;  %v2815_v48 = vrot.slane %v2801_v10, %v5068_v42 }
 0x470   : > { %v1910_v40 = vpop.permute.xlu0 %1909  ;;  %v4468_v38 = vld [vmem:[#allocation4 + $0x1e8] ss:$16 sps:$4 sm:$0xff]   ;;  %v1908_v43 = vpop.permute.xlu1 %1907  ;;  %4285 = vrot.lane.b32.xlu0 %v4284_v63, %s4720_s29  ;;  %v4466_v16 = vld [vmem:[#allocation4 + $0x1e0] ss:$16 sps:$4 sm:$0xff]   ;;  %v4476_v7 = vld [vmem:[#allocation4 + $0x1e4] ss:$16 sps:$4 sm:$0xff]   ;;  %v4304_v45 = vpack.i.bf16 %v2820_v44, %v2684_v29  ;;  %v2953_v4 = vcombine.high %v5694_v47, %v5691_v28  ;;  %v2679_v54 = vrot.slane %v2665_v1, %v5068_v42  ;;  %v2685_v10 = vcombine.high %v2640_v21, %v6088_v49 }
 0x471   : > { %1931 = vst.msk [vmem:[#allocation4 + $0x218] sm:$0xff] %vm297_vm0, %v1910_v40  ;;  %1930 = vst.msk [vmem:[#allocation4 + $0x210] sm:$0xff] %vm297_vm0, %v1908_v43  ;;  %v3016_v18 = vrot.slane %v4468_v38, %v5046_v30  ;;  %v4477_v12 = vld [vmem:[#allocation4 + $0x1ec] ss:$16 sps:$4 sm:$0xff]   ;;  %v3000_v20 = vrot.slane %v4466_v16, %v5046_v30  ;;  %v4474_v63 = vld [vmem:[#allocation4 + $0x1c4] ss:$16 sps:$4 sm:$0xff]   ;;  %v2769_v43 = vcombine.high %v6051_v36, %v6044_v31 }
 0x472   : > { %v4475_v40 = vld [vmem:[#allocation4 + $0x1cc] ss:$16 sps:$4 sm:$0xff]   ;;  %v3007_v13 = vrot.slane %v4476_v7, %v5046_v30  ;;  %v3023_v22 = vrot.slane %v4477_v12, %v5046_v30  ;;  %v2975_v57 = vrot.slane %v4474_v63, %v5046_v30  ;;  %v3039_v44 = vrot.slane %v3025_v53, %v5068_v42 }
 0x473   : > { %v3056_v38 = vcombine.low %v3000_v20, %v3016_v18  ;;  %v3057_v16 = vcombine.high %v3000_v20, %v3016_v18  ;;  %v2991_v2 = vrot.slane %v4475_v40, %v5046_v30  ;;  %v2783_v12 = vrot.slane %v2769_v43, %v5068_v42 }
 0x474   : > { %v1914_v41 = vpop.permute.xlu0 %1913  ;;  %v1912_v55 = vpop.permute.xlu1 %1911  ;;  %4295 = vrot.lane.b32.xlu0 %v4294_v62, %s4719_s23  ;;  %v2647_v20 = vrot.slane %v2633_v58, %v5068_v42  ;;  %v3072_v29 = vcombine.low %v3007_v13, %v3023_v22  ;;  %v4314_v1 = vpack.i.bf16 %v2821_v27, %v2685_v10  ;;  %v2912_v49 = vrot.slane %v2904_v23, %v5068_v42 }
 0x475   : > { %1933 = vst.msk [vmem:[#allocation4 + $0x228] sm:$0xff] %vm297_vm0, %v1914_v41  ;;  %1932 = vst.msk [vmem:[#allocation4 + $0x220] sm:$0xff] %vm297_vm0, %v1912_v55  ;;  %v6130_v41 = vrot.slane %v3024_v9, %v5068_v42  ;;  %v6133_v62 = vrot.slane %v3056_v38, %v5068_v42  ;;  %v3071_v31 = vrot.slane %v3057_v16, %v5068_v42 }
 0x476   : > { %v2903_v9 = vrot.slane %v2889_v50, %v5068_v42  ;;  %v2822_v40 = vcombine.low %v2783_v12, %v2815_v48  ;;  %v2936_v21 = vcombine.low %v6098_v3, %v6101_v5  ;;  %v3040_v38 = vcombine.low %v2975_v57, %v2991_v2 }
 0x477   : > { %v3089_v7 = vcombine.high %v6130_v41, %v6133_v62  ;;  %v3090_v55 = vcombine.low %v3039_v44, %v3071_v31  ;;  %v2686_v43 = vcombine.low %v2647_v20, %v2679_v54  ;;  %v3080_v27 = vrot.slane %v3072_v29, %v5068_v42 }
 0x478   : > { %v1918_v36 = vpop.permute.xlu0 %1917  ;;  %v1916_v18 = vpop.permute.xlu1 %1915  ;;  %4305 = vrot.lane.b32.xlu0 %v4304_v45, %s4721_s7  ;;  %v2954_v58 = vcombine.low %v2903_v9, %v6118_v51  ;;  %v4478_v53 = vld [vmem:[#allocation4 + $0x200] ss:$16 sps:$4 sm:$0xff]   ;;  %v4480_v50 = vld [vmem:[#allocation4 + $0x208] ss:$16 sps:$4 sm:$0xff]   ;;  %v2905_v23 = vcombine.high %v6079_v35, %v6082_v56  ;;  %v2937_v45 = vcombine.high %v6098_v3, %v6101_v5  ;;  %v2823_v10 = vcombine.high %v2783_v12, %v2815_v48 }
 0x479   : > { %1935 = vst.msk [vmem:[#allocation4 + $0x238] sm:$0xff] %vm297_vm0, %v1918_v36  ;;  %1934 = vst.msk [vmem:[#allocation4 + $0x230] sm:$0xff] %vm297_vm0, %v1916_v18  ;;  %v4309_v63 = vpack.i.bf16 %v3089_v7, %v2953_v4  ;;  %v3073_v36 = vcombine.high %v3007_v13, %v3023_v22  ;;  %v4324_v4 = vpack.i.bf16 %v2822_v40, %v2686_v43  ;;  %v4486_v40 = vld [vmem:[#allocation4 + $0x204] ss:$16 sps:$4 sm:$0xff]  }
 0x47a   : > { %v4319_v18 = vpack.i.bf16 %v3090_v55, %v2954_v58  ;;  %v3091_v7 = vcombine.high %v3039_v44, %v3071_v31  ;;  %v3048_v52 = vrot.slane %v3040_v38, %v5068_v42  ;;  %v3041_v34 = vcombine.high %v2975_v57, %v2991_v2 }
 0x47b   : > { %4310 = vrot.lane.b32.xlu1 %v4309_v63, %s4718_s26  ;;  %v2944_v63 = vrot.slane %v2936_v21, %v5068_v42  ;;  %v2687_v35 = vcombine.high %v2647_v20, %v2679_v54  ;;  %v3104_v56 = vrot.slane %v4478_v53, %v5046_v30  ;;  %v3120_v3 = vrot.slane %v4480_v50, %v5046_v30  ;;  %v4487_v21 = vld [vmem:[#allocation4 + $0x20c] ss:$16 sps:$4 sm:$0xff]  }
 0x47c   : > { %4315 = vrot.lane.b32.xlu0 %v4314_v1, %s4722_s8  ;;  %v2955_v1 = vcombine.high %v2903_v9, %v6118_v51  ;;  %v3093_v48 = vcombine.high %v3048_v52, %v3080_v27  ;;  %v3092_v13 = vcombine.low %v3048_v52, %v3080_v27  ;;  %v3087_v51 = vrot.slane %v3073_v36, %v5068_v42 }
 0x47d   : > { %v4334_v31 = vpack.i.bf16 %v2823_v10, %v2687_v35  ;;  %v2957_v9 = vcombine.high %v2912_v49, %v2944_v63  ;;  %v2956_v29 = vcombine.low %v2912_v49, %v2944_v63  ;;  %v2951_v54 = vrot.slane %v2937_v45, %v5068_v42 }
 0x47e   : > { %v4329_v12 = vpack.i.bf16 %v3091_v7, %v2955_v1  ;;  %v3055_v20 = vrot.slane %v3041_v34, %v5068_v42  ;;  %v3160_v52 = vcombine.low %v3104_v56, %v3120_v3  ;;  %v2919_v58 = vrot.slane %v2905_v23, %v5068_v42 }
 0x47f   : > { %4320 = vrot.lane.b32.xlu1 %v4319_v18, %s4720_s29  ;;  %v4344_v38 = vpack.i.bf16 %v3093_v48, %v2957_v9  ;;  %v4339_v43 = vpack.i.bf16 %v3092_v13, %v2956_v29  ;;  %v3111_v45 = vrot.slane %v4486_v40, %v5046_v30  ;;  %v3161_v23 = vcombine.high %v3104_v56, %v3120_v3 }
 0x480   : > { %v4484_v16 = vld [vmem:[#allocation4 + $0x228] ss:$16 sps:$4 sm:$0xff]   ;;  %4325 = vrot.lane.b32.xlu0 %v4324_v4, %s4723_s13  ;;  %v4482_v5 = vld [vmem:[#allocation4 + $0x220] ss:$16 sps:$4 sm:$0xff]   ;;  %v4488_v2 = vld [vmem:[#allocation4 + $0x224] ss:$16 sps:$4 sm:$0xff]   ;;  %v3094_v53 = vcombine.low %v3055_v20, %v3087_v51  ;;  %v2958_v27 = vcombine.low %v2919_v58, %v2951_v54  ;;  %v6188_v36 = vrot.slane %v3160_v52, %v5068_v42  ;;  %v3127_v4 = vrot.slane %v4487_v21, %v5046_v30 }
 0x481   : > { %v3152_v22 = vrot.slane %v4484_v16, %v5046_v30  ;;  %v3136_v57 = vrot.slane %v4482_v5, %v5046_v30  ;;  %v4489_v44 = vld [vmem:[#allocation4 + $0x22c] ss:$16 sps:$4 sm:$0xff]   ;;  %v3143_v16 = vrot.slane %v4488_v2, %v5046_v30  ;;  %v3095_v10 = vcombine.high %v3055_v20, %v3087_v51 }
 0x482   : > { %v3159_v34 = vrot.slane %v4489_v44, %v5046_v30  ;;  %v4349_v18 = vpack.i.bf16 %v3094_v53, %v2958_v27  ;;  %v2959_v5 = vcombine.high %v2919_v58, %v2951_v54  ;;  %v3175_v56 = vrot.slane %v3161_v23, %v5068_v42  ;;  %v3548_v20 = vld [vmem:[#allocation13] sm:$0xff] }
 0x483   : > { %4330 = vrot.lane.b32.xlu1 %v4329_v12, %s4719_s23  ;;  %v3192_v55 = vcombine.low %v3136_v57, %v3152_v22  ;;  %v3193_v49 = vcombine.high %v3136_v57, %v3152_v22  ;;  %v3176_v3 = vcombine.low %v3111_v45, %v3127_v4  ;;  %v3177_v12 = vcombine.high %v3111_v45, %v3127_v4 }
 0x484   : > { %4335 = vrot.lane.b32.xlu0 %v4334_v31, %s4725_s16  ;;  %v3208_v63 = vcombine.low %v3143_v16, %v3159_v34  ;;  %v4354_v48 = vpack.i.bf16 %v3095_v10, %v2959_v5  ;;  %v3209_v22 = vcombine.high %v3143_v16, %v3159_v34 }
 0x485   : > { %v6180_v50 = vrot.slane %v3192_v55, %v5068_v42  ;;  %v3207_v1 = vrot.slane %v3193_v49, %v5068_v42  ;;  %v3184_v31 = vrot.slane %v3176_v3, %v5068_v42  ;;  %v3191_v9 = vrot.slane %v3177_v12, %v5068_v42 }
 0x486   : > { %v3216_v51 = vrot.slane %v3208_v63, %v5068_v42  ;;  %v3223_v44 = vrot.slane %v3209_v22, %v5068_v42 }
 0x487   : > { %4340 = vrot.lane.b32.xlu1 %v4339_v43, %s4721_s7  ;;  %v3225_v7 = vcombine.high %v6188_v36, %v6180_v50  ;;  %v3224_v35 = vcombine.low %v6188_v36, %v6180_v50  ;;  %v3226_v13 = vcombine.low %v3175_v56, %v3207_v1  ;;  %v3227_v57 = vcombine.high %v3175_v56, %v3207_v1 }
 0x488   : > { %4345 = vrot.lane.b32.xlu0 %v4344_v38, %s4722_s8  ;;  %v3228_v2 = vcombine.low %v3184_v31, %v3216_v51  ;;  %v3229_v29 = vcombine.high %v3184_v31, %v3216_v51  ;;  %v3230_v54 = vcombine.low %v3191_v9, %v3223_v44  ;;  %v3231_v40 = vcombine.high %v3191_v9, %v3223_v44 }
 0x48b   : > { %4350 = vrot.lane.b32.xlu1 %v4349_v18, %s4723_s13 }
 0x48c   : > { %3257 = vrot.lane.b32.xlu0 %v3225_v7, %s4718_s26 }
 0x48f   : > { %4355 = vrot.lane.b32.xlu1 %v4354_v48, %s4725_s16 }
 0x490   : > { %3293 = vrot.lane.b32.xlu0 %v3226_v13, %s4720_s29  ;;  %s3966_s29 = sshll.u32 %s4791_s22, 10 }
 0x493   : > { %3329 = vrot.lane.b32.xlu1 %v3227_v57, %s4719_s23  ;;  %s3936_s23 = sshll.u32 %s4978_s30, 6 }
 0x494   : > { %3365 = vrot.lane.b32.xlu0 %v3228_v2, %s4721_s7  ;;  %s292_s7 = scalar_lea.vmem [#allocation14], %s3936_s23 }
 0x497   : > { %3401 = vrot.lane.b32.xlu1 %v3229_v29, %s4722_s8  ;;  %s3809_s8 = sshll.u32 %s292_s7, 4  ;;  %s6334_s8 = int_to_ptr.vmem [resolvable:$true] %s3809_s8 }
 0x498   : > { %3437 = vrot.lane.b32.xlu0 %v3230_v54, %s4723_s13 }
 0x49b   : > { %3473 = vrot.lane.b32.xlu1 %v3231_v40, %s4725_s16  ;;  %s6332_s16 = scalar_lea.hbm %s6392_s5, %s3966_s29 }
 0x49c   : > { %3551 = vperm.xlu0 %4359, %v3548_v20  }
 0x4ae   : > { %v4226_v52 = vpop.permute.xlu0 %4225  ;;  %v4221_v55 = vpop.permute.xlu1 %4220 }
 0x4af   : > { %v4223_v38 = vunpack.i.h.bf16 %v4221_v55  ;;  %v4222_v43 = vunpack.i.l.bf16 %v4221_v55  ;;  %v4228_v53 = vunpack.i.h.bf16 %v4226_v52  ;;  %v4227_v49 = vunpack.i.l.bf16 %v4226_v52 }
 0x4b1   : > { %v3485_v34 = vsel %vm297_vm0, %v2272_v60, %v4223_v38  ;;  %v3484_v27 = vsel %vm297_vm0, %v2136_v17, %v4222_v43 }
 0x4b2   : > { %v4236_v21 = vpop.permute.xlu0 %4235  ;;  %v4231_v58 = vpop.permute.xlu1 %4230  ;;  %v3493_v10 = vsel %vm1218_vm2, %v3484_v27, %v4227_v49  ;;  %v3494_v7 = vsel %vm1218_vm2, %v3485_v34, %v4228_v53 }
 0x4b3   : > { %v4233_v45 = vunpack.i.h.bf16 %v4231_v58  ;;  %v4232_v23 = vunpack.i.l.bf16 %v4231_v58  ;;  %v4238_v4 = vunpack.i.h.bf16 %v4236_v21  ;;  %v4237_v18 = vunpack.i.l.bf16 %v4236_v21 }
 0x4b5   : > { %v3502_v63 = vsel %vm1224_vm3, %v3493_v10, %v4232_v23  ;;  %v3503_v59 = vsel %vm1224_vm3, %v3494_v7, %v4233_v45 }
 0x4b6   : > { %v4246_v16 = vpop.permute.xlu0 %4245  ;;  %v3511_v8 = vsel %vm1230_vm4, %v3502_v63, %v4237_v18  ;;  %v3512_v11 = vsel %vm1230_vm4, %v3503_v59, %v4238_v4 }
 0x4b7   : > { %v4248_v6 = vunpack.i.h.bf16 %v4246_v16  ;;  %v4247_v60 = vunpack.i.l.bf16 %v4246_v16 }
 0x4b9   : > { %v3520_v48 = vsel %vm1236_vm5, %v3511_v8, %v4247_v60  ;;  %v3521_v13 = vsel %vm1236_vm5, %v3512_v11, %v4248_v6 }
 0x4ba   : > { %v4256_v1 = vpop.permute.xlu0 %4255 }
 0x4bb   : > { %v4258_v5 = vunpack.i.h.bf16 %v4256_v1  ;;  %v4257_v56 = vunpack.i.l.bf16 %v4256_v1 }
 0x4bd   : > { %v3529_v31 = vsel %vm1242_vm6, %v3520_v48, %v4257_v56  ;;  %v3530_v12 = vsel %vm1242_vm6, %v3521_v13, %v4258_v5 }
 0x4be   : > { %v4266_v17 = vpop.permute.xlu0 %4265  ;;  %v4241_v3 = vpop.permute.xlu1 %4240 }
 0x4bf   : > { %v4268_v51 = vunpack.i.h.bf16 %v4266_v17  ;;  %v4267_v22 = vunpack.i.l.bf16 %v4266_v17  ;;  %v4243_v40 = vunpack.i.h.bf16 %v4241_v3  ;;  %v4242_v52 = vunpack.i.l.bf16 %v4241_v3 }
 0x4c1   : > { %v3538_v57 = vsel %vm1248_vm7, %v3529_v31, %v4267_v22  ;;  %v3539_v2 = vsel %vm1248_vm7, %v3530_v12, %v4268_v51  ;;  %v3487_v16 = vsel %vm297_vm0, %v2544_v33, %v4243_v40  ;;  %v3486_v34 = vsel %vm297_vm0, %v2408_v0, %v4242_v52 }
 0x4c2   : > { %v4251_v44 = vpop.permute.xlu1 %4250  ;;  %v4024_v9 = vpack.c.bf16 %v3539_v2, %v3538_v57 }
 0x4c3   : > { %v4253_v55 = vunpack.i.h.bf16 %v4251_v44  ;;  %v4252_v21 = vunpack.i.l.bf16 %v4251_v44 }
 0x4c4   : > { %4025 = vmatpush3.bf16.msra.mxu1 %v4024_v9 }
 0x4c5   : > { %4026 = vmatprep.subr.bf16.mxu1 %v4724_v39  ;;  %v3495_v23 = vsel %vm1218_vm2, %v3486_v34, %v4252_v21  ;;  %v3496_v4 = vsel %vm1218_vm2, %v3487_v16, %v4253_v55 }
 0x4c6   : > { %v4261_v29 = vpop.permute.xlu1 %4260 }
 0x4c7   : > { %v4263_v38 = vunpack.i.h.bf16 %v4261_v29  ;;  %v4262_v43 = vunpack.i.l.bf16 %v4261_v29 }
 0x4c9   : > { %v3504_v7 = vsel %vm1224_vm3, %v3495_v23, %v4262_v43  ;;  %v3505_v1 = vsel %vm1224_vm3, %v3496_v4, %v4263_v38 }
 0x4ca   : > { %v4271_v54 = vpop.permute.xlu1 %4270 }
 0x4cb   : > { %v4273_v58 = vunpack.i.h.bf16 %v4271_v54  ;;  %v4272_v53 = vunpack.i.l.bf16 %v4271_v54 }
 0x4cd   : > { %v3513_v61 = vsel %vm1230_vm4, %v3504_v7, %v4272_v53  ;;  %v3514_v15 = vsel %vm1230_vm4, %v3505_v1, %v4273_v58 }
 0x4ce   : > { %v4281_v20 = vpop.permute.xlu1 %4280 }
 0x4cf   : > { %v4283_v27 = vunpack.i.h.bf16 %v4281_v20  ;;  %v4282_v45 = vunpack.i.l.bf16 %v4281_v20 }
 0x4d1   : > { %v3522_v26 = vsel %vm1236_vm5, %v3513_v61, %v4282_v45  ;;  %v3523_v24 = vsel %vm1236_vm5, %v3514_v15, %v4283_v27 }
 0x4d2   : > { %v4291_v49 = vpop.permute.xlu1 %4290 }
 0x4d3   : > { %v4293_v18 = vunpack.i.h.bf16 %v4291_v49  ;;  %v4292_v10 = vunpack.i.l.bf16 %v4291_v49 }
 0x4d5   : > { %v3531_v59 = vsel %vm1242_vm6, %v3522_v26, %v4292_v10  ;;  %v3532_v6 = vsel %vm1242_vm6, %v3523_v24, %v4293_v18 }
 0x4d6   : > { %v4301_v33 = vpop.permute.xlu1 %4300 }
 0x4d7   : > { %v4303_v0 = vunpack.i.h.bf16 %v4301_v33  ;;  %v4302_v63 = vunpack.i.l.bf16 %v4301_v33 }
 0x4d9   : > { %v3540_v60 = vsel %vm1248_vm7, %v3531_v59, %v4302_v63  ;;  %v3541_v5 = vsel %vm1248_vm7, %v3532_v6, %v4303_v0  ;;  %v6412_v59 = vcombine.low %v6130_v41, %v6133_v62 }
 0x4da   : > { %v4027_v56 = vpack.c.bf16 %v3541_v5, %v3540_v60  ;;  %v6413_v60 = vcombine.low %v5694_v47, %v5691_v28 }
 0x4dc   : > { %4028 = vmatpush3.bf16.msra.mxu1 %v4027_v56 }
 0x4dd   : > { %4029 = vmatprep.subr.bf16.mxu1 %v4724_v39 }
 0x4de   : > { %v4276_v8 = vpop.permute.xlu0 %4275 }
 0x4df   : > { %v4278_v51 = vunpack.i.h.bf16 %v4276_v8  ;;  %v4277_v22 = vunpack.i.l.bf16 %v4276_v8 }
 0x4e1   : > { %v3488_v20 = vsel %vm297_vm0, %v2680_v19, %v4277_v22  ;;  %v3489_v40 = vsel %vm297_vm0, %v2816_v46, %v4278_v51 }
 0x4e2   : > { %v4286_v11 = vpop.permute.xlu0 %4285 }
 0x4e3   : > { %v4288_v31 = vunpack.i.h.bf16 %v4286_v11  ;;  %v4287_v12 = vunpack.i.l.bf16 %v4286_v11 }
 0x4e5   : > { %v3497_v21 = vsel %vm1218_vm2, %v3488_v20, %v4287_v12  ;;  %v3498_v38 = vsel %vm1218_vm2, %v3489_v40, %v4288_v31 }
 0x4e6   : > { %v4296_v17 = vpop.permute.xlu0 %4295 }
 0x4e7   : > { %v4298_v57 = vunpack.i.h.bf16 %v4296_v17  ;;  %v4297_v2 = vunpack.i.l.bf16 %v4296_v17 }
 0x4e9   : > { %v3506_v53 = vsel %vm1224_vm3, %v3497_v21, %v4297_v2  ;;  %v3507_v49 = vsel %vm1224_vm3, %v3498_v38, %v4298_v57 }
 0x4ea   : > { %v4306_v3 = vpop.permute.xlu0 %4305 }
 0x4eb   : > { %v4308_v44 = vunpack.i.h.bf16 %v4306_v3  ;;  %v4307_v9 = vunpack.i.l.bf16 %v4306_v3 }
 0x4ed   : > { %v4311_v13 = vpop.permute.xlu1 %4310  ;;  %v3515_v32 = vsel %vm1230_vm4, %v3506_v53, %v4307_v9  ;;  %v3516_v14 = vsel %vm1230_vm4, %v3507_v49, %v4308_v44 }
 0x4ee   : > { %v4316_v48 = vpop.permute.xlu0 %4315  ;;  %v4313_v23 = vunpack.i.h.bf16 %v4311_v13  ;;  %v4312_v4 = vunpack.i.l.bf16 %v4311_v13 }
 0x4ef   : > { %v4318_v52 = vunpack.i.h.bf16 %v4316_v48  ;;  %v4317_v55 = vunpack.i.l.bf16 %v4316_v48 }
 0x4f0   : > { %v3491_v6 = vsel %vm297_vm0, %v6412_v59, %v4313_v23  ;;  %v3490_v5 = vsel %vm297_vm0, %v6413_v60, %v4312_v4 }
 0x4f1   : > { %v4321_v54 = vpop.permute.xlu1 %4320  ;;  %v3524_v25 = vsel %vm1236_vm5, %v3515_v32, %v4317_v55  ;;  %v3525_v46 = vsel %vm1236_vm5, %v3516_v14, %v4318_v52  ;;  %v3547_v32 = vld [vmem:[#allocation11] sm:$0xff] }
 0x4f2   : > { %v4326_v29 = vpop.permute.xlu0 %4325  ;;  %v4323_v7 = vunpack.i.h.bf16 %v4321_v54  ;;  %v4322_v1 = vunpack.i.l.bf16 %v4321_v54 }
 0x4f3   : > { %v4328_v43 = vunpack.i.h.bf16 %v4326_v29  ;;  %v4327_v58 = vunpack.i.l.bf16 %v4326_v29 }
 0x4f4   : > { %v3499_v56 = vsel %vm1218_vm2, %v3490_v5, %v4322_v1  ;;  %v3500_v8 = vsel %vm1218_vm2, %v3491_v6, %v4323_v7 }
 0x4f5   : > { %v4331_v37 = vpop.permute.xlu1 %4330  ;;  %v3533_v27 = vsel %vm1242_vm6, %v3524_v25, %v4327_v58  ;;  %v3534_v45 = vsel %vm1242_vm6, %v3525_v46, %v4328_v43  ;;  %v6414_v43 = vmov 0.0  }
 0x4f6   : > { %v4336_v19 = vpop.permute.xlu0 %4335  ;;  %v4333_v26 = vunpack.i.h.bf16 %v4331_v37  ;;  %v4332_v24 = vunpack.i.l.bf16 %v4331_v37 }
 0x4f7   : > { %v4338_v16 = vunpack.i.h.bf16 %v4336_v19  ;;  %v4337_v34 = vunpack.i.l.bf16 %v4336_v19 }
 0x4f8   : > { %v3508_v3 = vsel %vm1224_vm3, %v3499_v56, %v4332_v24  ;;  %v3509_v48 = vsel %vm1224_vm3, %v3500_v8, %v4333_v26 }
 0x4f9   : > { %v3542_v18 = vsel %vm1248_vm7, %v3533_v27, %v4337_v34  ;;  %v3543_v10 = vsel %vm1248_vm7, %v3534_v45, %v4338_v16  ;;  %v4341_v15 = vpop.permute.xlu1 %4340 }
 0x4fa   : > { %v4346_v61 = vpop.permute.xlu0 %4345  ;;  %v4030_v33 = vpack.c.bf16 %v3543_v10, %v3542_v18  ;;  %v4343_v0 = vunpack.i.h.bf16 %v4341_v15  ;;  %v4342_v63 = vunpack.i.l.bf16 %v4341_v15 }
 0x4fb   : > { %v4348_v41 = vunpack.i.h.bf16 %v4346_v61  ;;  %v4347_v62 = vunpack.i.l.bf16 %v4346_v61 }
 0x4fc   : > { %4031 = vmatpush3.bf16.msra.mxu1 %v4030_v33  ;;  %v3517_v13 = vsel %vm1230_vm4, %v3508_v3, %v4342_v63  ;;  %v3518_v28 = vsel %vm1230_vm4, %v3509_v48, %v4343_v0 }
 0x4fd   : > { %4032 = vmatprep.subr.bf16.mxu1 %v4724_v39  ;;  %v4351_v17 = vpop.permute.xlu1 %4350  ;;  %v3526_v31 = vsel %vm1236_vm5, %v3517_v13, %v4347_v62  ;;  %v3527_v12 = vsel %vm1236_vm5, %v3518_v28, %v4348_v41 }
 0x4fe   : > { %v3258_v11 = vpop.permute.xlu0 %3257  ;;  %v4353_v47 = vunpack.i.h.bf16 %v4351_v17  ;;  %v4352_v51 = vunpack.i.l.bf16 %v4351_v17 }
 0x4ff   : > { %v3492_v29 = vsel %vm297_vm0, %v3224_v35, %v3258_v11 }
 0x500   : > { %v3535_v44 = vsel %vm1242_vm6, %v3526_v31, %v4352_v51  ;;  %v3536_v9 = vsel %vm1242_vm6, %v3527_v12, %v4353_v47 }
 0x501   : > { %v4356_v39 = vpop.permute.xlu1 %4355 }
 0x502   : > { %v3294_v22 = vpop.permute.xlu0 %3293  ;;  %v4358_v57 = vunpack.i.h.bf16 %v4356_v39  ;;  %v4357_v2 = vunpack.i.l.bf16 %v4356_v39 }
 0x503   : > { %v3501_v40 = vsel %vm1218_vm2, %v3492_v29, %v3294_v22 }
 0x504   : > { %v3544_v54 = vsel %vm1248_vm7, %v3535_v44, %v4357_v2  ;;  %v3545_v20 = vsel %vm1248_vm7, %v3536_v9, %v4358_v57 }
 0x505   : > { %v3330_v55 = vpop.permute.xlu1 %3329  ;;  %v4033_v21 = vpack.c.bf16 %v3545_v20, %v3544_v54 }
 0x506   : > { %v3366_v52 = vpop.permute.xlu0 %3365  ;;  %v3510_v38 = vsel %vm1224_vm3, %v3501_v40, %v3330_v55 }
 0x507   : > { %4034 = vmatpush3.bf16.msra.mxu1 %v4033_v21  ;;  %v3519_v58 = vsel %vm1230_vm4, %v3510_v38, %v3366_v52 }
 0x508   : > { %4012 = vmatprep.subr.mxu1 %v6414_v43 }
 0x509   : > { %v3402_v53 = vpop.permute.xlu1 %3401 }
 0x50a   : > { %v3438_v50 = vpop.permute.xlu0 %3437  ;;  %v3528_v36 = vsel %vm1236_vm5, %v3519_v58, %v3402_v53 }
 0x50b   : > { %v3537_v49 = vsel %vm1242_vm6, %v3528_v36, %v3438_v50 }
 0x50d   : > { %v3474_v35 = vpop.permute.xlu1 %3473 }
 0x50e   : > { %v3546_v14 = vsel %vm1248_vm7, %v3537_v49, %v3474_v35 }
 0x50f   : > { %4013 = vmatpush3.msra.mxu1 %v3546_v14 }
 0x510   : > { %4015 = vmatmul.mubr.msk.f32.vlgmr.msra.gmra.mrb[0].mxu1 %vm3554_vm1, %v3547_v32 }
 0x51b   : > { %v3552_v19 = vpop.permute.xlu0 %3551 }
 0x5e3   : > { %v3624_v37 = vpop.f32.mrb[0].mxu1 }
 0x5e4   : > { %v3625_v25 = vadd.f32 %v3624_v37, %v3552_v19  ;;  %v4016_v46 = vpop.f32.mrb[1].mxu1 }
 0x5e6   : > { %v3628_v16 = vmax.f32 %v3625_v25, 0.0 }
 0x5e8   : > { %3636 = vrot.lane.b32.xlu0 %v3628_v16, %s4732_s10  ;;  %3630 = vrot.lane.b32.xlu1 %v3628_v16, %s4730_s27  ;;  %s4632_s27 = scalar_lea.vmem %s6334_s8, 1024 }
 0x5e9   : > { %p4633_p4 = scmp.ne.s32.totalorder %s6334_s8, %s4632_s27 }
 0x5eb   : > { %p4634_p6 = pnand %p4633_p4, %p4926_p1 }
 0x5ec   : > { %3642 = vrot.lane.b32.xlu0 %v3628_v16, %s4734_s15  ;;  %3633 = vrot.lane.b32.xlu1 %v3628_v16, %s4729_s17  ;;  %s3796_s17 = scalar_lea.sflag [#allocation7], %s4978_s30 }
 0x5ed   : > { %p4635_p8 = pneg %p4634_p6 }
 0x5f0   : > { %3648 = vrot.lane.b32.xlu0 %v3628_v16, %s4735_s28  ;;  %3639 = vrot.lane.b32.xlu1 %v3628_v16, %s4731_s9  ;;  %s4738_s9 = smov [#allocation14]  }
 0x5f1   : > { %s4636_s10 = sshll.u32 %s4738_s9, 4  ;;  %s4637_s10 = int_to_ptr.vmem [resolvable:$false] %s4636_s10 }
 0x5f2   : > { %s4638_s15 = scalar_lea.vmem %s4637_s10, 2048  ;;  %p4639_p3 = scmp.lt.s32.totalorder %s6334_s8, %s4637_s10 }
 0x5f3   : > { %p4640_p7 = scmp.lt.s32.totalorder %s4638_s15, %s4632_s27 }
 0x5f4   : > { %3645 = vrot.lane.b32.xlu1 %v3628_v16, %s6415_s24 }
 0x5f5   : > { %p4641_p10 = por %p4640_p7, %p4639_p3 }
 0x5f7   : > { %p4642_p13 = pnand %p4641_p10, %p4635_p8 }
 0x65a   : > { %v3637_v34 = vpop.permute.xlu0 %3636  ;;  %v3631_v27 = vpop.permute.xlu1 %3630 }
 0x65b   : > { %v3667_v18 = vcombine.low %v3631_v27, %v3637_v34  ;;  %v3668_v61 = vcombine.high %v3631_v27, %v3637_v34 }
 0x65d   : > { %v3675_v24 = vrot.slane %v3667_v18, %v5046_v30  ;;  %v3682_v60 = vrot.slane %v3668_v61, %v5046_v30 }
 0x65e   : > { %v3643_v45 = vpop.permute.xlu0 %3642  ;;  %v3634_v23 = vpop.permute.xlu1 %3633 }
 0x65f   : > { %v3651_v4 = vcombine.low %v3628_v16, %v3634_v23  ;;  %v3652_v10 = vcombine.high %v3628_v16, %v3634_v23 }
 0x661   : > { %v3659_v15 = vrot.slane %v3651_v4, %v5046_v30  ;;  %v3666_v0 = vrot.slane %v3652_v10, %v5046_v30 }
 0x662   : > { %v3649_v7 = vpop.permute.xlu0 %3648  ;;  %v3640_v1 = vpop.permute.xlu1 %3639 }
 0x663   : > { %v3699_v33 = vcombine.low %v3643_v45, %v3649_v7  ;;  %v3700_v26 = vcombine.high %v3643_v45, %v3649_v7  ;;  %v3715_v5 = vcombine.low %v3659_v15, %v3675_v24  ;;  %v3716_v56 = vcombine.high %v3659_v15, %v3675_v24 }
 0x664   : > { %v3731_v48 = vcombine.low %v3666_v0, %v3682_v60  ;;  %v3732_v41 = vcombine.high %v3666_v0, %v3682_v60 }
 0x665   : > { %v3707_v8 = vrot.slane %v3699_v33, %v5046_v30  ;;  %v3714_v11 = vrot.slane %v3700_v26, %v5046_v30  ;;  %v3723_v51 = vrot.slane %v3715_v5, %v5068_v42  ;;  %v3730_v22 = vrot.slane %v3716_v56, %v5068_v42 }
 0x666   : > { %v3646_v63 = vpop.permute.xlu1 %3645  ;;  %v3746_v2 = vrot.slane %v3732_v41, %v5068_v42 }
 0x667   : > { %v3683_v59 = vcombine.low %v3640_v1, %v3646_v63  ;;  %v3684_v6 = vcombine.high %v3640_v1, %v3646_v63 }
 0x669   : > { %v3691_v17 = vrot.slane %v3683_v59, %v5046_v30  ;;  %v3698_v3 = vrot.slane %v3684_v6, %v5046_v30  ;;  %v3739_v30 = vrot.slane %v3731_v48, %v5068_v42 }
 0x66b   : > { %v3747_v62 = vcombine.low %v3691_v17, %v3707_v8  ;;  %v3748_v13 = vcombine.high %v3691_v17, %v3707_v8  ;;  %v3763_v28 = vcombine.low %v3698_v3, %v3714_v11  ;;  %v3764_v47 = vcombine.high %v3698_v3, %v3714_v11 }
 0x66d   : > { %v3755_v39 = vrot.slane %v3747_v62, %v5068_v42  ;;  %v3762_v31 = vrot.slane %v3748_v13, %v5068_v42  ;;  %v3771_v12 = vrot.slane %v3763_v28, %v5068_v42  ;;  %v3778_v57 = vrot.slane %v3764_v47, %v5068_v42 }
 0x66f   : > { %v3779_v44 = vcombine.low %v3723_v51, %v3755_v39  ;;  %v3780_v9 = vcombine.high %v3723_v51, %v3755_v39  ;;  %v3781_v29 = vcombine.low %v3730_v22, %v3762_v31  ;;  %v3782_v54 = vcombine.high %v3730_v22, %v3762_v31 }
 0x670   : > { %v3783_v20 = vcombine.low %v3739_v30, %v3771_v12  ;;  %v3784_v40 = vcombine.high %v3739_v30, %v3771_v12  ;;  %v3785_v52 = vcombine.low %v3746_v2, %v3778_v57  ;;  %v3786_v55 = vcombine.high %v3746_v2, %v3778_v57 }
 0x671   : > { %3787 = vst.msk [vmem:[%s292_s7] sm:$0xff] %vm297_vm0, %v3779_v44  ;;  %3788 = vst.msk [vmem:[%s292_s7 + $0x8] sm:$0xff] %vm297_vm0, %v3780_v9 }
 0x672   : > { %3789 = vst.msk [vmem:[%s292_s7 + $0x10] sm:$0xff] %vm297_vm0, %v3781_v29  ;;  %3790 = vst.msk [vmem:[%s292_s7 + $0x18] sm:$0xff] %vm297_vm0, %v3782_v54 }
 0x673   : > { %3791 = vst.msk [vmem:[%s292_s7 + $0x20] sm:$0xff] %vm297_vm0, %v3783_v20  ;;  %3792 = vst.msk [vmem:[%s292_s7 + $0x28] sm:$0xff] %vm297_vm0, %v3784_v40 }
 0x674   : > { %3793 = vst.msk [vmem:[%s292_s7 + $0x30] sm:$0xff] %vm297_vm0, %v3785_v52  ;;  %3794 = vst.msk [vmem:[%s292_s7 + $0x38] sm:$0xff] %vm297_vm0, %v3786_v55 }
 0x675   : > { %4645 = shalt.err (!%p4642_p13)
}
 0x676   : > { %s4646_s28 = scalar_lea.hbm %s6332_s16, 1024  ;;  %s4650_s23 = scalar_lea.hbm %s6392_s5, 2048 }
 0x677   : > { %p4647_p0 = scmp.ne.s32.totalorder %s6332_s16, %s4646_s28  ;;  %p4651_p9 = scmp.lt.u32.totalorder %s6332_s16, %s6392_s5 }
 0x678   : > { %p4652_p12 = scmp.lt.u32.totalorder %s4650_s23, %s4646_s28  ;;  %p4654_p4 = scmp.lt.u32.totalorder %s4646_s28, %s6332_s16 }
 0x679   : > { %p4648_p5 = pnand %p4647_p0, %p4926_p1 }
 0x67a   : > { %p4653_p2 = por %p4652_p12, %p4651_p9 }
 0x67b   : > { %p4649_p11 = pneg %p4648_p5 }
 0x67c   : > { %p4655_p6 = por %p4654_p4, %p4653_p2 }
 0x67e   : > { %p4656_p8 = pnand %p4655_p6, %p4649_p11 }
 0x680   : > { %4659 = shalt.err (!%p4656_p8)
}
 0x681   : > { %s4739_s22 = smov 128  }
 0x682   : > { %4053 = dma.vmem_to_hbm [thread:$0]  (%p4926_p1), %s6334_s8, 1024, %s6332_s16, %s3796_s17, %s4739_s22, %s4739_s22, %s4718_s26  }
 0x683 PF: > { %s3824_s13 = sand.u32 1, %s4694_s18   ;;  %p6416_p3 = scmp.ne.s32.totalorder %s6399_s25, 0 }
 0x684   : > { %p6417_p7 = scmp.ge.s32.totalorder %s4706_s21, 2  ;;  %s3825_s27 = scalar_lea.sflag [#allocation7], %s3824_s13 }
 0x686   : > { %p4073_p10 = pnand %p6417_p7, %p6416_p3 }
 0x688   : > { %4689 = dma.done.wait (!%p4073_p10), %s3825_s27, 1024  }
 0x689   : > { %4691 = vsyncadd (!%p4073_p10), %s3825_s27, 4294966272  ;;  %p20_p13 = scmp.ge.s32.totalorder %s4916_s14, 4   ;;  %s6418_s18 = smov %s4698_s19 }
 0x68a   : > { %s6419_s19 = smov %s4702_s20  ;;  %s6420_s20 = smov %s4932_s12 }
 0x68b   : > { %s6421_s21 = smov %s4916_s14  ;;  %22 = sbr.rel (!%p20_p13) target bundleno = 7 (0x7), region = 120 }
 0x692   :  { %3830 = vsyncpa [#allocation6], 1 }
 0x693   :  { %3832 = vsyncpa [#allocation6 + $0x1], 1 }
 0x694   :  { %3833 = vsyncpa [#allocation9], 1 }
 0x695   :  { %3834 = vsyncpa [#allocation12], 1 }
 0x696   :  { %3835 = vsyncpa [#allocation7], 1 }
 0x697   :  { %3837 = vsyncpa [#allocation7 + $0x1], 1 }

</bundles_post_ra>
